<compile_context>
chip_gen: v6e
topology: v6e:2x2x1
jax: 0.10.0
libtpu: 0.0.40
codegen_flags: <defaults>
</compile_context>

<pallas_src>
import functools

import jax
import jax.numpy as jnp
from jax import lax
from jax.experimental import pallas as pl
from jax.experimental.pallas import tpu as pltpu

_LANE = 128


def _round_up(x, m):
    return (x + m - 1) // m * m


def _vmem_budget_bytes():
    """Per-generation scoped-VMEM request (don't ask for all of v7x's 64 MiB)."""
    try:
        cap = getattr(pltpu.get_tpu_info(), "vmem_capacity_bytes", None)
    except Exception:  # noqa: BLE001 - CPU host / query unsupported -> safe fallback
        cap = None
    if not cap:
        return 48 * 1024 * 1024
    return int(min(cap * 3 // 4, 100 * 1024 * 1024))


def _conv_in_lrelu_kernel(x_ref, w_ref, gamma_ref, beta_ref, o_ref, sum_ref, ssq_ref, *,
                          H, W, TH, KH, KW, eps, neg_slope, two_pass):
    """One grid step of conv(k, stride=1, SAME) + InstanceNorm2d + LeakyReLU.

    x_ref:     (1, H, W, Cin_pad)     activations (compute dtype), channels lane-padded
    w_ref:     (KH, KW, Cin_pad, TC)  conv weights (compute dtype)
    gamma_ref: (1, TC), beta_ref: (1, TC)   InstanceNorm affine params (f32)
    o_ref:     (1, TH, W, TC)         output row tile (TH == H on the single-pass path)
    sum_ref / ssq_ref: (1, TC) f32 scratch, used only by the two-pass (H-tiled) path.

    Conv bias is intentionally dropped: InstanceNorm's mean subtraction cancels it.
    """
    cinp = x_ref.shape[-1]
    tc = o_ref.shape[-1]
    ph, pw = KH // 2, KW // 2
    tp = TH * W
    n_pix = H * W
    inv_npix = 1.0 / float(n_pix)

    if two_pass:
        p_id = pl.program_id(2)
        h_id = pl.program_id(3)
        row0 = h_id * TH
    else:
        row0 = 0

    def conv_tile():
        # Row tile [row0, row0+TH) plus one halo row each side (leading-dim reads, no
        # sublane alignment issues).  Halo indices are clamped at the image border; any
        # contribution from a clamped / rolled-past-the-end source is zeroed by the
        # per-tap validity select below (post-roll masking).
        prev = x_ref[0, pl.ds(jnp.maximum(row0 - 1, 0), 1)].reshape(W, cinp)
        main = x_ref[0, pl.ds(row0, TH)].reshape(tp, cinp)
        nxt = x_ref[0, pl.ds(jnp.minimum(row0 + TH, H - 1), 1)].reshape(W, cinp)
        ext = jnp.concatenate([prev, main, nxt], axis=0)          # (tp + 2W, Cin_pad)
        n_ext = tp + 2 * W

        # Global output row / column indices of this tile, flattened to (tp, 1).
        rowi = (lax.broadcasted_iota(jnp.int32, (TH, W, 1), 0) + row0).reshape(tp, 1)
        coli = lax.broadcasted_iota(jnp.int32, (TH, W, 1), 1).reshape(tp, 1)

        acc = jnp.zeros((tp, tc), jnp.float32)
        zero = jnp.zeros((), ext.dtype)
        for kh in range(KH):
            dh = kh - ph
            for kw in range(KW):
                dw = kw - pw
                # xt[q] = x[row(q)+dh, col(q)+dw, :], realised with one static XLU roll.
                shift = (-(W + dh * W + dw)) % n_ext
                xt = pltpu.roll(ext, shift=shift, axis=0)[:tp]
                keep = None
                if dh != 0:
                    keep = (rowi + dh >= 0) & (rowi + dh < H)
                if dw != 0:
                    ck = (coli + dw >= 0) & (coli + dw < W)
                    keep = ck if keep is None else (keep & ck)
                if keep is not None:
                    xt = jnp.where(keep, xt, zero)                # one fused select / tap
                # Per-tap K = Cin_pad matmul (feedback option (b); no patch concatenate).
                # TODO(synk): pair kw taps into K=2*Cin_pad matmuls on v6e/v7x (256-deep MXU).
                acc = acc + jnp.dot(xt, w_ref[kh, kw],
                                    preferred_element_type=jnp.float32)
        return acc

    def normalize_and_store(acc, s1, s2):
        mean = s1 * inv_npix
        var = jnp.maximum(s2 * inv_npix - mean * mean, 0.0)       # one-sweep variance
        scale = gamma_ref[...].astype(jnp.float32) * lax.rsqrt(var + eps)
        shift = beta_ref[...].astype(jnp.float32) - mean * scale
        y = acc * scale + shift                                   # fused IN affine
        y = jnp.where(y >= 0.0, y, neg_slope * y)                 # LeakyReLU(0.01)
        o_ref[0] = y.reshape(TH, W, tc).astype(o_ref.dtype)

    if not two_pass:
        acc = conv_tile()
        s1 = jnp.sum(acc, axis=0, keepdims=True)
        s2 = jnp.sum(acc * acc, axis=0, keepdims=True)
        normalize_and_store(acc, s1, s2)
    else:
        @pl.when(jnp.logical_and(p_id == 0, h_id == 0))
        def _():
            sum_ref[...] = jnp.zeros_like(sum_ref)
            ssq_ref[...] = jnp.zeros_like(ssq_ref)

        acc = conv_tile()

        @pl.when(p_id == 0)
        def _():
            sum_ref[...] += jnp.sum(acc, axis=0, keepdims=True)
            ssq_ref[...] += jnp.sum(acc * acc, axis=0, keepdims=True)

        @pl.when(p_id == 1)
        def _():
            normalize_and_store(acc, sum_ref[...], ssq_ref[...])


def _plan_tiles(H, W, cinp, tc, itemsize, budget, KH, KW, row_tile, force_two_pass):
    """Choose single-pass (whole image / step) vs two-pass H-tiled streamed-IN + row tile."""
    def step_bytes(th):
        tp = th * W
        b = 2 * H * W * cinp * itemsize           # x block (double-buffered)
        b += 2 * KH * KW * cinp * tc * itemsize   # weights
        b += 2 * th * W * tc * itemsize           # output blocks
        b += tp * tc * 4                          # f32 accumulator
        b += tp * tc * 4                          # normalised tile before cast/store
        b += 2 * (tp + 2 * W) * cinp * itemsize   # ext + one rolled/masked tap
        b += 2 * 1024 * 1024                      # compiler-scratch slack
        return b

    fit = int(budget * 0.7)
    if row_tile is not None:
        if row_tile >= H:
            return False, H
        assert H % row_tile == 0 and row_tile % 8 == 0, \
            "row_tile must divide H and be a multiple of 8"
        return True, row_tile
    if not force_two_pass and step_bytes(H) <= fit:
        return False, H
    cands = [t for t in range(8, H, 8) if H % t == 0]
    if not cands:                                 # H too small / not 8-aligned
        return False, H
    for t in sorted(cands, reverse=True):
        if step_bytes(t) <= fit:
            return True, t
    return True, min(cands)


def _conv_in_lrelu_layer(x, w, gamma, beta, *, eps=1e-5, neg_slope=0.01,
                         row_tile=None, force_two_pass=False):
    """One fused conv(stride=1, SAME) + InstanceNorm + LeakyReLU layer.

    x: (N, H, W, Cin_pad) with Cin_pad a multiple of 128 (lane-dense).
    w: (KH, KW, Cin_pad, Cout_pad);  gamma/beta: (1, Cout_pad) float32.
    """
    N, H, W, cinp = x.shape
    KH, KW, cin_w, coutp = w.shape
    assert cin_w == cinp and coutp % _LANE == 0
    assert KH % 2 == 1 and KW % 2 == 1, "SAME padding requires odd kernel sizes"
    assert W % 8 == 0, "W must be a multiple of 8 (sublane-aligned flatten/store)"

    itemsize = jnp.dtype(x.dtype).itemsize
    # Cout tile: 256 only for deep small-spatial stages; 128 keeps per-step VMEM low.
    tc = 256 if (coutp % 256 == 0 and H * W <= 4096) else _LANE
    n_ct = coutp // tc
    budget = _vmem_budget_bytes()
    two_pass, th = _plan_tiles(H, W, cinp, tc, itemsize, budget, KH, KW,
                               row_tile, force_two_pass)

    kernel = functools.partial(_conv_in_lrelu_kernel, H=H, W=W, TH=th, KH=KH, KW=KW,
                               eps=eps, neg_slope=neg_slope, two_pass=two_pass)

    if two_pass:
        n_ht = H // th
        grid = (N, n_ct, 2, n_ht)
        in_specs = [
            pl.BlockSpec((1, H, W, cinp), lambda n, c, p, h: (n, 0, 0, 0)),
            pl.BlockSpec((KH, KW, cinp, tc), lambda n, c, p, h: (0, 0, 0, c)),
            pl.BlockSpec((1, tc), lambda n, c, p, h: (0, c)),
            pl.BlockSpec((1, tc), lambda n, c, p, h: (0, c)),
        ]
        # Pass 0 (stats) never writes; mapping it onto the h=0 block keeps the output
        # block index constant so nothing is flushed to HBM before pass 1 writes real data.
        out_specs = pl.BlockSpec((1, th, W, tc), lambda n, c, p, h: (n, h * p, 0, c))
        dims = ("parallel", "parallel", "arbitrary", "arbitrary")
    else:
        grid = (N, n_ct)
        in_specs = [
            pl.BlockSpec((1, H, W, cinp), lambda n, c: (n, 0, 0, 0)),
            pl.BlockSpec((KH, KW, cinp, tc), lambda n, c: (0, 0, 0, c)),
            pl.BlockSpec((1, tc), lambda n, c: (0, c)),
            pl.BlockSpec((1, tc), lambda n, c: (0, c)),
        ]
        out_specs = pl.BlockSpec((1, H, W, tc), lambda n, c: (n, 0, 0, c))
        dims = ("parallel", "parallel")

    return pl.pallas_call(
        kernel,
        out_shape=jax.ShapeDtypeStruct((N, H, W, coutp), x.dtype),
        grid_spec=pltpu.PrefetchScalarGridSpec(
            num_scalar_prefetch=0,
            grid=grid,
            in_specs=in_specs,
            out_specs=out_specs,
            scratch_shapes=[pltpu.VMEM((1, tc), jnp.float32),
                            pltpu.VMEM((1, tc), jnp.float32)]),
        compiler_params=pltpu.CompilerParams(
            dimension_semantics=dims,
            vmem_limit_bytes=budget),
    )(x, w, gamma, beta)


def init_conv_block_params(key, in_channels, out_channels, kernel_size=3,
                           n_convs=2, dtype=jnp.float32):
    """PyTorch-like parameter init. Conv weight stored (KH, KW, Cin, Cout).  The bias is
    kept for the reference even though the fused kernel drops it (cancelled by IN)."""
    params = []
    cin = in_channels
    for _ in range(n_convs):
        key, k1, k2 = jax.random.split(key, 3)
        fan_in = cin * kernel_size * kernel_size
        bound = float(fan_in) ** -0.5
        w = jax.random.uniform(k1, (kernel_size, kernel_size, cin, out_channels),
                               dtype, -bound, bound)
        b = jax.random.uniform(k2, (1, out_channels), dtype, -bound, bound)
        gamma = jnp.ones((1, out_channels), dtype)
        beta = jnp.zeros((1, out_channels), dtype)
        params.append((w, b, gamma, beta))
        cin = out_channels
    return params


def conv_block_forward(x_nchw, params, *, compute_dtype=jnp.float32,
                       eps=1e-5, neg_slope=0.01, row_tile=None, force_two_pass=False):
    """ConvBlock forward (stride=1). x_nchw: (N, Cin, H, W) -> (N, Cout, H, W)."""
    out_dtype = x_nchw.dtype
    x = jnp.transpose(x_nchw, (0, 2, 3, 1)).astype(compute_dtype)   # NHWC (channels->lanes)
    cout = None
    for (w, _b, gamma, beta) in params:               # conv bias is dead under InstanceNorm
        KH, KW, cin, cout = w.shape
        cinp = _round_up(cin, _LANE)
        coutp = _round_up(cout, _LANE)
        if x.shape[-1] != cinp:
            x = jnp.pad(x, ((0, 0), (0, 0), (0, 0), (0, cinp - x.shape[-1])))
        w_p = jnp.pad(w, ((0, 0), (0, 0), (0, cinp - cin), (0, coutp - cout))
                      ).astype(compute_dtype)
        gamma_p = jnp.pad(gamma, ((0, 0), (0, coutp - cout))).astype(jnp.float32)
        beta_p = jnp.pad(beta, ((0, 0), (0, coutp - cout))).astype(jnp.float32)
        x = _conv_in_lrelu_layer(x, w_p, gamma_p, beta_p, eps=eps, neg_slope=neg_slope,
                                 row_tile=row_tile, force_two_pass=force_two_pass)
    y = x[..., :cout].astype(out_dtype)
    return jnp.transpose(y, (0, 3, 1, 2))             # back to NCHW


def _reference_forward(x_nchw, params, eps=1e-5, neg_slope=0.01):
    """Pure-JAX reference (for self-check)."""
    x = x_nchw
    for (w, b, gamma, beta) in params:
        w_oihw = jnp.transpose(w, (3, 2, 0, 1))
        y = lax.conv_general_dilated(
            x, w_oihw, window_strides=(1, 1), padding="SAME",
            dimension_numbers=("NCHW", "OIHW", "NCHW"))
        y = y + b.reshape(1, -1, 1, 1)
        mean = jnp.mean(y, axis=(2, 3), keepdims=True)
        var = jnp.mean((y - mean) ** 2, axis=(2, 3), keepdims=True)
        y = (y - mean) * lax.rsqrt(var + eps)
        y = y * gamma.reshape(1, -1, 1, 1) + beta.reshape(1, -1, 1, 1)
        x = jnp.where(y >= 0.0, y, neg_slope * y)
    return x


if __name__ == "__main__":
    key = jax.random.PRNGKey(0)
    kx, kp, kx2 = jax.random.split(key, 3)

    N, Cin, Cout, H, W = 2, 4, 8, 16, 16
    x = jax.random.normal(kx, (N, Cin, H, W), jnp.float32)
    params = init_conv_block_params(kp, Cin, Cout, kernel_size=3, n_convs=2)
    ref = _reference_forward(x, params)

    # 1) f32, single-pass fused path (auto-selected for small spatial stages).
    fwd_f32 = jax.jit(functools.partial(conv_block_forward, compute_dtype=jnp.float32))
    out = jax.block_until_ready(fwd_f32(x, params))
    assert out.shape == (N, Cout, H, W), out.shape
    err = float(jnp.max(jnp.abs(out - ref)))
    assert jnp.allclose(out, ref, atol=2e-4, rtol=2e-4), err

    # 2) bf16 operands (f32 accumulation / InstanceNorm stats) - fast path on v6e/v7x.
    fwd_bf16 = jax.jit(functools.partial(conv_block_forward, compute_dtype=jnp.bfloat16))
    out_bf16 = jax.block_until_ready(fwd_bf16(x, params)).astype(jnp.float32)
    assert out_bf16.shape == (N, Cout, H, W), out_bf16.shape
    err_bf = float(jnp.max(jnp.abs(out_bf16 - ref)))
    assert jnp.allclose(out_bf16, ref, atol=1.5e-1, rtol=1.5e-1), err_bf

    # 3) H-tiled, two-pass streamed-InstanceNorm path (what large UNet stages use),
    #    forced on a larger image so the halo / scratch-stat code paths all execute.
    H2 = W2 = 32
    x2 = jax.random.normal(kx2, (1, Cin, H2, W2), jnp.float32)
    ref2 = _reference_forward(x2, params)
    fwd_tiled = jax.jit(functools.partial(conv_block_forward, compute_dtype=jnp.float32,
                                          row_tile=8, force_two_pass=True))
    out2 = jax.block_until_ready(fwd_tiled(x2, params))
    assert out2.shape == (1, Cout, H2, W2), out2.shape
    err2 = float(jnp.max(jnp.abs(out2 - ref2)))
    assert jnp.allclose(out2, ref2, atol=2e-4, rtol=2e-4), err2

    print("KERNEL_OK")
</pallas_src>

<mosaic_0001>
module attributes {stable_mosaic.version = 11 : i64} {
  func.func @_conv_in_lrelu_kernel(%arg0: i32, %arg1: i32, %arg2: memref<1x16x16x128xf32, #tpu.memory_space<vmem>>, %arg3: memref<3x3x128x128xf32, #tpu.memory_space<vmem>>, %arg4: memref<1x128xf32, #tpu.memory_space<vmem>>, %arg5: memref<1x128xf32, #tpu.memory_space<vmem>>, %arg6: memref<1x16x16x128xf32, #tpu.memory_space<vmem>>, %arg7: memref<1x128xf32, #tpu.memory_space<vmem>>, %arg8: memref<1x128xf32, #tpu.memory_space<vmem>>) attributes {dimension_semantics = [#tpu.dimension_semantics<parallel>, #tpu.dimension_semantics<parallel>], iteration_bounds = array<i64: 2, 1>, scalar_prefetch = 0 : i64, scratch_operands = 2 : i64, tpu.core_type = #tpu.core_type<tc>, window_params = [{transform_indices = @transform_0, window_bounds = array<i64: 1, 16, 16, 128>}, {transform_indices = @transform_1, window_bounds = array<i64: 3, 3, 128, 128>}, {transform_indices = @transform_2, window_bounds = array<i64: 1, 128>}, {transform_indices = @transform_3, window_bounds = array<i64: 1, 128>}, {transform_indices = @transform_4, window_bounds = array<i64: 1, 16, 16, 128>}]} {
    %c-1_i32 = arith.constant -1 : i32
    %c0_i32 = arith.constant 0 : i32
    %0 = arith.maxsi %c-1_i32, %c0_i32 : i32
    %c0 = arith.constant 0 : index
    %1 = arith.index_cast %0 : i32 to index
    %c0_0 = arith.constant 0 : index
    %c0_1 = arith.constant 0 : index
    %2 = vector.load %arg2[%c0, %1, %c0_0, %c0_1] : memref<1x16x16x128xf32, #tpu.memory_space<vmem>>, vector<1x1x16x128xf32>
    %3 = vector.shape_cast %2 : vector<1x1x16x128xf32> to vector<1x16x128xf32>
    %4 = vector.shape_cast %3 : vector<1x16x128xf32> to vector<16x128xf32>
    %c0_2 = arith.constant 0 : index
    %c0_3 = arith.constant 0 : index
    %c0_4 = arith.constant 0 : index
    %c0_5 = arith.constant 0 : index
    %5 = vector.load %arg2[%c0_2, %c0_3, %c0_4, %c0_5] : memref<1x16x16x128xf32, #tpu.memory_space<vmem>>, vector<1x16x16x128xf32>
    %6 = vector.shape_cast %5 : vector<1x16x16x128xf32> to vector<16x16x128xf32>
    %7 = vector.shape_cast %6 : vector<16x16x128xf32> to vector<256x128xf32>
    %c16_i32 = arith.constant 16 : i32
    %c15_i32 = arith.constant 15 : i32
    %8 = arith.minsi %c16_i32, %c15_i32 : i32
    %c0_6 = arith.constant 0 : index
    %9 = arith.index_cast %8 : i32 to index
    %c0_7 = arith.constant 0 : index
    %c0_8 = arith.constant 0 : index
    %10 = vector.load %arg2[%c0_6, %9, %c0_7, %c0_8] : memref<1x16x16x128xf32, #tpu.memory_space<vmem>>, vector<1x1x16x128xf32>
    %11 = vector.shape_cast %10 : vector<1x1x16x128xf32> to vector<1x16x128xf32>
    %12 = vector.shape_cast %11 : vector<1x16x128xf32> to vector<16x128xf32>
    %13 = tpu.concatenate %4, %7, %12 in 0 : vector<16x128xf32>, vector<256x128xf32>, vector<16x128xf32> -> vector<288x128xf32>
    %14 = tpu.iota {dimensions = array<i32: 0>} : vector<16x16x1xi32>
    %c0_i32_9 = arith.constant 0 : i32
    %15 = vector.broadcast %c0_i32_9 : i32 to vector<16x16x1xi32>
    %16 = arith.addi %14, %15 : vector<16x16x1xi32>
    %17 = vector.shape_cast %16 : vector<16x16x1xi32> to vector<256x1xi32>
    %18 = tpu.iota {dimensions = array<i32: 1>} : vector<16x16x1xi32>
    %19 = vector.shape_cast %18 : vector<16x16x1xi32> to vector<256x1xi32>
    %cst = arith.constant 0.000000e+00 : f32
    %20 = vector.broadcast %cst : f32 to vector<256x128xf32>
    %c1_i32 = arith.constant 1 : i32
    %21 = tpu.dynamic_rotate %13 by %c1_i32 dim 0 : vector<288x128xf32>, i32 -> vector<288x128xf32>
    %22 = vector.extract_strided_slice %21 {offsets = [0, 0], sizes = [256, 128], strides = [1, 1]} : vector<288x128xf32> to vector<256x128xf32>
    %c-1_i32_10 = arith.constant -1 : i32
    %23 = vector.broadcast %c-1_i32_10 : i32 to vector<256x1xi32>
    %24 = arith.addi %17, %23 : vector<256x1xi32>
    %c0_i32_11 = arith.constant 0 : i32
    %25 = vector.broadcast %c0_i32_11 : i32 to vector<256x1xi32>
    %26 = arith.cmpi sge, %24, %25 : vector<256x1xi32>
    %c-1_i32_12 = arith.constant -1 : i32
    %27 = vector.broadcast %c-1_i32_12 : i32 to vector<256x1xi32>
    %28 = arith.addi %17, %27 : vector<256x1xi32>
    %c16_i32_13 = arith.constant 16 : i32
    %29 = vector.broadcast %c16_i32_13 : i32 to vector<256x1xi32>
    %30 = arith.cmpi slt, %28, %29 : vector<256x1xi32>
    %31 = arith.andi %26, %30 : vector<256x1xi1>
    %c-1_i32_14 = arith.constant -1 : i32
    %32 = vector.broadcast %c-1_i32_14 : i32 to vector<256x1xi32>
    %33 = arith.addi %19, %32 : vector<256x1xi32>
    %c0_i32_15 = arith.constant 0 : i32
    %34 = vector.broadcast %c0_i32_15 : i32 to vector<256x1xi32>
    %35 = arith.cmpi sge, %33, %34 : vector<256x1xi32>
    %c-1_i32_16 = arith.constant -1 : i32
    %36 = vector.broadcast %c-1_i32_16 : i32 to vector<256x1xi32>
    %37 = arith.addi %19, %36 : vector<256x1xi32>
    %c16_i32_17 = arith.constant 16 : i32
    %38 = vector.broadcast %c16_i32_17 : i32 to vector<256x1xi32>
    %39 = arith.cmpi slt, %37, %38 : vector<256x1xi32>
    %40 = arith.andi %35, %39 : vector<256x1xi1>
    %41 = arith.andi %31, %40 : vector<256x1xi1>
    %cst_18 = arith.constant 0.000000e+00 : f32
    %42 = vector.shape_cast %41 : vector<256x1xi1> to vector<256x1xi1>
    %43 = vector.broadcast %42 : vector<256x1xi1> to vector<256x128xi1>
    %44 = vector.broadcast %cst_18 : f32 to vector<256x128xf32>
    %45 = arith.select %43, %22, %44 : vector<256x128xi1>, vector<256x128xf32>
    %c0_19 = arith.constant 0 : index
    %c0_20 = arith.constant 0 : index
    %c0_21 = arith.constant 0 : index
    %c0_22 = arith.constant 0 : index
    %46 = vector.load %arg3[%c0_19, %c0_20, %c0_21, %c0_22] : memref<3x3x128x128xf32, #tpu.memory_space<vmem>>, vector<1x1x128x128xf32>
    %47 = vector.shape_cast %46 : vector<1x1x128x128xf32> to vector<128x128xf32>
    %cst_23 = arith.constant dense<0.000000e+00> : vector<256x128xf32>
    %48 = tpu.matmul %45, %47, %cst_23 {dimension_numbers = #tpu.dot_dimension_numbers<[1], [0], [0], [1], [0, 0, 1, 1], [], []>} : vector<256x128xf32>, vector<128x128xf32>, vector<256x128xf32> -> vector<256x128xf32>
    %49 = arith.addf %20, %48 : vector<256x128xf32>
    %c0_i32_24 = arith.constant 0 : i32
    %50 = tpu.dynamic_rotate %13 by %c0_i32_24 dim 0 : vector<288x128xf32>, i32 -> vector<288x128xf32>
    %51 = vector.extract_strided_slice %50 {offsets = [0, 0], sizes = [256, 128], strides = [1, 1]} : vector<288x128xf32> to vector<256x128xf32>
    %c-1_i32_25 = arith.constant -1 : i32
    %52 = vector.broadcast %c-1_i32_25 : i32 to vector<256x1xi32>
    %53 = arith.addi %17, %52 : vector<256x1xi32>
    %c0_i32_26 = arith.constant 0 : i32
    %54 = vector.broadcast %c0_i32_26 : i32 to vector<256x1xi32>
    %55 = arith.cmpi sge, %53, %54 : vector<256x1xi32>
    %c-1_i32_27 = arith.constant -1 : i32
    %56 = vector.broadcast %c-1_i32_27 : i32 to vector<256x1xi32>
    %57 = arith.addi %17, %56 : vector<256x1xi32>
    %c16_i32_28 = arith.constant 16 : i32
    %58 = vector.broadcast %c16_i32_28 : i32 to vector<256x1xi32>
    %59 = arith.cmpi slt, %57, %58 : vector<256x1xi32>
    %60 = arith.andi %55, %59 : vector<256x1xi1>
    %cst_29 = arith.constant 0.000000e+00 : f32
    %61 = vector.shape_cast %60 : vector<256x1xi1> to vector<256x1xi1>
    %62 = vector.broadcast %61 : vector<256x1xi1> to vector<256x128xi1>
    %63 = vector.broadcast %cst_29 : f32 to vector<256x128xf32>
    %64 = arith.select %62, %51, %63 : vector<256x128xi1>, vector<256x128xf32>
    %c0_30 = arith.constant 0 : index
    %c1 = arith.constant 1 : index
    %c0_31 = arith.constant 0 : index
    %c0_32 = arith.constant 0 : index
    %65 = vector.load %arg3[%c0_30, %c1, %c0_31, %c0_32] : memref<3x3x128x128xf32, #tpu.memory_space<vmem>>, vector<1x1x128x128xf32>
    %66 = vector.shape_cast %65 : vector<1x1x128x128xf32> to vector<128x128xf32>
    %cst_33 = arith.constant dense<0.000000e+00> : vector<256x128xf32>
    %67 = tpu.matmul %64, %66, %cst_33 {dimension_numbers = #tpu.dot_dimension_numbers<[1], [0], [0], [1], [0, 0, 1, 1], [], []>} : vector<256x128xf32>, vector<128x128xf32>, vector<256x128xf32> -> vector<256x128xf32>
    %68 = arith.addf %49, %67 : vector<256x128xf32>
    %c287_i32 = arith.constant 287 : i32
    %69 = tpu.dynamic_rotate %13 by %c287_i32 dim 0 : vector<288x128xf32>, i32 -> vector<288x128xf32>
    %70 = vector.extract_strided_slice %69 {offsets = [0, 0], sizes = [256, 128], strides = [1, 1]} : vector<288x128xf32> to vector<256x128xf32>
    %c-1_i32_34 = arith.constant -1 : i32
    %71 = vector.broadcast %c-1_i32_34 : i32 to vector<256x1xi32>
    %72 = arith.addi %17, %71 : vector<256x1xi32>
    %c0_i32_35 = arith.constant 0 : i32
    %73 = vector.broadcast %c0_i32_35 : i32 to vector<256x1xi32>
    %74 = arith.cmpi sge, %72, %73 : vector<256x1xi32>
    %c-1_i32_36 = arith.constant -1 : i32
    %75 = vector.broadcast %c-1_i32_36 : i32 to vector<256x1xi32>
    %76 = arith.addi %17, %75 : vector<256x1xi32>
    %c16_i32_37 = arith.constant 16 : i32
    %77 = vector.broadcast %c16_i32_37 : i32 to vector<256x1xi32>
    %78 = arith.cmpi slt, %76, %77 : vector<256x1xi32>
    %79 = arith.andi %74, %78 : vector<256x1xi1>
    %c1_i32_38 = arith.constant 1 : i32
    %80 = vector.broadcast %c1_i32_38 : i32 to vector<256x1xi32>
    %81 = arith.addi %19, %80 : vector<256x1xi32>
    %c0_i32_39 = arith.constant 0 : i32
    %82 = vector.broadcast %c0_i32_39 : i32 to vector<256x1xi32>
    %83 = arith.cmpi sge, %81, %82 : vector<256x1xi32>
    %c1_i32_40 = arith.constant 1 : i32
    %84 = vector.broadcast %c1_i32_40 : i32 to vector<256x1xi32>
    %85 = arith.addi %19, %84 : vector<256x1xi32>
    %c16_i32_41 = arith.constant 16 : i32
    %86 = vector.broadcast %c16_i32_41 : i32 to vector<256x1xi32>
    %87 = arith.cmpi slt, %85, %86 : vector<256x1xi32>
    %88 = arith.andi %83, %87 : vector<256x1xi1>
    %89 = arith.andi %79, %88 : vector<256x1xi1>
    %cst_42 = arith.constant 0.000000e+00 : f32
    %90 = vector.shape_cast %89 : vector<256x1xi1> to vector<256x1xi1>
    %91 = vector.broadcast %90 : vector<256x1xi1> to vector<256x128xi1>
    %92 = vector.broadcast %cst_42 : f32 to vector<256x128xf32>
    %93 = arith.select %91, %70, %92 : vector<256x128xi1>, vector<256x128xf32>
    %c0_43 = arith.constant 0 : index
    %c2 = arith.constant 2 : index
    %c0_44 = arith.constant 0 : index
    %c0_45 = arith.constant 0 : index
    %94 = vector.load %arg3[%c0_43, %c2, %c0_44, %c0_45] : memref<3x3x128x128xf32, #tpu.memory_space<vmem>>, vector<1x1x128x128xf32>
    %95 = vector.shape_cast %94 : vector<1x1x128x128xf32> to vector<128x128xf32>
    %cst_46 = arith.constant dense<0.000000e+00> : vector<256x128xf32>
    %96 = tpu.matmul %93, %95, %cst_46 {dimension_numbers = #tpu.dot_dimension_numbers<[1], [0], [0], [1], [0, 0, 1, 1], [], []>} : vector<256x128xf32>, vector<128x128xf32>, vector<256x128xf32> -> vector<256x128xf32>
    %97 = arith.addf %68, %96 : vector<256x128xf32>
    %c273_i32 = arith.constant 273 : i32
    %98 = tpu.dynamic_rotate %13 by %c273_i32 dim 0 : vector<288x128xf32>, i32 -> vector<288x128xf32>
    %99 = vector.extract_strided_slice %98 {offsets = [0, 0], sizes = [256, 128], strides = [1, 1]} : vector<288x128xf32> to vector<256x128xf32>
    %c-1_i32_47 = arith.constant -1 : i32
    %100 = vector.broadcast %c-1_i32_47 : i32 to vector<256x1xi32>
    %101 = arith.addi %19, %100 : vector<256x1xi32>
    %c0_i32_48 = arith.constant 0 : i32
    %102 = vector.broadcast %c0_i32_48 : i32 to vector<256x1xi32>
    %103 = arith.cmpi sge, %101, %102 : vector<256x1xi32>
    %c-1_i32_49 = arith.constant -1 : i32
    %104 = vector.broadcast %c-1_i32_49 : i32 to vector<256x1xi32>
    %105 = arith.addi %19, %104 : vector<256x1xi32>
    %c16_i32_50 = arith.constant 16 : i32
    %106 = vector.broadcast %c16_i32_50 : i32 to vector<256x1xi32>
    %107 = arith.cmpi slt, %105, %106 : vector<256x1xi32>
    %108 = arith.andi %103, %107 : vector<256x1xi1>
    %cst_51 = arith.constant 0.000000e+00 : f32
    %109 = vector.shape_cast %108 : vector<256x1xi1> to vector<256x1xi1>
    %110 = vector.broadcast %109 : vector<256x1xi1> to vector<256x128xi1>
    %111 = vector.broadcast %cst_51 : f32 to vector<256x128xf32>
    %112 = arith.select %110, %99, %111 : vector<256x128xi1>, vector<256x128xf32>
    %c1_52 = arith.constant 1 : index
    %c0_53 = arith.constant 0 : index
    %c0_54 = arith.constant 0 : index
    %c0_55 = arith.constant 0 : index
    %113 = vector.load %arg3[%c1_52, %c0_53, %c0_54, %c0_55] : memref<3x3x128x128xf32, #tpu.memory_space<vmem>>, vector<1x1x128x128xf32>
    %114 = vector.shape_cast %113 : vector<1x1x128x128xf32> to vector<128x128xf32>
    %cst_56 = arith.constant dense<0.000000e+00> : vector<256x128xf32>
    %115 = tpu.matmul %112, %114, %cst_56 {dimension_numbers = #tpu.dot_dimension_numbers<[1], [0], [0], [1], [0, 0, 1, 1], [], []>} : vector<256x128xf32>, vector<128x128xf32>, vector<256x128xf32> -> vector<256x128xf32>
    %116 = arith.addf %97, %115 : vector<256x128xf32>
    %c272_i32 = arith.constant 272 : i32
    %117 = tpu.dynamic_rotate %13 by %c272_i32 dim 0 : vector<288x128xf32>, i32 -> vector<288x128xf32>
    %118 = vector.extract_strided_slice %117 {offsets = [0, 0], sizes = [256, 128], strides = [1, 1]} : vector<288x128xf32> to vector<256x128xf32>
    %c1_57 = arith.constant 1 : index
    %c1_58 = arith.constant 1 : index
    %c0_59 = arith.constant 0 : index
    %c0_60 = arith.constant 0 : index
    %119 = vector.load %arg3[%c1_57, %c1_58, %c0_59, %c0_60] : memref<3x3x128x128xf32, #tpu.memory_space<vmem>>, vector<1x1x128x128xf32>
    %120 = vector.shape_cast %119 : vector<1x1x128x128xf32> to vector<128x128xf32>
    %cst_61 = arith.constant dense<0.000000e+00> : vector<256x128xf32>
    %121 = tpu.matmul %118, %120, %cst_61 {dimension_numbers = #tpu.dot_dimension_numbers<[1], [0], [0], [1], [0, 0, 1, 1], [], []>} : vector<256x128xf32>, vector<128x128xf32>, vector<256x128xf32> -> vector<256x128xf32>
    %122 = arith.addf %116, %121 : vector<256x128xf32>
    %c271_i32 = arith.constant 271 : i32
    %123 = tpu.dynamic_rotate %13 by %c271_i32 dim 0 : vector<288x128xf32>, i32 -> vector<288x128xf32>
    %124 = vector.extract_strided_slice %123 {offsets = [0, 0], sizes = [256, 128], strides = [1, 1]} : vector<288x128xf32> to vector<256x128xf32>
    %c1_i32_62 = arith.constant 1 : i32
    %125 = vector.broadcast %c1_i32_62 : i32 to vector<256x1xi32>
    %126 = arith.addi %19, %125 : vector<256x1xi32>
    %c0_i32_63 = arith.constant 0 : i32
    %127 = vector.broadcast %c0_i32_63 : i32 to vector<256x1xi32>
    %128 = arith.cmpi sge, %126, %127 : vector<256x1xi32>
    %c1_i32_64 = arith.constant 1 : i32
    %129 = vector.broadcast %c1_i32_64 : i32 to vector<256x1xi32>
    %130 = arith.addi %19, %129 : vector<256x1xi32>
    %c16_i32_65 = arith.constant 16 : i32
    %131 = vector.broadcast %c16_i32_65 : i32 to vector<256x1xi32>
    %132 = arith.cmpi slt, %130, %131 : vector<256x1xi32>
    %133 = arith.andi %128, %132 : vector<256x1xi1>
    %cst_66 = arith.constant 0.000000e+00 : f32
    %134 = vector.shape_cast %133 : vector<256x1xi1> to vector<256x1xi1>
    %135 = vector.broadcast %134 : vector<256x1xi1> to vector<256x128xi1>
    %136 = vector.broadcast %cst_66 : f32 to vector<256x128xf32>
    %137 = arith.select %135, %124, %136 : vector<256x128xi1>, vector<256x128xf32>
    %c1_67 = arith.constant 1 : index
    %c2_68 = arith.constant 2 : index
    %c0_69 = arith.constant 0 : index
    %c0_70 = arith.constant 0 : index
    %138 = vector.load %arg3[%c1_67, %c2_68, %c0_69, %c0_70] : memref<3x3x128x128xf32, #tpu.memory_space<vmem>>, vector<1x1x128x128xf32>
    %139 = vector.shape_cast %138 : vector<1x1x128x128xf32> to vector<128x128xf32>
    %cst_71 = arith.constant dense<0.000000e+00> : vector<256x128xf32>
    %140 = tpu.matmul %137, %139, %cst_71 {dimension_numbers = #tpu.dot_dimension_numbers<[1], [0], [0], [1], [0, 0, 1, 1], [], []>} : vector<256x128xf32>, vector<128x128xf32>, vector<256x128xf32> -> vector<256x128xf32>
    %141 = arith.addf %122, %140 : vector<256x128xf32>
    %c257_i32 = arith.constant 257 : i32
    %142 = tpu.dynamic_rotate %13 by %c257_i32 dim 0 : vector<288x128xf32>, i32 -> vector<288x128xf32>
    %143 = vector.extract_strided_slice %142 {offsets = [0, 0], sizes = [256, 128], strides = [1, 1]} : vector<288x128xf32> to vector<256x128xf32>
    %c1_i32_72 = arith.constant 1 : i32
    %144 = vector.broadcast %c1_i32_72 : i32 to vector<256x1xi32>
    %145 = arith.addi %17, %144 : vector<256x1xi32>
    %c0_i32_73 = arith.constant 0 : i32
    %146 = vector.broadcast %c0_i32_73 : i32 to vector<256x1xi32>
    %147 = arith.cmpi sge, %145, %146 : vector<256x1xi32>
    %c1_i32_74 = arith.constant 1 : i32
    %148 = vector.broadcast %c1_i32_74 : i32 to vector<256x1xi32>
    %149 = arith.addi %17, %148 : vector<256x1xi32>
    %c16_i32_75 = arith.constant 16 : i32
    %150 = vector.broadcast %c16_i32_75 : i32 to vector<256x1xi32>
    %151 = arith.cmpi slt, %149, %150 : vector<256x1xi32>
    %152 = arith.andi %147, %151 : vector<256x1xi1>
    %c-1_i32_76 = arith.constant -1 : i32
    %153 = vector.broadcast %c-1_i32_76 : i32 to vector<256x1xi32>
    %154 = arith.addi %19, %153 : vector<256x1xi32>
    %c0_i32_77 = arith.constant 0 : i32
    %155 = vector.broadcast %c0_i32_77 : i32 to vector<256x1xi32>
    %156 = arith.cmpi sge, %154, %155 : vector<256x1xi32>
    %c-1_i32_78 = arith.constant -1 : i32
    %157 = vector.broadcast %c-1_i32_78 : i32 to vector<256x1xi32>
    %158 = arith.addi %19, %157 : vector<256x1xi32>
    %c16_i32_79 = arith.constant 16 : i32
    %159 = vector.broadcast %c16_i32_79 : i32 to vector<256x1xi32>
    %160 = arith.cmpi slt, %158, %159 : vector<256x1xi32>
    %161 = arith.andi %156, %160 : vector<256x1xi1>
    %162 = arith.andi %152, %161 : vector<256x1xi1>
    %cst_80 = arith.constant 0.000000e+00 : f32
    %163 = vector.shape_cast %162 : vector<256x1xi1> to vector<256x1xi1>
    %164 = vector.broadcast %163 : vector<256x1xi1> to vector<256x128xi1>
    %165 = vector.broadcast %cst_80 : f32 to vector<256x128xf32>
    %166 = arith.select %164, %143, %165 : vector<256x128xi1>, vector<256x128xf32>
    %c2_81 = arith.constant 2 : index
    %c0_82 = arith.constant 0 : index
    %c0_83 = arith.constant 0 : index
    %c0_84 = arith.constant 0 : index
    %167 = vector.load %arg3[%c2_81, %c0_82, %c0_83, %c0_84] : memref<3x3x128x128xf32, #tpu.memory_space<vmem>>, vector<1x1x128x128xf32>
    %168 = vector.shape_cast %167 : vector<1x1x128x128xf32> to vector<128x128xf32>
    %cst_85 = arith.constant dense<0.000000e+00> : vector<256x128xf32>
    %169 = tpu.matmul %166, %168, %cst_85 {dimension_numbers = #tpu.dot_dimension_numbers<[1], [0], [0], [1], [0, 0, 1, 1], [], []>} : vector<256x128xf32>, vector<128x128xf32>, vector<256x128xf32> -> vector<256x128xf32>
    %170 = arith.addf %141, %169 : vector<256x128xf32>
    %c256_i32 = arith.constant 256 : i32
    %171 = tpu.dynamic_rotate %13 by %c256_i32 dim 0 : vector<288x128xf32>, i32 -> vector<288x128xf32>
    %172 = vector.extract_strided_slice %171 {offsets = [0, 0], sizes = [256, 128], strides = [1, 1]} : vector<288x128xf32> to vector<256x128xf32>
    %c1_i32_86 = arith.constant 1 : i32
    %173 = vector.broadcast %c1_i32_86 : i32 to vector<256x1xi32>
    %174 = arith.addi %17, %173 : vector<256x1xi32>
    %c0_i32_87 = arith.constant 0 : i32
    %175 = vector.broadcast %c0_i32_87 : i32 to vector<256x1xi32>
    %176 = arith.cmpi sge, %174, %175 : vector<256x1xi32>
    %c1_i32_88 = arith.constant 1 : i32
    %177 = vector.broadcast %c1_i32_88 : i32 to vector<256x1xi32>
    %178 = arith.addi %17, %177 : vector<256x1xi32>
    %c16_i32_89 = arith.constant 16 : i32
    %179 = vector.broadcast %c16_i32_89 : i32 to vector<256x1xi32>
    %180 = arith.cmpi slt, %178, %179 : vector<256x1xi32>
    %181 = arith.andi %176, %180 : vector<256x1xi1>
    %cst_90 = arith.constant 0.000000e+00 : f32
    %182 = vector.shape_cast %181 : vector<256x1xi1> to vector<256x1xi1>
    %183 = vector.broadcast %182 : vector<256x1xi1> to vector<256x128xi1>
    %184 = vector.broadcast %cst_90 : f32 to vector<256x128xf32>
    %185 = arith.select %183, %172, %184 : vector<256x128xi1>, vector<256x128xf32>
    %c2_91 = arith.constant 2 : index
    %c1_92 = arith.constant 1 : index
    %c0_93 = arith.constant 0 : index
    %c0_94 = arith.constant 0 : index
    %186 = vector.load %arg3[%c2_91, %c1_92, %c0_93, %c0_94] : memref<3x3x128x128xf32, #tpu.memory_space<vmem>>, vector<1x1x128x128xf32>
    %187 = vector.shape_cast %186 : vector<1x1x128x128xf32> to vector<128x128xf32>
    %cst_95 = arith.constant dense<0.000000e+00> : vector<256x128xf32>
    %188 = tpu.matmul %185, %187, %cst_95 {dimension_numbers = #tpu.dot_dimension_numbers<[1], [0], [0], [1], [0, 0, 1, 1], [], []>} : vector<256x128xf32>, vector<128x128xf32>, vector<256x128xf32> -> vector<256x128xf32>
    %189 = arith.addf %170, %188 : vector<256x128xf32>
    %c255_i32 = arith.constant 255 : i32
    %190 = tpu.dynamic_rotate %13 by %c255_i32 dim 0 : vector<288x128xf32>, i32 -> vector<288x128xf32>
    %191 = vector.extract_strided_slice %190 {offsets = [0, 0], sizes = [256, 128], strides = [1, 1]} : vector<288x128xf32> to vector<256x128xf32>
    %c1_i32_96 = arith.constant 1 : i32
    %192 = vector.broadcast %c1_i32_96 : i32 to vector<256x1xi32>
    %193 = arith.addi %17, %192 : vector<256x1xi32>
    %c0_i32_97 = arith.constant 0 : i32
    %194 = vector.broadcast %c0_i32_97 : i32 to vector<256x1xi32>
    %195 = arith.cmpi sge, %193, %194 : vector<256x1xi32>
    %c1_i32_98 = arith.constant 1 : i32
    %196 = vector.broadcast %c1_i32_98 : i32 to vector<256x1xi32>
    %197 = arith.addi %17, %196 : vector<256x1xi32>
    %c16_i32_99 = arith.constant 16 : i32
    %198 = vector.broadcast %c16_i32_99 : i32 to vector<256x1xi32>
    %199 = arith.cmpi slt, %197, %198 : vector<256x1xi32>
    %200 = arith.andi %195, %199 : vector<256x1xi1>
    %c1_i32_100 = arith.constant 1 : i32
    %201 = vector.broadcast %c1_i32_100 : i32 to vector<256x1xi32>
    %202 = arith.addi %19, %201 : vector<256x1xi32>
    %c0_i32_101 = arith.constant 0 : i32
    %203 = vector.broadcast %c0_i32_101 : i32 to vector<256x1xi32>
    %204 = arith.cmpi sge, %202, %203 : vector<256x1xi32>
    %c1_i32_102 = arith.constant 1 : i32
    %205 = vector.broadcast %c1_i32_102 : i32 to vector<256x1xi32>
    %206 = arith.addi %19, %205 : vector<256x1xi32>
    %c16_i32_103 = arith.constant 16 : i32
    %207 = vector.broadcast %c16_i32_103 : i32 to vector<256x1xi32>
    %208 = arith.cmpi slt, %206, %207 : vector<256x1xi32>
    %209 = arith.andi %204, %208 : vector<256x1xi1>
    %210 = arith.andi %200, %209 : vector<256x1xi1>
    %cst_104 = arith.constant 0.000000e+00 : f32
    %211 = vector.shape_cast %210 : vector<256x1xi1> to vector<256x1xi1>
    %212 = vector.broadcast %211 : vector<256x1xi1> to vector<256x128xi1>
    %213 = vector.broadcast %cst_104 : f32 to vector<256x128xf32>
    %214 = arith.select %212, %191, %213 : vector<256x128xi1>, vector<256x128xf32>
    %c2_105 = arith.constant 2 : index
    %c2_106 = arith.constant 2 : index
    %c0_107 = arith.constant 0 : index
    %c0_108 = arith.constant 0 : index
    %215 = vector.load %arg3[%c2_105, %c2_106, %c0_107, %c0_108] : memref<3x3x128x128xf32, #tpu.memory_space<vmem>>, vector<1x1x128x128xf32>
    %216 = vector.shape_cast %215 : vector<1x1x128x128xf32> to vector<128x128xf32>
    %cst_109 = arith.constant dense<0.000000e+00> : vector<256x128xf32>
    %217 = tpu.matmul %214, %216, %cst_109 {dimension_numbers = #tpu.dot_dimension_numbers<[1], [0], [0], [1], [0, 0, 1, 1], [], []>} : vector<256x128xf32>, vector<128x128xf32>, vector<256x128xf32> -> vector<256x128xf32>
    %218 = arith.addf %189, %217 : vector<256x128xf32>
    %cst_110 = arith.constant dense<0.000000e+00> : vector<128xf32>
    %219 = vector.multi_reduction <add>, %218, %cst_110 [0] : vector<256x128xf32> to vector<128xf32>
    %220 = vector.shape_cast %219 : vector<128xf32> to vector<1x128xf32>
    %221 = arith.mulf %218, %218 : vector<256x128xf32>
    %cst_111 = arith.constant dense<0.000000e+00> : vector<128xf32>
    %222 = vector.multi_reduction <add>, %221, %cst_111 [0] : vector<256x128xf32> to vector<128xf32>
    %223 = vector.shape_cast %222 : vector<128xf32> to vector<1x128xf32>
    %cst_112 = arith.constant 3.906250e-03 : f32
    %224 = vector.broadcast %cst_112 : f32 to vector<1x128xf32>
    %225 = arith.mulf %220, %224 : vector<1x128xf32>
    %cst_113 = arith.constant 3.906250e-03 : f32
    %226 = vector.broadcast %cst_113 : f32 to vector<1x128xf32>
    %227 = arith.mulf %223, %226 : vector<1x128xf32>
    %228 = arith.mulf %225, %225 : vector<1x128xf32>
    %229 = arith.subf %227, %228 : vector<1x128xf32>
    %cst_114 = arith.constant 0.000000e+00 : f32
    %230 = vector.broadcast %cst_114 : f32 to vector<1x128xf32>
    %231 = arith.maximumf %229, %230 : vector<1x128xf32>
    %c0_115 = arith.constant 0 : index
    %c0_116 = arith.constant 0 : index
    %232 = vector.load %arg4[%c0_115, %c0_116] : memref<1x128xf32, #tpu.memory_space<vmem>>, vector<1x128xf32>
    %cst_117 = arith.constant 9.99999974E-6 : f32
    %233 = vector.broadcast %cst_117 : f32 to vector<1x128xf32>
    %234 = arith.addf %231, %233 : vector<1x128xf32>
    %235 = math.rsqrt %234 : vector<1x128xf32>
    %236 = arith.mulf %232, %235 : vector<1x128xf32>
    %c0_118 = arith.constant 0 : index
    %c0_119 = arith.constant 0 : index
    %237 = vector.load %arg5[%c0_118, %c0_119] : memref<1x128xf32, #tpu.memory_space<vmem>>, vector<1x128xf32>
    %238 = arith.mulf %225, %236 : vector<1x128xf32>
    %239 = arith.subf %237, %238 : vector<1x128xf32>
    %240 = vector.broadcast %236 : vector<1x128xf32> to vector<256x128xf32>
    %241 = arith.mulf %218, %240 : vector<256x128xf32>
    %242 = vector.broadcast %239 : vector<1x128xf32> to vector<256x128xf32>
    %243 = arith.addf %241, %242 : vector<256x128xf32>
    %cst_120 = arith.constant 0.000000e+00 : f32
    %244 = vector.broadcast %cst_120 : f32 to vector<256x128xf32>
    %245 = arith.cmpf oge, %243, %244 : vector<256x128xf32>
    %cst_121 = arith.constant 0.00999999977 : f32
    %246 = vector.broadcast %cst_121 : f32 to vector<256x128xf32>
    %247 = arith.mulf %246, %243 : vector<256x128xf32>
    %248 = arith.select %245, %243, %247 : vector<256x128xi1>, vector<256x128xf32>
    %249 = vector.shape_cast %248 : vector<256x128xf32> to vector<16x16x128xf32>
    %c0_122 = arith.constant 0 : index
    %c0_123 = arith.constant 0 : index
    %c0_124 = arith.constant 0 : index
    %c0_125 = arith.constant 0 : index
    %250 = vector.load %arg6[%c0_122, %c0_123, %c0_124, %c0_125] : memref<1x16x16x128xf32, #tpu.memory_space<vmem>>, vector<1x16x16x128xf32>
    %251 = vector.shape_cast %250 : vector<1x16x16x128xf32> to vector<16x16x128xf32>
    %252 = vector.shape_cast %249 : vector<16x16x128xf32> to vector<1x16x16x128xf32>
    tpu.vector_store %arg6[%c0_122, %c0_123, %c0_124, %c0_125], %252 {strides = array<i32>} : memref<1x16x16x128xf32, #tpu.memory_space<vmem>>, vector<1x16x16x128xf32>,
    return
  }
  func.func @transform_0(%arg0: i32, %arg1: i32) -> (i32, i32, i32, i32) {
    %c0_i32 = arith.constant 0 : i32
    %c0_i32_0 = arith.constant 0 : i32
    %c0_i32_1 = arith.constant 0 : i32
    %c0_i32_2 = arith.constant 0 : i32
    return %arg0, %c0_i32, %c0_i32_0, %c0_i32_1 : i32, i32, i32, i32
  }
  func.func @transform_1(%arg0: i32, %arg1: i32) -> (i32, i32, i32, i32) {
    %c0_i32 = arith.constant 0 : i32
    %c0_i32_0 = arith.constant 0 : i32
    %c0_i32_1 = arith.constant 0 : i32
    %c0_i32_2 = arith.constant 0 : i32
    return %c0_i32, %c0_i32_0, %c0_i32_1, %arg1 : i32, i32, i32, i32
  }
  func.func @transform_2(%arg0: i32, %arg1: i32) -> (i32, i32) {
    %c0_i32 = arith.constant 0 : i32
    %c0_i32_0 = arith.constant 0 : i32
    return %c0_i32, %arg1 : i32, i32
  }
  func.func @transform_3(%arg0: i32, %arg1: i32) -> (i32, i32) {
    %c0_i32 = arith.constant 0 : i32
    %c0_i32_0 = arith.constant 0 : i32
    return %c0_i32, %arg1 : i32, i32
  }
  func.func @transform_4(%arg0: i32, %arg1: i32) -> (i32, i32, i32, i32) {
    %c0_i32 = arith.constant 0 : i32
    %c0_i32_0 = arith.constant 0 : i32
    %c0_i32_1 = arith.constant 0 : i32
    return %arg0, %c0_i32, %c0_i32_0, %arg1 : i32, i32, i32, i32
  }
}

</mosaic_0001>

<bundles_post_ra>
// kernel: conv_block_forward.2
= control target key start
LH: loop header
LB: loop body
LE: loop exit
PB: predicated region body
PF: predicated region fallthrough
CT: control target
= control target key end

     0   :  { %s4888_s15 = smov 0   ;;  %s4890_s16 = smov 0   ;;  %s7179_s0 = inlined_call_operand.vmem [shape: f32[2,16,16,128], index: 0, kind: input, shape index: {}]   ;;  %s7180_s1 = inlined_call_operand.vmem [shape: f32[3,3,128,128], index: 1, kind: input, shape index: {}]   ;;  %s7181_s2 = inlined_call_operand.vmem [shape: f32[1,128], index: 2, kind: input, shape index: {}]   ;;  %s7182_s3 = inlined_call_operand.vmem [shape: f32[1,128], index: 3, kind: input, shape index: {}]   ;;  %s7183_s4 = inlined_call_operand.vmem [shape: f32[2,16,16,128], index: 4, kind: output, shape index: {}]  }
   0x1   :  { %s4892_s17 = smov 0  }
   0x2 LB: > { %s26_s18 = sadd.s32 1, %s4856_s16  ;;  %p3368_p0 = scmp.ge.s32.totalorder %s4860_s17, 1  ;;  %s4860_s17 = sphi %s4892_s17, %s14_s17   ;;  %s4856_s16 = sphi %s4890_s16, %s7383_s16   ;;  %s4852_s15 = sphi %s4888_s15, %s7382_s15  }
   0x3   : > { %p28_p1 = scmp.ge.s32.totalorder %s26_s18, 2  ;;  %p201_p2 = scmp.lt.s32.totalorder %s4860_s17, 3 }
   0x5   : > { %s7385_s18 = smov (%p28_p1, %s26_s18), 0  ;;  %p202_p3 = pnand %p3368_p0, %p201_p2 }
   0x7   : > { %205 = sbr.rel (%p202_p3) target bundleno = 634 (0x27a), region = 36 }
   0xc   : > { %v3389_v0 = vld [vmem:[%s7180_s1 + $0xf8] sm:$0xff]  ;;  %v3388_v1 = vld [vmem:[%s7180_s1 + $0xf0] sm:$0xff]  ;;  %v3387_v2 = vld [vmem:[%s7180_s1 + $0xe8] sm:$0xff]  ;;  %p240_p4 = scmp.lt.s32.totalorder %s4852_s15, 1  ;;  %v7184_v19 = vmov 0.0  }
   0xd   : > { %4750 = vmatprep.subr.mxu1 %v3389_v0  ;;  %4030 = vmatprep.subr.mxu0 %v3389_v0  ;;  %v3386_v3 = vld [vmem:[%s7180_s1 + $0xe0] sm:$0xff]  ;;  %v3385_v4 = vld [vmem:[%s7180_s1 + $0xd8] sm:$0xff]  ;;  %v3384_v5 = vld [vmem:[%s7180_s1 + $0xd0] sm:$0xff] }
   0xe   : > { %4766 = vmatpush3.msra.mxu1 %v3389_v0  ;;  %4031 = vmatpush3.msra.mxu0 %v3389_v0  ;;  %v3383_v6 = vld [vmem:[%s7180_s1 + $0xc8] sm:$0xff]  ;;  %v3382_v7 = vld [vmem:[%s7180_s1 + $0xc0] sm:$0xff]  ;;  %v3381_v8 = vld [vmem:[%s7180_s1 + $0xb8] sm:$0xff]  ;;  %s7387_s15 = smov (!%p240_p4, %s4852_s15), 1 }
   0xf   : > { %4751 = vmatprep.subr.mxu1 %v3388_v1  ;;  %4032 = vmatprep.subr.mxu0 %v3388_v1  ;;  %v3380_v9 = vld [vmem:[%s7180_s1 + $0xb0] sm:$0xff]  ;;  %v3379_v10 = vld [vmem:[%s7180_s1 + $0xa8] sm:$0xff]  ;;  %v3378_v11 = vld [vmem:[%s7180_s1 + $0xa0] sm:$0xff]  ;;  %s3596_s23 = sshll.u32 %s7387_s15, 8 }
  0x10   : > { %4767 = vmatpush3.msra.mxu1 %v3388_v1  ;;  %4033 = vmatpush3.msra.mxu0 %v3388_v1  ;;  %v3377_v12 = vld [vmem:[%s7180_s1 + $0x98] sm:$0xff]  ;;  %v3376_v13 = vld [vmem:[%s7180_s1 + $0x90] sm:$0xff]  ;;  %v3375_v14 = vld [vmem:[%s7180_s1 + $0x88] sm:$0xff]  ;;  %s4963_s30 = scalar_lea.vmem %s7179_s0, %s3596_s23  ;;  %s6986_s8 = scalar_lea.vmem %s7183_s4, %s3596_s23 }
  0x11   : > { %4752 = vmatprep.subr.mxu1 %v3387_v2  ;;  %4034 = vmatprep.subr.mxu0 %v3387_v2  ;;  %v3374_v15 = vld [vmem:[%s7180_s1 + $0x80] sm:$0xff]  ;;  %v4969_v16 = vld [vmem:[%s4963_s30 + $0x70] sm:$0xff]  ;;  %v4972_v17 = vld [vmem:[%s4963_s30 + $0x78] sm:$0xff] }
  0x12   : > { %4768 = vmatpush3.msra.mxu1 %v3387_v2  ;;  %4035 = vmatpush3.msra.mxu0 %v3387_v2  ;;  %v420_v18 = vld [vmem:[%s7180_s1 + $0x78] sm:$0xff]  ;;  %v419_v21 = vld [vmem:[%s7180_s1 + $0x70] sm:$0xff]  ;;  %v4987_v22 = vld [vmem:[%s4963_s30 + $0x80] sm:$0xff] }
  0x13   : > { %4753 = vmatprep.subr.mxu1 %v3386_v3  ;;  %4036 = vmatprep.subr.mxu0 %v3386_v3  ;;  %v3420_v20 = vld [vmem:[%s7180_s1 + $0x178] sm:$0xff]  ;;  %v3419_v23 = vld [vmem:[%s7180_s1 + $0x170] sm:$0xff]  ;;  %v4994_v24 = vld [vmem:[%s4963_s30] sm:$0xff] }
  0x14   : > { %4769 = vmatpush3.msra.mxu1 %v3386_v3  ;;  %4037 = vmatpush3.msra.mxu0 %v3386_v3  ;;  %v4997_v25 = vld [vmem:[%s4963_s30 + $0x88] sm:$0xff]  ;;  %v417_v29 = vld [vmem:[%s7180_s1 + $0x60] sm:$0xff]  ;;  %v5015_v30 = vld [vmem:[%s4963_s30 + $0x90] sm:$0xff] }
  0x15   : > { %4754 = vmatprep.subr.mxu1 %v3385_v4  ;;  %4038 = vmatprep.subr.mxu0 %v3385_v4  ;;  %v418_v26 = vld [vmem:[%s7180_s1 + $0x68] sm:$0xff]  ;;  %v3417_v31 = vld [vmem:[%s7180_s1 + $0x160] sm:$0xff]  ;;  %v5022_v32 = vld [vmem:[%s4963_s30 + $0x10] sm:$0xff] }
  0x16   : > { %4770 = vmatpush3.msra.mxu1 %v3385_v4  ;;  %4039 = vmatpush3.msra.mxu0 %v3385_v4  ;;  %v5004_v27 = vld [vmem:[%s4963_s30 + $0x8] sm:$0xff]  ;;  %v5025_v33 = vld [vmem:[%s4963_s30 + $0x98] sm:$0xff]  ;;  %v415_v37 = vld [vmem:[%s7180_s1 + $0x50] sm:$0xff]  ;;  %v298_v4 = vlaneseq }
  0x17   : > { %4755 = vmatprep.subr.mxu1 %v3384_v5  ;;  %4040 = vmatprep.subr.mxu0 %v3384_v5  ;;  %v3418_v28 = vld [vmem:[%s7180_s1 + $0x168] sm:$0xff]  ;;  %v416_v34 = vld [vmem:[%s7180_s1 + $0x58] sm:$0xff]  ;;  %v5043_v38 = vld [vmem:[%s4963_s30 + $0xa0] sm:$0xff] }
  0x18   : > { %4771 = vmatpush3.msra.mxu1 %v3384_v5  ;;  %4041 = vmatpush3.msra.mxu0 %v3384_v5  ;;  %v5032_v35 = vld [vmem:[%s4963_s30 + $0x18] sm:$0xff]  ;;  %v3415_v39 = vld [vmem:[%s7180_s1 + $0x150] sm:$0xff]  ;;  %v5050_v40 = vld [vmem:[%s4963_s30 + $0x20] sm:$0xff] }
  0x19   : > { %4756 = vmatprep.subr.mxu1 %v3383_v6  ;;  %4042 = vmatprep.subr.mxu0 %v3383_v6  ;;  %v3416_v36 = vld [vmem:[%s7180_s1 + $0x158] sm:$0xff]  ;;  %v5053_v41 = vld [vmem:[%s4963_s30 + $0xa8] sm:$0xff]  ;;  %v413_v45 = vld [vmem:[%s7180_s1 + $0x40] sm:$0xff] }
  0x1a   : > { %4772 = vmatpush3.msra.mxu1 %v3383_v6  ;;  %4043 = vmatpush3.msra.mxu0 %v3383_v6  ;;  %v414_v42 = vld [vmem:[%s7180_s1 + $0x48] sm:$0xff]  ;;  %v5071_v46 = vld [vmem:[%s4963_s30 + $0xb0] sm:$0xff]  ;;  %v3413_v47 = vld [vmem:[%s7180_s1 + $0x140] sm:$0xff] }
  0x1b   : > { %4757 = vmatprep.subr.mxu1 %v3382_v7  ;;  %4044 = vmatprep.subr.mxu0 %v3382_v7  ;;  %v5060_v43 = vld [vmem:[%s4963_s30 + $0x28] sm:$0xff]  ;;  %v5078_v48 = vld [vmem:[%s4963_s30 + $0x30] sm:$0xff]  ;;  %v5081_v49 = vld [vmem:[%s4963_s30 + $0xb8] sm:$0xff] }
  0x1c   : > { %4773 = vmatpush3.msra.mxu1 %v3382_v7  ;;  %4045 = vmatpush3.msra.mxu0 %v3382_v7  ;;  %v3414_v44 = vld [vmem:[%s7180_s1 + $0x148] sm:$0xff]  ;;  %v412_v50 = vld [vmem:[%s7180_s1 + $0x38] sm:$0xff]  ;;  %v411_v53 = vld [vmem:[%s7180_s1 + $0x30] sm:$0xff] }
  0x1d   : > { %4758 = vmatprep.subr.mxu1 %v3381_v8  ;;  %4046 = vmatprep.subr.mxu0 %v3381_v8  ;;  %v5088_v51 = vld [vmem:[%s4963_s30 + $0x38] sm:$0xff]  ;;  %v5099_v54 = vld [vmem:[%s4963_s30 + $0xc0] sm:$0xff]  ;;  %v3411_v55 = vld [vmem:[%s7180_s1 + $0x130] sm:$0xff] }
  0x1e   : > { %4774 = vmatpush3.msra.mxu1 %v3381_v8  ;;  %4047 = vmatpush3.msra.mxu0 %v3381_v8  ;;  %v3412_v52 = vld [vmem:[%s7180_s1 + $0x138] sm:$0xff]  ;;  %7247 = vst [vmem:[#allocation4_spill] sm:$0xff] %v5099_v54  ;;  %v5106_v56 = vld [vmem:[%s4963_s30 + $0x40] sm:$0xff]  ;;  %v5109_v57 = vld [vmem:[%s4963_s30 + $0xc8] sm:$0xff] }
  0x1f   : > { %4759 = vmatprep.subr.mxu1 %v3380_v9  ;;  %4048 = vmatprep.subr.mxu0 %v3380_v9  ;;  %7248 = vst [vmem:[#allocation5_spill] sm:$0xff] %v5109_v57  ;;  %v410_v58 = vld [vmem:[%s7180_s1 + $0x28] sm:$0xff]  ;;  %v409_v61 = vld [vmem:[%s7180_s1 + $0x20] sm:$0xff]  ;;  %v5127_v62 = vld [vmem:[%s4963_s30 + $0xd0] sm:$0xff] }
  0x20   : > { %4775 = vmatpush3.msra.mxu1 %v3380_v9  ;;  %4049 = vmatpush3.msra.mxu0 %v3380_v9  ;;  %v5116_v59 = vld [vmem:[%s4963_s30 + $0x48] sm:$0xff]  ;;  %7249 = vst [vmem:[#allocation6_spill] sm:$0xff] %v5127_v62  ;;  %v3409_v63 = vld [vmem:[%s7180_s1 + $0x120] sm:$0xff]  ;;  %v5134_v0 = vld [vmem:[%s4963_s30 + $0x50] sm:$0xff] }
  0x21   : > { %4760 = vmatprep.subr.mxu1 %v3379_v10  ;;  %4050 = vmatprep.subr.mxu0 %v3379_v10  ;;  %v3410_v60 = vld [vmem:[%s7180_s1 + $0x128] sm:$0xff]  ;;  %v5137_v1 = vld [vmem:[%s4963_s30 + $0xd8] sm:$0xff]  ;;  %v407_v6 = vld [vmem:[%s7180_s1 + $0x10] sm:$0xff] }
  0x22   : > { %4776 = vmatpush3.msra.mxu1 %v3379_v10  ;;  %4051 = vmatpush3.msra.mxu0 %v3379_v10  ;;  %7250 = vst [vmem:[#allocation7_spill] sm:$0xff] %v5137_v1  ;;  %v408_v2 = vld [vmem:[%s7180_s1 + $0x18] sm:$0xff]  ;;  %v5155_v7 = vld [vmem:[%s4963_s30 + $0xe0] sm:$0xff]  ;;  %v3407_v8 = vld [vmem:[%s7180_s1 + $0x110] sm:$0xff] }
  0x23   : > { %4761 = vmatprep.subr.mxu1 %v3378_v11  ;;  %4052 = vmatprep.subr.mxu0 %v3378_v11  ;;  %v5144_v3 = vld [vmem:[%s4963_s30 + $0x58] sm:$0xff]  ;;  %7251 = vst [vmem:[#allocation8_spill] sm:$0xff] %v5155_v7  ;;  %v5162_v9 = vld [vmem:[%s4963_s30 + $0x60] sm:$0xff]  ;;  %v5165_v10 = vld [vmem:[%s4963_s30 + $0xe8] sm:$0xff] }
  0x24   : > { %4777 = vmatpush3.msra.mxu1 %v3378_v11  ;;  %4053 = vmatpush3.msra.mxu0 %v3378_v11  ;;  %v3408_v5 = vld [vmem:[%s7180_s1 + $0x118] sm:$0xff]  ;;  %v5167_v11 = vshrl.u32 %v298_v4, 7 }
  0x25   : > { %4762 = vmatprep.subr.mxu1 %v3377_v12  ;;  %4054 = vmatprep.subr.mxu0 %v3377_v12 }
  0x26   : > { %4778 = vmatpush3.msra.mxu1 %v3377_v12  ;;  %4055 = vmatpush3.msra.mxu0 %v3377_v12  ;;  %7252 = vst [vmem:[#allocation9_spill] sm:$0xff] %v5167_v11  ;;  %v406_v12 = vld [vmem:[%s7180_s1 + $0x8] sm:$0xff]  ;;  %vm332_vm0 = vcmp.lt.s32.totalorder %v5167_v11, 1  ;;  %vm919_vm1 = vcmp.lt.s32.totalorder %v5167_v11, 7 }
  0x27   : > { %4763 = vmatprep.subr.mxu1 %v3376_v13  ;;  %4056 = vmatprep.subr.mxu0 %v3376_v13 }
  0x28   : > { %4779 = vmatpush3.msra.mxu1 %v3376_v13  ;;  %4057 = vmatpush3.msra.mxu0 %v3376_v13  ;;  %v5174_v13 = vld [vmem:[%s4963_s30 + $0x68] sm:$0xff] }
  0x29   : > { %4764 = vmatprep.subr.mxu1 %v3375_v14  ;;  %4058 = vmatprep.subr.mxu0 %v3375_v14 }
  0x2a   : > { %4780 = vmatpush3.msra.mxu1 %v3375_v14  ;;  %4059 = vmatpush3.msra.mxu0 %v3375_v14  ;;  %v3406_v14 = vld [vmem:[%s7180_s1 + $0x108] sm:$0xff] }
  0x2b   : > { %4765 = vmatprep.subr.mxu1 %v3374_v15  ;;  %4060 = vmatprep.subr.mxu0 %v3374_v15 }
  0x2c   : > { %4781 = vmatpush3.msra.mxu1 %v3374_v15  ;;  %4086 = vmatprep.mubr.f32.mxu1 %v4969_v16 }
  0x2d   : > { %4061 = vmatpush3.msra.mxu0 %v3374_v15  ;;  %4062 = vmatprep.mubr.f32.mxu0 %v7184_v19  ;;  %v405_v15 = vld [vmem:[%s7180_s1] sm:$0xff] }
  0x2e   : > { %4087 = vmatmul.mubr.f32.vlgmr.msra.gmra.mxu1 %v4972_v17  ;;  %4110 = vmatprep.subr.mxu1 %v420_v18 }
  0x2f   : > { %4063 = vmatmul.mubr.f32.vlgmr.msra.gmra.mxu0 %v7184_v19  ;;  %4111 = vmatpush3.msra.mxu1 %v420_v18  ;;  %v300_v18 = vadd.s32 8, %v5167_v11 }
  0x30   : > { %4190 = vmatprep.subr.mxu0 %v3420_v20  ;;  %4112 = vmatprep.subr.mxu1 %v419_v21 }
  0x31   : > { %4191 = vmatpush3.msra.mxu0 %v3420_v20  ;;  %4089 = vmatprep.mubr.f32.mxu1 %v4987_v22  ;;  %v302_v20 = vrot.slane %v4994_v24, 7 }
  0x32   : > { %4113 = vmatpush3.msra.mxu1 %v419_v21  ;;  %4192 = vmatprep.subr.mxu0 %v3419_v23  ;;  %v3405_v21 = vld [vmem:[%s7180_s1 + $0x100] sm:$0xff] }
  0x33   : > { %4065 = vmatprep.mubr.f32.mxu0 %v4994_v24  ;;  %4090 = vmatmul.mubr.f32.gmra.mxu1 %v4997_v25 }
  0x34   : > { %4114 = vmatprep.subr.mxu1 %v418_v26  ;;  %4193 = vmatpush3.msra.mxu0 %v3419_v23  ;;  %v301_v23 = vrot.slane %v5004_v27, 7 }
  0x35   : > { %4066 = vmatmul.mubr.f32.gmra.mxu0 %v5004_v27  ;;  %4115 = vmatpush3.msra.mxu1 %v418_v26  ;;  %v5192_v26 = vadd.s32 4294967295, %v5167_v11  ;;  %v4815_v11 = vld [vmem:[%s4963_s30 + $0x18] sm:$0xff] }
  0x36   : > { %4194 = vmatprep.subr.mxu0 %v3418_v28  ;;  %4116 = vmatprep.subr.mxu1 %v417_v29 }
  0x37   : > { %4195 = vmatpush3.msra.mxu0 %v3418_v28  ;;  %4092 = vmatprep.mubr.f32.mxu1 %v5015_v30  ;;  %v3451_v28 = vld [vmem:[%s7180_s1 + $0x1f8] sm:$0xff]  ;;  %vm365_vm2 = vcmp.ge.s32.totalorder %v5192_v26, 0 }
  0x38   : > { %4117 = vmatpush3.msra.mxu1 %v417_v29  ;;  %4196 = vmatprep.subr.mxu0 %v3417_v31  ;;  %v888_v29 = vrot.slane %v4994_v24, 1 }
  0x39   : > { %4068 = vmatprep.mubr.f32.mxu0 %v5022_v32  ;;  %4093 = vmatmul.mubr.f32.gmra.mxu1 %v5025_v33 }
  0x3a   : > { %4118 = vmatprep.subr.mxu1 %v416_v34  ;;  %4197 = vmatpush3.msra.mxu0 %v3417_v31  ;;  %v889_v31 = vrot.slane %v5004_v27, 1 }
  0x3b   : > { %4069 = vmatmul.mubr.f32.gmra.mxu0 %v5032_v35  ;;  %4119 = vmatpush3.msra.mxu1 %v416_v34  ;;  %v5201_v34 = vadd.s32 1, %v300_v18  ;;  %v308_v18 = vrot.slane %v5078_v48, 7 }
  0x3c   : > { %4198 = vmatprep.subr.mxu0 %v3416_v36  ;;  %4120 = vmatprep.subr.mxu1 %v415_v37 }
  0x3d   : > { %4199 = vmatpush3.msra.mxu0 %v3416_v36  ;;  %4095 = vmatprep.mubr.f32.mxu1 %v5043_v38  ;;  %v890_v36 = vrot.slane %v5022_v32, 1  ;;  %vm955_vm3 = vcmp.lt.s32.totalorder %v5201_v34, 16 }
  0x3e   : > { %4121 = vmatpush3.msra.mxu1 %v415_v37  ;;  %4200 = vmatprep.subr.mxu0 %v3415_v39  ;;  %v3483_v37 = vld [vmem:[%s7180_s1 + $0x278] sm:$0xff] }
  0x3f   : > { %4071 = vmatprep.mubr.f32.mxu0 %v5050_v40  ;;  %4096 = vmatmul.mubr.f32.gmra.mxu1 %v5053_v41 }
  0x40   : > { %4122 = vmatprep.subr.mxu1 %v414_v42  ;;  %4201 = vmatpush3.msra.mxu0 %v3415_v39  ;;  %v5211_v39 = vsel %vm332_vm0, %v301_v23, %v302_v20 }
  0x41   : > { %4072 = vmatmul.mubr.f32.gmra.mxu0 %v5060_v43  ;;  %4123 = vmatpush3.msra.mxu1 %v414_v42  ;;  %v304_v42 = vrot.slane %v5022_v32, 7 }
  0x42   : > { %4202 = vmatprep.subr.mxu0 %v3414_v44  ;;  %4124 = vmatprep.subr.mxu1 %v413_v45 }
  0x43   : > { %4203 = vmatpush3.msra.mxu0 %v3414_v44  ;;  %4098 = vmatprep.mubr.f32.mxu1 %v5071_v46  ;;  %v5218_v44 = vsel %vm332_vm0, %v302_v20, %v301_v23 }
  0x44   : > { %4125 = vmatpush3.msra.mxu1 %v413_v45  ;;  %4204 = vmatprep.subr.mxu0 %v3413_v47  ;;  %v305_v45 = vrot.slane %v5032_v35, 7 }
  0x45   : > { %4074 = vmatprep.mubr.f32.mxu0 %v5078_v48  ;;  %4099 = vmatmul.mubr.f32.gmra.mxu1 %v5081_v49 }
  0x46   : > { %4126 = vmatprep.subr.mxu1 %v412_v50  ;;  %4205 = vmatpush3.msra.mxu0 %v3413_v47  ;;  %v5224_v47 = vsel %vm919_vm1, %v888_v29, %v889_v31  ;;  %v895_v29 = vrot.slane %v5088_v51, 1 }
  0x47   : > { %4075 = vmatmul.mubr.f32.gmra.mxu0 %v5088_v51  ;;  %4127 = vmatpush3.msra.mxu1 %v412_v50  ;;  %7253 = vst [vmem:[#allocation10_spill] sm:$0xff] %v5224_v47  ;;  %v3450_v50 = vld [vmem:[%s7180_s1 + $0x1f0] sm:$0xff] }
  0x48   : > { %4206 = vmatprep.subr.mxu0 %v3412_v52  ;;  %4128 = vmatprep.subr.mxu1 %v411_v53 }
  0x49   : > { %4207 = vmatpush3.msra.mxu0 %v3412_v52  ;;  %4101 = vmatprep.mubr.f32.mxu1 %v5099_v54  ;;  %v891_v52 = vrot.slane %v5032_v35, 1 }
  0x4a   : > { %4129 = vmatpush3.msra.mxu1 %v411_v53  ;;  %4208 = vmatprep.subr.mxu0 %v3411_v55  ;;  %v5236_v53 = vsel %vm919_vm1, %v889_v31, %v890_v36 }
  0x4b   : > { %4077 = vmatprep.mubr.f32.mxu0 %v5106_v56  ;;  %4102 = vmatmul.mubr.f32.gmra.mxu1 %v5109_v57  ;;  %7254 = vst [vmem:[#allocation11_spill] sm:$0xff] %v5236_v53  ;;  %v5259_v4 = vsel %vm919_vm1, %v890_v36, %v891_v52  ;;  %v896_v36 = vrot.slane %v5106_v56, 1 }
  0x4c   : > { %4130 = vmatprep.subr.mxu1 %v410_v58  ;;  %4209 = vmatpush3.msra.mxu0 %v3411_v55  ;;  %v892_v55 = vrot.slane %v5050_v40, 1  ;;  %7255 = vst [vmem:[#allocation12_spill] sm:$0xff] %v5259_v4 }
  0x4d   : > { %4078 = vmatmul.mubr.f32.gmra.mxu0 %v5116_v59  ;;  %4131 = vmatpush3.msra.mxu1 %v410_v58  ;;  %v3482_v58 = vld [vmem:[%s7180_s1 + $0x270] sm:$0xff] }
  0x4e   : > { %4210 = vmatprep.subr.mxu0 %v3410_v60  ;;  %4132 = vmatprep.subr.mxu1 %v409_v61 }
  0x4f   : > { %4211 = vmatpush3.msra.mxu0 %v3410_v60  ;;  %4104 = vmatprep.mubr.f32.mxu1 %v5127_v62  ;;  %v5245_v60 = vsel %vm332_vm0, %v301_v23, %v304_v42 }
  0x50   : > { %4133 = vmatpush3.msra.mxu1 %v409_v61  ;;  %4212 = vmatprep.subr.mxu0 %v3409_v63  ;;  %v306_v61 = vrot.slane %v5050_v40, 7 }
  0x51   : > { %4080 = vmatprep.mubr.f32.mxu0 %v5134_v0  ;;  %4105 = vmatmul.mubr.f32.gmra.mxu1 %v5137_v1 }
  0x52   : > { %4134 = vmatprep.subr.mxu1 %v408_v2  ;;  %4213 = vmatpush3.msra.mxu0 %v3409_v63  ;;  %v5251_v63 = vsel %vm332_vm0, %v304_v42, %v305_v45 }
  0x53   : > { %4081 = vmatmul.mubr.f32.gmra.mxu0 %v5144_v3  ;;  %4135 = vmatpush3.msra.mxu1 %v408_v2  ;;  %v307_v2 = vrot.slane %v5060_v43, 7 }
  0x54   : > { %4214 = vmatprep.subr.mxu0 %v3408_v5  ;;  %4136 = vmatprep.subr.mxu1 %v407_v6 }
  0x55   : > { %4215 = vmatpush3.msra.mxu0 %v3408_v5  ;;  %4107 = vmatprep.mubr.f32.mxu1 %v5155_v7  ;;  %v3449_v5 = vld [vmem:[%s7180_s1 + $0x1e8] sm:$0xff]  ;;  %v5285_v20 = vsel %vm332_vm0, %v306_v61, %v307_v2  ;;  %v5313_v42 = vsel %vm332_vm0, %v307_v2, %v308_v18  ;;  %v5338_v2 = vsel %vm919_vm1, %v895_v29, %v896_v36 }
  0x56   : > { %4137 = vmatpush3.msra.mxu1 %v407_v6  ;;  %4216 = vmatprep.subr.mxu0 %v3407_v8  ;;  %v893_v6 = vrot.slane %v5060_v43, 1  ;;  %7260 = vst [vmem:[#allocation17_spill] sm:$0xff] %v5338_v2 }
  0x57   : > { %4083 = vmatprep.mubr.f32.mxu0 %v5162_v9  ;;  %4108 = vmatmul.mubr.f32.gmra.mxu1 %v5165_v10 }
  0x58   : > { %4138 = vmatprep.subr.mxu1 %v406_v12  ;;  %4217 = vmatpush3.msra.mxu0 %v3407_v8  ;;  %v5270_v8 = vsel %vm919_vm1, %v891_v52, %v892_v55  ;;  %v5293_v23 = vsel %vm919_vm1, %v892_v55, %v893_v6  ;;  %v311_v52 = vrot.slane %v5116_v59, 7 }
  0x59   : > { %4084 = vmatmul.mubr.f32.gmra.mxu0 %v5174_v13  ;;  %4139 = vmatpush3.msra.mxu1 %v406_v12  ;;  %7256 = vst [vmem:[#allocation13_spill] sm:$0xff] %v5270_v8  ;;  %v894_v12 = vrot.slane %v5078_v48, 1  ;;  %7257 = vst [vmem:[#allocation14_spill] sm:$0xff] %v5293_v23 }
  0x5a   : > { %4218 = vmatprep.subr.mxu0 %v3406_v14  ;;  %4140 = vmatprep.subr.mxu1 %v405_v15 }
  0x5b   : > { %4219 = vmatpush3.msra.mxu0 %v3406_v14  ;;  %4141 = vmatpush3.msra.mxu1 %v405_v15  ;;  %v3481_v14 = vld [vmem:[%s7180_s1 + $0x268] sm:$0xff]  ;;  %v5279_v15 = vsel %vm332_vm0, %v305_v45, %v306_v61  ;;  %v5304_v31 = vsel %vm919_vm1, %v893_v6, %v894_v12  ;;  %v310_v45 = vrot.slane %v5106_v56, 7  ;;  %v5327_v55 = vsel %vm919_vm1, %v894_v12, %v895_v29  ;;  %v3479_v6 = vld [vmem:[%s7180_s1 + $0x258] sm:$0xff]  ;;  %v3446_v29 = vld [vmem:[%s7180_s1 + $0x1d0] sm:$0xff] }
  0x5c   : > { %4142 = vmatprep.mubr.f32.mxu1 %v7184_v19  ;;  %4220 = vmatprep.subr.mxu0 %v3405_v21  ;;  %7258 = vst [vmem:[#allocation15_spill] sm:$0xff] %v5304_v31  ;;  %7259 = vst [vmem:[#allocation16_spill] sm:$0xff] %v5327_v55  ;;  %v897_v61 = vrot.slane %v5116_v59, 1 }
  0x5d   : > { %4143 = vmatmul.mubr.f32.vlgmr.msra.gmra.mxu1 %v7184_v19  ;;  %4221 = vmatpush3.msra.mxu0 %v3405_v21  ;;  %v309_v21 = vrot.slane %v5088_v51, 7 }
  0x5e   : > { %4222 = vmatprep.mubr.f32.mxu0 %v7184_v19  ;;  %4270 = vmatprep.subr.mxu1 %v3451_v28 }
  0x5f   : > { %4223 = vmatmul.mubr.f32.vlgmr.msra.gmra.mxu0 %v7184_v19  ;;  %4271 = vmatpush3.msra.mxu1 %v3451_v28  ;;  %v3448_v28 = vld [vmem:[%s7180_s1 + $0x1e0] sm:$0xff]  ;;  %v5347_v12 = vsel %vm332_vm0, %v309_v21, %v310_v45 }
  0x60   : > { %4350 = vmatprep.subr.mxu0 %v3483_v37  ;;  %4145 = vmatprep.mubr.msk.f32.mxu1 %vm365_vm2, %v5211_v39 }
  0x61   : > { %4351 = vmatpush3.msra.mxu0 %v3483_v37  ;;  %4146 = vmatmul.mubr.f32.gmra.mxu1 %v5218_v44  ;;  %v3480_v37 = vld [vmem:[%s7180_s1 + $0x260] sm:$0xff] }
  0x62   : > { %4225 = vmatprep.mubr.f32.mxu0 %v5224_v47  ;;  %4272 = vmatprep.subr.mxu1 %v3450_v50  ;;  %v326_v47 = vrot.slane %v5099_v54, 7 }
  0x63   : > { %4226 = vmatmul.mubr.msk.f32.gmra.mxu0 %vm955_vm3, %v5236_v53  ;;  %4273 = vmatpush3.msra.mxu1 %v3450_v50  ;;  %v5319_v50 = vsel %vm332_vm0, %v308_v18, %v309_v21  ;;  %v5353_v18 = vsel %vm332_vm0, %v310_v45, %v311_v52  ;;  %v5361_v21 = vsel %vm919_vm1, %v896_v36, %v897_v61  ;;  %v3478_v36 = vld [vmem:[%s7180_s1 + $0x250] sm:$0xff]  ;;  %v911_v53 = vrot.slane %v5081_v49, 1 }
  0x64   : > { %4352 = vmatprep.subr.mxu0 %v3482_v58  ;;  %4148 = vmatprep.mubr.msk.f32.mxu1 %vm365_vm2, %v5245_v60  ;;  %7261 = vst [vmem:[#allocation18_spill] sm:$0xff] %v5361_v21 }
  0x65   : > { %4353 = vmatpush3.msra.mxu0 %v3482_v58  ;;  %4149 = vmatmul.mubr.f32.gmra.mxu1 %v5251_v63  ;;  %v3447_v58 = vld [vmem:[%s7180_s1 + $0x1d8] sm:$0xff] }
  0x66   : > { %4228 = vmatprep.mubr.f32.mxu0 %v5259_v4  ;;  %4274 = vmatprep.subr.mxu1 %v3449_v5  ;;  %v324_v4 = vrot.slane %v5071_v46, 7 }
  0x67   : > { %4229 = vmatmul.mubr.msk.f32.gmra.mxu0 %vm955_vm3, %v5270_v8  ;;  %4275 = vmatpush3.msra.mxu1 %v3449_v5  ;;  %v898_v5 = vrot.slane %v5134_v0, 1  ;;  %v909_v8 = vrot.slane %v5053_v41, 1 }
  0x68   : > { %4354 = vmatprep.subr.mxu0 %v3481_v14  ;;  %4151 = vmatprep.mubr.msk.f32.mxu1 %vm365_vm2, %v5279_v15 }
  0x69   : > { %4355 = vmatpush3.msra.mxu0 %v3481_v14  ;;  %4152 = vmatmul.mubr.f32.gmra.mxu1 %v5285_v20  ;;  %v312_v14 = vrot.slane %v5134_v0, 7  ;;  %v5372_v45 = vsel %vm919_vm1, %v897_v61, %v898_v5 }
  0x6a   : > { %4231 = vmatprep.mubr.f32.mxu0 %v5293_v23  ;;  %4276 = vmatprep.subr.mxu1 %v3448_v28  ;;  %7262 = vst [vmem:[#allocation19_spill] sm:$0xff] %v5372_v45  ;;  %v322_v23 = vrot.slane %v5043_v38, 7 }
  0x6b   : > { %4232 = vmatmul.mubr.msk.f32.gmra.mxu0 %vm955_vm3, %v5304_v31  ;;  %4277 = vmatpush3.msra.mxu1 %v3448_v28  ;;  %v313_v28 = vrot.slane %v5144_v3, 7  ;;  %v5381_v19 = vsel %vm332_vm0, %v311_v52, %v312_v14  ;;  %v316_v31 = vrot.slane %v4969_v16, 7 }
  0x6c   : > { %4356 = vmatprep.subr.mxu0 %v3480_v37  ;;  %4154 = vmatprep.mubr.msk.f32.mxu1 %vm365_vm2, %v5313_v42 }
  0x6d   : > { %4357 = vmatpush3.msra.mxu0 %v3480_v37  ;;  %4155 = vmatmul.mubr.f32.gmra.mxu1 %v5319_v50  ;;  %v899_v37 = vrot.slane %v5144_v3, 1  ;;  %v5387_v61 = vsel %vm332_vm0, %v312_v14, %v313_v28 }
  0x6e   : > { %4234 = vmatprep.mubr.f32.mxu0 %v5327_v55  ;;  %4278 = vmatprep.subr.mxu1 %v3447_v58  ;;  %v901_v55 = vrot.slane %v5174_v13, 1 }
  0x6f   : > { %4235 = vmatmul.mubr.msk.f32.gmra.mxu0 %vm955_vm3, %v5338_v2  ;;  %4279 = vmatpush3.msra.mxu1 %v3447_v58  ;;  %v900_v58 = vrot.slane %v5162_v9, 1  ;;  %v314_v2 = vrot.slane %v5162_v9, 7  ;;  %v5395_v52 = vsel %vm919_vm1, %v898_v5, %v899_v37  ;;  %v3477_v5 = vld [vmem:[%s7180_s1 + $0x248] sm:$0xff] }
  0x70   : > { %4358 = vmatprep.subr.mxu0 %v3479_v6  ;;  %4157 = vmatprep.mubr.msk.f32.mxu1 %vm365_vm2, %v5347_v12  ;;  %7263 = vst [vmem:[#allocation20_spill] sm:$0xff] %v5395_v52 }
  0x71   : > { %4359 = vmatpush3.msra.mxu0 %v3479_v6  ;;  %4158 = vmatmul.mubr.f32.gmra.mxu1 %v5353_v18  ;;  %v315_v6 = vrot.slane %v5174_v13, 7  ;;  %v5406_v14 = vsel %vm919_vm1, %v899_v37, %v900_v58 }
  0x72   : > { %4237 = vmatprep.mubr.f32.mxu0 %v5361_v21  ;;  %4280 = vmatprep.subr.mxu1 %v3446_v29  ;;  %v3445_v21 = vld [vmem:[%s7180_s1 + $0x1c8] sm:$0xff]  ;;  %7264 = vst [vmem:[#allocation21_spill] sm:$0xff] %v5406_v14 }
  0x73   : > { %4238 = vmatmul.mubr.msk.f32.gmra.mxu0 %vm955_vm3, %v5372_v45  ;;  %4281 = vmatpush3.msra.mxu1 %v3446_v29  ;;  %v902_v29 = vrot.slane %v4969_v16, 1  ;;  %v5415_v45 = vsel %vm332_vm0, %v313_v28, %v314_v2  ;;  %v5421_v37 = vsel %vm332_vm0, %v314_v2, %v315_v6  ;;  %v5429_v28 = vsel %vm919_vm1, %v900_v58, %v901_v55  ;;  %v3444_v16 = vld [vmem:[%s7180_s1 + $0x1c0] sm:$0xff] }
  0x74   : > { %4360 = vmatprep.subr.mxu0 %v3478_v36  ;;  %4160 = vmatprep.mubr.msk.f32.mxu1 %vm365_vm2, %v5381_v19  ;;  %7265 = vst [vmem:[#allocation22_spill] sm:$0xff] %v5429_v28  ;;  %v3476_v58 = vld [vmem:[%s7180_s1 + $0x240] sm:$0xff] }
  0x75   : > { %4361 = vmatpush3.msra.mxu0 %v3478_v36  ;;  %4161 = vmatmul.mubr.f32.gmra.mxu1 %v5387_v61  ;;  %v317_v36 = vrot.slane %v4972_v17, 7  ;;  %v5440_v2 = vsel %vm919_vm1, %v901_v55, %v902_v29 }
  0x76   : > { %4240 = vmatprep.mubr.f32.mxu0 %v5395_v52  ;;  %4282 = vmatprep.subr.mxu1 %v3445_v21  ;;  %v903_v52 = vrot.slane %v4972_v17, 1  ;;  %7266 = vst [vmem:[#allocation23_spill] sm:$0xff] %v5440_v2  ;;  %v5449_v17 = vsel %vm332_vm0, %v315_v6, %v316_v31 }
  0x77   : > { %4241 = vmatmul.mubr.msk.f32.gmra.mxu0 %vm955_vm3, %v5406_v14  ;;  %4283 = vmatpush3.msra.mxu1 %v3445_v21  ;;  %v904_v21 = vrot.slane %v4987_v22, 1  ;;  %v318_v14 = vrot.slane %v4987_v22, 7  ;;  %v5455_v55 = vsel %vm332_vm0, %v316_v31, %v317_v36  ;;  %v3443_v22 = vld [vmem:[%s7180_s1 + $0x1b8] sm:$0xff] }
  0x78   : > { %4362 = vmatprep.subr.mxu0 %v3477_v5  ;;  %4163 = vmatprep.mubr.msk.f32.mxu1 %vm365_vm2, %v5415_v45  ;;  %v5463_v6 = vsel %vm919_vm1, %v902_v29, %v903_v52  ;;  %v3475_v29 = vld [vmem:[%s7180_s1 + $0x238] sm:$0xff] }
  0x79   : > { %4363 = vmatpush3.msra.mxu0 %v3477_v5  ;;  %4164 = vmatmul.mubr.f32.gmra.mxu1 %v5421_v37  ;;  %v319_v5 = vrot.slane %v4997_v25, 7  ;;  %7267 = vst [vmem:[#allocation24_spill] sm:$0xff] %v5463_v6  ;;  %v5474_v31 = vsel %vm919_vm1, %v903_v52, %v904_v21 }
  0x7a   : > { %4243 = vmatprep.mubr.f32.mxu0 %v5429_v28  ;;  %4284 = vmatprep.subr.mxu1 %v3444_v16  ;;  %v905_v28 = vrot.slane %v4997_v25, 1  ;;  %7268 = vst [vmem:[#allocation25_spill] sm:$0xff] %v5474_v31  ;;  %v5483_v25 = vsel %vm332_vm0, %v317_v36, %v318_v14 }
  0x7b   : > { %4244 = vmatmul.mubr.msk.f32.gmra.mxu0 %vm955_vm3, %v5440_v2  ;;  %4285 = vmatpush3.msra.mxu1 %v3444_v16  ;;  %v906_v16 = vrot.slane %v5015_v30, 1  ;;  %v320_v2 = vrot.slane %v5015_v30, 7  ;;  %v5489_v52 = vsel %vm332_vm0, %v318_v14, %v319_v5  ;;  %v3442_v30 = vld [vmem:[%s7180_s1 + $0x1b0] sm:$0xff] }
  0x7c   : > { %4364 = vmatprep.subr.mxu0 %v3476_v58  ;;  %4166 = vmatprep.mubr.msk.f32.mxu1 %vm365_vm2, %v5449_v17  ;;  %v5497_v36 = vsel %vm919_vm1, %v904_v21, %v905_v28  ;;  %v3474_v21 = vld [vmem:[%s7180_s1 + $0x230] sm:$0xff] }
  0x7d   : > { %4365 = vmatpush3.msra.mxu0 %v3476_v58  ;;  %4167 = vmatmul.mubr.f32.gmra.mxu1 %v5455_v55  ;;  %v321_v58 = vrot.slane %v5025_v33, 7  ;;  %7269 = vst [vmem:[#allocation26_spill] sm:$0xff] %v5497_v36  ;;  %v5508_v14 = vsel %vm919_vm1, %v905_v28, %v906_v16 }
  0x7e   : > { %4246 = vmatprep.mubr.f32.mxu0 %v5463_v6  ;;  %4286 = vmatprep.subr.mxu1 %v3443_v22  ;;  %v907_v6 = vrot.slane %v5025_v33, 1  ;;  %7270 = vst [vmem:[#allocation27_spill] sm:$0xff] %v5508_v14 }
  0x7f   : > { %4247 = vmatmul.mubr.msk.f32.gmra.mxu0 %vm955_vm3, %v5474_v31  ;;  %4287 = vmatpush3.msra.mxu1 %v3443_v22  ;;  %v908_v22 = vrot.slane %v5043_v38, 1  ;;  %v5517_v31 = vsel %vm332_vm0, %v319_v5, %v320_v2  ;;  %v5523_v28 = vsel %vm332_vm0, %v320_v2, %v321_v58 }
  0x80   : > { %4366 = vmatprep.subr.mxu0 %v3475_v29  ;;  %4169 = vmatprep.mubr.msk.f32.mxu1 %vm365_vm2, %v5483_v25  ;;  %v5531_v5 = vsel %vm919_vm1, %v906_v16, %v907_v6  ;;  %v3473_v16 = vld [vmem:[%s7180_s1 + $0x228] sm:$0xff] }
  0x81   : > { %4367 = vmatpush3.msra.mxu0 %v3475_v29  ;;  %4170 = vmatmul.mubr.f32.gmra.mxu1 %v5489_v52  ;;  %v323_v29 = vrot.slane %v5053_v41, 7  ;;  %7271 = vst [vmem:[#allocation28_spill] sm:$0xff] %v5531_v5  ;;  %v5542_v2 = vsel %vm919_vm1, %v907_v6, %v908_v22 }
  0x82   : > { %4249 = vmatprep.mubr.f32.mxu0 %v5497_v36  ;;  %4288 = vmatprep.subr.mxu1 %v3442_v30  ;;  %v3441_v36 = vld [vmem:[%s7180_s1 + $0x1a8] sm:$0xff]  ;;  %7272 = vst [vmem:[#allocation29_spill] sm:$0xff] %v5542_v2 }
  0x83   : > { %4250 = vmatmul.mubr.msk.f32.gmra.mxu0 %vm955_vm3, %v5508_v14  ;;  %4289 = vmatpush3.msra.mxu1 %v3442_v30  ;;  %v910_v30 = vrot.slane %v5071_v46, 1  ;;  %v5551_v14 = vsel %vm332_vm0, %v321_v58, %v322_v23  ;;  %v5557_v6 = vsel %vm332_vm0, %v322_v23, %v323_v29  ;;  %v5565_v58 = vsel %vm919_vm1, %v908_v22, %v909_v8  ;;  %v3472_v22 = vld [vmem:[%s7180_s1 + $0x220] sm:$0xff] }
  0x84   : > { %4368 = vmatprep.subr.mxu0 %v3474_v21  ;;  %4172 = vmatprep.mubr.msk.f32.mxu1 %vm365_vm2, %v5517_v31  ;;  %7273 = vst [vmem:[#allocation30_spill] sm:$0xff] %v5565_v58 }
  0x85   : > { %4369 = vmatpush3.msra.mxu0 %v3474_v21  ;;  %4173 = vmatmul.mubr.f32.gmra.mxu1 %v5523_v28  ;;  %v325_v21 = vrot.slane %v5081_v49, 7  ;;  %v5576_v23 = vsel %vm919_vm1, %v909_v8, %v910_v30 }
  0x86   : > { %4252 = vmatprep.mubr.f32.mxu0 %v5531_v5  ;;  %4290 = vmatprep.subr.mxu1 %v3441_v36  ;;  %v3440_v5 = vld [vmem:[%s7180_s1 + $0x1a0] sm:$0xff]  ;;  %7274 = vst [vmem:[#allocation31_spill] sm:$0xff] %v5576_v23 }
  0x87   : > { %4253 = vmatmul.mubr.msk.f32.gmra.mxu0 %vm955_vm3, %v5542_v2  ;;  %4291 = vmatpush3.msra.mxu1 %v3441_v36  ;;  %v912_v36 = vrot.slane %v5099_v54, 1  ;;  %v5585_v2 = vsel %vm332_vm0, %v323_v29, %v324_v4  ;;  %v5591_v8 = vsel %vm332_vm0, %v324_v4, %v325_v21  ;;  %v5599_v29 = vsel %vm919_vm1, %v910_v30, %v911_v53  ;;  %v3471_v30 = vld [vmem:[%s7180_s1 + $0x218] sm:$0xff] }
  0x88   : > { %4370 = vmatprep.subr.mxu0 %v3473_v16  ;;  %4175 = vmatprep.mubr.msk.f32.mxu1 %vm365_vm2, %v5551_v14  ;;  %7275 = vst [vmem:[#allocation32_spill] sm:$0xff] %v5599_v29  ;;  %v913_v54 = vrot.slane %v5109_v57, 1 }
  0x89   : > { %4371 = vmatpush3.msra.mxu0 %v3473_v16  ;;  %4176 = vmatmul.mubr.f32.gmra.mxu1 %v5557_v6  ;;  %v327_v16 = vrot.slane %v5109_v57, 7  ;;  %v5610_v4 = vsel %vm919_vm1, %v911_v53, %v912_v36  ;;  %v328_v57 = vrot.slane %v5127_v62, 7 }
  0x8a   : > { %4255 = vmatprep.mubr.f32.mxu0 %v5565_v58  ;;  %4292 = vmatprep.subr.mxu1 %v3440_v5  ;;  %v3439_v58 = vld [vmem:[%s7180_s1 + $0x198] sm:$0xff]  ;;  %7276 = vst [vmem:[#allocation33_spill] sm:$0xff] %v5610_v4 }
  0x8b   : > { %4256 = vmatmul.mubr.msk.f32.gmra.mxu0 %vm955_vm3, %v5576_v23  ;;  %4293 = vmatpush3.msra.mxu1 %v3440_v5  ;;  %v914_v5 = vrot.slane %v5127_v62, 1  ;;  %v5619_v23 = vsel %vm332_vm0, %v325_v21, %v326_v47  ;;  %v5625_v53 = vsel %vm332_vm0, %v326_v47, %v327_v16  ;;  %v5633_v21 = vsel %vm919_vm1, %v912_v36, %v913_v54  ;;  %v3470_v36 = vld [vmem:[%s7180_s1 + $0x210] sm:$0xff] }
  0x8c   : > { %4372 = vmatprep.subr.mxu0 %v3472_v22  ;;  %4178 = vmatprep.mubr.msk.f32.mxu1 %vm365_vm2, %v5585_v2  ;;  %7277 = vst [vmem:[#allocation34_spill] sm:$0xff] %v5619_v23  ;;  %7278 = vst [vmem:[#allocation35_spill] sm:$0xff] %v5633_v21  ;;  %v915_v62 = vrot.slane %v5137_v1, 1 }
  0x8d   : > { %4373 = vmatpush3.msra.mxu0 %v3472_v22  ;;  %4179 = vmatmul.mubr.f32.gmra.mxu1 %v5591_v8  ;;  %v329_v22 = vrot.slane %v5137_v1, 7  ;;  %v5644_v47 = vsel %vm919_vm1, %v913_v54, %v914_v5  ;;  %v330_v1 = vrot.slane %v5155_v7, 7 }
  0x8e   : > { %4258 = vmatprep.mubr.f32.mxu0 %v5599_v29  ;;  %4294 = vmatprep.subr.mxu1 %v3439_v58  ;;  %v3438_v29 = vld [vmem:[%s7180_s1 + $0x190] sm:$0xff]  ;;  %7279 = vst [vmem:[#allocation36_spill] sm:$0xff] %v5644_v47 }
  0x8f   : > { %4259 = vmatmul.mubr.msk.f32.gmra.mxu0 %vm955_vm3, %v5610_v4  ;;  %4295 = vmatpush3.msra.mxu1 %v3439_v58  ;;  %v916_v58 = vrot.slane %v5155_v7, 1  ;;  %v5653_v4 = vsel %vm332_vm0, %v327_v16, %v328_v57  ;;  %v5662_v54 = vsel %vm332_vm0, %v328_v57, %v329_v22  ;;  %v5670_v16 = vsel %vm919_vm1, %v914_v5, %v915_v62  ;;  %v3469_v5 = vld [vmem:[%s7180_s1 + $0x208] sm:$0xff] }
  0x90   : > { %4374 = vmatprep.subr.mxu0 %v3471_v30  ;;  %4181 = vmatprep.mubr.msk.f32.mxu1 %vm365_vm2, %v5619_v23  ;;  %v5657_v23 = vld [vmem:[%s4963_s30 + $0xf0] sm:$0xff]  ;;  %v917_v7 = vrot.slane %v5165_v10, 1 }
  0x91   : > { %4375 = vmatpush3.msra.mxu0 %v3471_v30  ;;  %4182 = vmatmul.mubr.f32.gmra.mxu1 %v5625_v53  ;;  %v5681_v57 = vsel %vm919_vm1, %v915_v62, %v916_v58  ;;  %v5692_v30 = vsel %vm332_vm0, %v329_v22, %v330_v1  ;;  %v7281_v62 = vrot.slane %v5165_v10, 7  ;;  %v3436_v22 = vld [vmem:[%s7180_s1 + $0x180] sm:$0xff] }
  0x92   : > { %4261 = vmatprep.mubr.f32.mxu0 %v5633_v21  ;;  %4296 = vmatprep.subr.mxu1 %v3438_v29  ;;  %v3437_v21 = vld [vmem:[%s7180_s1 + $0x188] sm:$0xff]  ;;  %7280 = vst [vmem:[#allocation37_spill] sm:$0xff] %v5681_v57 }
  0x93   : > { %4262 = vmatmul.mubr.msk.f32.gmra.mxu0 %vm955_vm3, %v5644_v47  ;;  %4297 = vmatpush3.msra.mxu1 %v3438_v29  ;;  %v5684_v29 = vrot.slane %v5657_v23, 1  ;;  %v5699_v47 = vsel %vm332_vm0, %v330_v1, %v7281_v62  ;;  %v3523_v62 = vld [vmem:[%s7180_s1 + $0x338] sm:$0xff] }
  0x94   : > { %4376 = vmatprep.subr.mxu0 %v3470_v36  ;;  %4184 = vmatprep.mubr.msk.f32.mxu1 %vm365_vm2, %v5653_v4 }
  0x95   : > { %4377 = vmatpush3.msra.mxu0 %v3470_v36  ;;  %4185 = vmatmul.mubr.f32.gmra.mxu1 %v5662_v54  ;;  %v5706_v36 = vsel %vm919_vm1, %v916_v58, %v917_v7  ;;  %v5717_v1 = vsel %vm919_vm1, %v917_v7, %v5684_v29  ;;  %v3499_v7 = vld [vmem:[%s7180_s1 + $0x2f8] sm:$0xff] }
  0x96   : > { %4264 = vmatprep.mubr.f32.mxu0 %v5670_v16  ;;  %4298 = vmatprep.subr.mxu1 %v3437_v21  ;;  %v3531_v58 = vld [vmem:[%s7180_s1 + $0x378] sm:$0xff] }
  0x97   : > { %4265 = vmatmul.mubr.msk.f32.gmra.mxu0 %vm955_vm3, %v5681_v57  ;;  %4299 = vmatpush3.msra.mxu1 %v3437_v21  ;;  %v3468_v21 = vld [vmem:[%s7180_s1 + $0x200] sm:$0xff] }
  0x98   : > { %4378 = vmatprep.subr.mxu0 %v3469_v5  ;;  %4187 = vmatprep.mubr.msk.f32.mxu1 %vm365_vm2, %v5692_v30 }
  0x99   : > { %4379 = vmatpush3.msra.mxu0 %v3469_v5  ;;  %4188 = vmatmul.mubr.f32.gmra.mxu1 %v5699_v47  ;;  %v3498_v5 = vld [vmem:[%s7180_s1 + $0x2f0] sm:$0xff] }
  0x9a   : > { %4267 = vmatprep.mubr.f32.mxu0 %v5706_v36  ;;  %4300 = vmatprep.subr.mxu1 %v3436_v22 }
  0x9b   : > { %4268 = vmatmul.mubr.msk.f32.gmra.mxu0 %vm955_vm3, %v5717_v1  ;;  %4301 = vmatpush3.msra.mxu1 %v3436_v22  ;;  %v5840_v22 = vld [vmem:[%s4963_s30 + $0x80] sm:$0xff] }
  0x9c   : > { %4380 = vmatprep.subr.mxu0 %v3468_v21  ;;  %4302 = vmatprep.mubr.msk.f32.mxu1 %vm365_vm2, %v5211_v39  ;;  %v5826_v39 = vld [vmem:[%s4963_s30 + $0x78] sm:$0xff] }
  0x9d   : > { %4381 = vmatpush3.msra.mxu0 %v3468_v21  ;;  %4303 = vmatmul.mubr.f32.vlgmr.msra.gmra.mxu1 %v5218_v44  ;;  %v3491_v44 = vld [vmem:[%s7180_s1 + $0x2b8] sm:$0xff]  ;;  %v5844_v21 = vld [vmem:[%s4963_s30 + $0x88] sm:$0xff] }
  0x9e   : > { %4382 = vmatprep.mubr.f32.mxu0 %v4994_v24  ;;  %4430 = vmatprep.subr.mxu1 %v3499_v7  ;;  %v3530_v24 = vld [vmem:[%s7180_s1 + $0x370] sm:$0xff] }
  0x9f   : > { %4383 = vmatmul.mubr.f32.vlgmr.msra.gmra.mxu0 %v5004_v27  ;;  %4431 = vmatpush3.msra.mxu1 %v3499_v7  ;;  %v3497_v27 = vld [vmem:[%s7180_s1 + $0x2e8] sm:$0xff]  ;;  %v3490_v7 = vld [vmem:[%s7180_s1 + $0x2b0] sm:$0xff] }
  0xa0   : > { %4510 = vmatprep.subr.mxu0 %v3531_v58  ;;  %4305 = vmatprep.mubr.msk.f32.mxu1 %vm365_vm2, %v5245_v60 }
  0xa1   : > { %4511 = vmatpush3.msra.mxu0 %v3531_v58  ;;  %4306 = vmatmul.mubr.f32.gmra.mxu1 %v5251_v63  ;;  %v3522_v58 = vld [vmem:[%s7180_s1 + $0x330] sm:$0xff] }
  0xa2   : > { %4385 = vmatprep.mubr.f32.mxu0 %v5022_v32  ;;  %4432 = vmatprep.subr.mxu1 %v3498_v5  ;;  %v3529_v32 = vld [vmem:[%s7180_s1 + $0x368] sm:$0xff] }
  0xa3   : > { %4386 = vmatmul.mubr.f32.gmra.mxu0 %v5032_v35  ;;  %4433 = vmatpush3.msra.mxu1 %v3498_v5  ;;  %v3496_v35 = vld [vmem:[%s7180_s1 + $0x2e0] sm:$0xff]  ;;  %v5858_v5 = vld [vmem:[%s4963_s30 + $0x90] sm:$0xff] }
  0xa4   : > { %4512 = vmatprep.subr.mxu0 %v3530_v24  ;;  %4308 = vmatprep.mubr.msk.f32.mxu1 %vm365_vm2, %v5279_v15 }
  0xa5   : > { %4513 = vmatpush3.msra.mxu0 %v3530_v24  ;;  %4309 = vmatmul.mubr.f32.gmra.mxu1 %v5285_v20  ;;  %v3489_v24 = vld [vmem:[%s7180_s1 + $0x2a8] sm:$0xff] }
  0xa6   : > { %4388 = vmatprep.mubr.f32.mxu0 %v5050_v40  ;;  %4434 = vmatprep.subr.mxu1 %v3497_v27  ;;  %v3528_v40 = vld [vmem:[%s7180_s1 + $0x360] sm:$0xff] }
  0xa7   : > { %4389 = vmatmul.mubr.f32.gmra.mxu0 %v5060_v43  ;;  %4435 = vmatpush3.msra.mxu1 %v3497_v27  ;;  %v3495_v43 = vld [vmem:[%s7180_s1 + $0x2d8] sm:$0xff]  ;;  %v3521_v27 = vld [vmem:[%s7180_s1 + $0x328] sm:$0xff] }
  0xa8   : > { %4514 = vmatprep.subr.mxu0 %v3529_v32  ;;  %4311 = vmatprep.mubr.msk.f32.mxu1 %vm365_vm2, %v5313_v42 }
  0xa9   : > { %4515 = vmatpush3.msra.mxu0 %v3529_v32  ;;  %4312 = vmatmul.mubr.f32.gmra.mxu1 %v5319_v50  ;;  %v7282_v32 = vld [vmem:[#allocation34_spill] sm:$0xff] }
  0xaa   : > { %4391 = vmatprep.mubr.f32.mxu0 %v5078_v48  ;;  %4436 = vmatprep.subr.mxu1 %v3496_v35  ;;  %v3527_v48 = vld [vmem:[%s7180_s1 + $0x358] sm:$0xff] }
  0xab   : > { %4392 = vmatmul.mubr.f32.gmra.mxu0 %v5088_v51  ;;  %4437 = vmatpush3.msra.mxu1 %v3496_v35  ;;  %v3494_v51 = vld [vmem:[%s7180_s1 + $0x2d0] sm:$0xff]  ;;  %v7283_v35 = vld [vmem:[#allocation4_spill] sm:$0xff] }
  0xac   : > { %4516 = vmatprep.subr.mxu0 %v3528_v40  ;;  %4314 = vmatprep.mubr.msk.f32.mxu1 %vm365_vm2, %v5347_v12 }
  0xad   : > { %4517 = vmatpush3.msra.mxu0 %v3528_v40  ;;  %4315 = vmatmul.mubr.f32.gmra.mxu1 %v5353_v18  ;;  %v3486_v40 = vld [vmem:[%s7180_s1 + $0x290] sm:$0xff] }
  0xae   : > { %4394 = vmatprep.mubr.f32.mxu0 %v5106_v56  ;;  %4438 = vmatprep.subr.mxu1 %v3495_v43  ;;  %v3526_v56 = vld [vmem:[%s7180_s1 + $0x350] sm:$0xff] }
  0xaf   : > { %4395 = vmatmul.mubr.f32.gmra.mxu0 %v5116_v59  ;;  %4439 = vmatpush3.msra.mxu1 %v3495_v43  ;;  %v3493_v59 = vld [vmem:[%s7180_s1 + $0x2c8] sm:$0xff]  ;;  %v5902_v43 = vld [vmem:[%s4963_s30 + $0xf8] sm:$0xff] }
  0xb0   : > { %4518 = vmatprep.subr.mxu0 %v3527_v48  ;;  %4317 = vmatprep.mubr.msk.f32.mxu1 %vm365_vm2, %v5381_v19 }
  0xb1   : > { %4519 = vmatpush3.msra.mxu0 %v3527_v48  ;;  %4318 = vmatmul.mubr.f32.gmra.mxu1 %v5387_v61  ;;  %v3518_v48 = vld [vmem:[%s7180_s1 + $0x310] sm:$0xff] }
  0xb2   : > { %4397 = vmatprep.mubr.f32.mxu0 %v5134_v0  ;;  %4440 = vmatprep.subr.mxu1 %v3494_v51  ;;  %v3525_v0 = vld [vmem:[%s7180_s1 + $0x348] sm:$0xff] }
  0xb3   : > { %4398 = vmatmul.mubr.f32.gmra.mxu0 %v5144_v3  ;;  %4441 = vmatpush3.msra.mxu1 %v3494_v51  ;;  %v3492_v3 = vld [vmem:[%s7180_s1 + $0x2c0] sm:$0xff]  ;;  %v1266_v51 = vrot.slane %v5657_v23, 7 }
  0xb4   : > { %4520 = vmatprep.subr.mxu0 %v3526_v56  ;;  %4320 = vmatprep.mubr.msk.f32.mxu1 %vm365_vm2, %v5415_v45 }
  0xb5   : > { %4521 = vmatpush3.msra.mxu0 %v3526_v56  ;;  %4321 = vmatmul.mubr.f32.gmra.mxu1 %v5421_v37  ;;  %v7285_v56 = vld [vmem:[#allocation6_spill] sm:$0xff] }
  0xb6   : > { %4400 = vmatprep.mubr.f32.mxu0 %v5162_v9  ;;  %4442 = vmatprep.subr.mxu1 %v3493_v59  ;;  %v3524_v9 = vld [vmem:[%s7180_s1 + $0x340] sm:$0xff] }
  0xb7   : > { %4401 = vmatmul.mubr.f32.gmra.mxu0 %v5174_v13  ;;  %4443 = vmatpush3.msra.mxu1 %v3493_v59  ;;  %v5822_v13 = vld [vmem:[%s4963_s30 + $0x70] sm:$0xff]  ;;  %v1267_v59 = vrot.slane %v5902_v43, 7 }
  0xb8   : > { %4522 = vmatprep.subr.mxu0 %v3525_v0  ;;  %4323 = vmatprep.mubr.msk.f32.mxu1 %vm365_vm2, %v5449_v17 }
  0xb9   : > { %4523 = vmatpush3.msra.mxu0 %v3525_v0  ;;  %4324 = vmatmul.mubr.f32.gmra.mxu1 %v5455_v55  ;;  %v7286_v0 = vld [vmem:[#allocation7_spill] sm:$0xff] }
  0xba   : > { %4403 = vmatprep.mubr.f32.mxu0 %v5822_v13  ;;  %4444 = vmatprep.subr.mxu1 %v3492_v3 }
  0xbb   : > { %4404 = vmatmul.mubr.f32.gmra.mxu0 %v5826_v39  ;;  %4445 = vmatpush3.msra.mxu1 %v3492_v3  ;;  %v3485_v3 = vld [vmem:[%s7180_s1 + $0x288] sm:$0xff] }
  0xbc   : > { %4524 = vmatprep.subr.mxu0 %v3524_v9  ;;  %4326 = vmatprep.mubr.msk.f32.mxu1 %vm365_vm2, %v5483_v25 }
  0xbd   : > { %4525 = vmatpush3.msra.mxu0 %v3524_v9  ;;  %4327 = vmatmul.mubr.f32.gmra.mxu1 %v5489_v52  ;;  %v3517_v9 = vld [vmem:[%s7180_s1 + $0x308] sm:$0xff] }
  0xbe   : > { %4406 = vmatprep.mubr.f32.mxu0 %v5840_v22  ;;  %4446 = vmatprep.subr.mxu1 %v3491_v44 }
  0xbf   : > { %4407 = vmatmul.mubr.f32.gmra.mxu0 %v5844_v21  ;;  %4447 = vmatpush3.msra.mxu1 %v3491_v44  ;;  %v7287_v44 = vrot.slane %v5165_v10, 7 }
  0xc0   : > { %4526 = vmatprep.subr.mxu0 %v3523_v62  ;;  %4329 = vmatprep.mubr.msk.f32.mxu1 %vm365_vm2, %v5517_v31 }
  0xc1   : > { %4527 = vmatpush3.msra.mxu0 %v3523_v62  ;;  %4330 = vmatmul.mubr.f32.gmra.mxu1 %v5523_v28  ;;  %v5929_v62 = vsel %vm332_vm0, %v7287_v44, %v1266_v51 }
  0xc2   : > { %4409 = vmatprep.mubr.f32.mxu0 %v5858_v5  ;;  %4448 = vmatprep.subr.mxu1 %v3490_v7 }
  0xc3   : > { %4410 = vmatmul.mubr.f32.gmra.mxu0 %v5025_v33  ;;  %4449 = vmatpush3.msra.mxu1 %v3490_v7  ;;  %v3488_v33 = vld [vmem:[%s7180_s1 + $0x2a0] sm:$0xff] }
  0xc4   : > { %4528 = vmatprep.subr.mxu0 %v3522_v58  ;;  %4332 = vmatprep.mubr.msk.f32.mxu1 %vm365_vm2, %v5551_v14  ;;  %v7288_v7 = vld [vmem:[#allocation8_spill] sm:$0xff] }
  0xc5   : > { %4529 = vmatpush3.msra.mxu0 %v3522_v58  ;;  %4333 = vmatmul.mubr.f32.gmra.mxu1 %v5557_v6  ;;  %v5934_v58 = vsel %vm332_vm0, %v1266_v51, %v1267_v59  ;;  %v7296_v51 = vld [vmem:[#allocation17_spill] sm:$0xff]  ;;  %v7298_v59 = vld [vmem:[#allocation19_spill] sm:$0xff] }
  0xc6   : > { %4412 = vmatprep.mubr.f32.mxu0 %v5043_v38  ;;  %4450 = vmatprep.subr.mxu1 %v3489_v24  ;;  %v3520_v38 = vld [vmem:[%s7180_s1 + $0x320] sm:$0xff] }
  0xc7   : > { %4413 = vmatmul.mubr.f32.gmra.mxu0 %v5053_v41  ;;  %4451 = vmatpush3.msra.mxu1 %v3489_v24  ;;  %v3487_v41 = vld [vmem:[%s7180_s1 + $0x298] sm:$0xff]  ;;  %v3484_v24 = vld [vmem:[%s7180_s1 + $0x280] sm:$0xff] }
  0xc8   : > { %4530 = vmatprep.subr.mxu0 %v3521_v27  ;;  %4335 = vmatprep.mubr.msk.f32.mxu1 %vm365_vm2, %v5585_v2 }
  0xc9   : > { %4531 = vmatpush3.msra.mxu0 %v3521_v27  ;;  %4336 = vmatmul.mubr.f32.gmra.mxu1 %v5591_v8  ;;  %v3516_v27 = vld [vmem:[%s7180_s1 + $0x300] sm:$0xff] }
  0xca   : > { %4415 = vmatprep.mubr.f32.mxu0 %v5071_v46  ;;  %4452 = vmatprep.subr.mxu1 %v3488_v33  ;;  %v3519_v46 = vld [vmem:[%s7180_s1 + $0x318] sm:$0xff] }
  0xcb   : > { %4416 = vmatmul.mubr.f32.gmra.mxu0 %v5081_v49  ;;  %4453 = vmatpush3.msra.mxu1 %v3488_v33  ;;  %v7284_v49 = vld [vmem:[#allocation5_spill] sm:$0xff]  ;;  %v7289_v33 = vld [vmem:[#allocation10_spill] sm:$0xff] }
  0xcc   : > { %4532 = vmatprep.subr.mxu0 %v3520_v38  ;;  %4338 = vmatprep.mubr.msk.f32.mxu1 %vm365_vm2, %v7282_v32 }
  0xcd   : > { %4533 = vmatpush3.msra.mxu0 %v3520_v38  ;;  %4339 = vmatmul.mubr.f32.gmra.mxu1 %v5625_v53  ;;  %v7290_v38 = vld [vmem:[#allocation11_spill] sm:$0xff] }
  0xce   : > { %4418 = vmatprep.mubr.f32.mxu0 %v7283_v35  ;;  %4454 = vmatprep.subr.mxu1 %v3487_v41  ;;  %v7292_v35 = vld [vmem:[#allocation13_spill] sm:$0xff] }
  0xcf   : > { %4419 = vmatmul.mubr.f32.gmra.mxu0 %v7284_v49  ;;  %4455 = vmatpush3.msra.mxu1 %v3487_v41  ;;  %v3561_v41 = vld [vmem:[%s7180_s1 + $0x3f0] sm:$0xff] }
  0xd0   : > { %4534 = vmatprep.subr.mxu0 %v3519_v46  ;;  %4341 = vmatprep.mubr.msk.f32.mxu1 %vm365_vm2, %v5653_v4  ;;  %v7293_v49 = vld [vmem:[#allocation14_spill] sm:$0xff] }
  0xd1   : > { %4535 = vmatpush3.msra.mxu0 %v3519_v46  ;;  %4342 = vmatmul.mubr.f32.gmra.mxu1 %v5662_v54  ;;  %v7291_v46 = vld [vmem:[#allocation12_spill] sm:$0xff] }
  0xd2   : > { %4421 = vmatprep.mubr.f32.mxu0 %v7285_v56  ;;  %4456 = vmatprep.subr.mxu1 %v3486_v40  ;;  %v7297_v56 = vld [vmem:[#allocation18_spill] sm:$0xff] }
  0xd3   : > { %4422 = vmatmul.mubr.f32.gmra.mxu0 %v7286_v0  ;;  %4457 = vmatpush3.msra.mxu1 %v3486_v40  ;;  %v7294_v40 = vld [vmem:[#allocation15_spill] sm:$0xff]  ;;  %v3557_v0 = vld [vmem:[%s7180_s1 + $0x3d0] sm:$0xff] }
  0xd4   : > { %4536 = vmatprep.subr.mxu0 %v3518_v48  ;;  %4344 = vmatprep.mubr.msk.f32.mxu1 %vm365_vm2, %v5692_v30 }
  0xd5   : > { %4537 = vmatpush3.msra.mxu0 %v3518_v48  ;;  %4345 = vmatmul.mubr.f32.gmra.mxu1 %v5699_v47  ;;  %v7295_v48 = vld [vmem:[#allocation16_spill] sm:$0xff] }
  0xd6   : > { %4424 = vmatprep.mubr.f32.mxu0 %v7288_v7  ;;  %4458 = vmatprep.subr.mxu1 %v3485_v3  ;;  %v7300_v7 = vld [vmem:[#allocation21_spill] sm:$0xff] }
  0xd7   : > { %4425 = vmatmul.mubr.f32.gmra.mxu0 %v5165_v10  ;;  %4459 = vmatpush3.msra.mxu1 %v3485_v3  ;;  %v3562_v10 = vld [vmem:[%s7180_s1 + $0x3f8] sm:$0xff] }
  0xd8   : > { %4538 = vmatprep.subr.mxu0 %v3517_v9  ;;  %4347 = vmatprep.mubr.msk.f32.mxu1 %vm365_vm2, %v5929_v62 }
  0xd9   : > { %4539 = vmatpush3.msra.mxu0 %v3517_v9  ;;  %4348 = vmatmul.mubr.f32.gmra.mxu1 %v5934_v58  ;;  %v7299_v9 = vld [vmem:[#allocation20_spill] sm:$0xff] }
  0xda   : > { %4427 = vmatprep.mubr.f32.mxu0 %v5657_v23  ;;  %4460 = vmatprep.subr.mxu1 %v3484_v24  ;;  %v3578_v23 = vld [vmem:[%s7180_s1 + $0x478] sm:$0xff] }
  0xdb   : > { %4428 = vmatmul.mubr.f32.gmra.mxu0 %v5902_v43  ;;  %4461 = vmatpush3.msra.mxu1 %v3484_v24  ;;  %v3556_v24 = vld [vmem:[%s7180_s1 + $0x3c8] sm:$0xff] }
  0xdc   : > { %4540 = vmatprep.subr.mxu0 %v3516_v27  ;;  %4462 = vmatprep.mubr.f32.mxu1 %v7289_v33  ;;  %v7302_v33 = vld [vmem:[#allocation23_spill] sm:$0xff] }
  0xdd   : > { %4541 = vmatpush3.msra.mxu0 %v3516_v27  ;;  %4463 = vmatmul.mubr.msk.f32.vlgmr.msra.gmra.mxu1 %vm955_vm3, %v7290_v38 }
  0xde   : > { %4542 = vmatprep.mubr.msk.f32.mxu0 %vm365_vm2, %v5245_v60  ;;  %4590 = vmatprep.subr.mxu1 %v3562_v10  ;;  %v3577_v60 = vld [vmem:[%s7180_s1 + $0x470] sm:$0xff] }
  0xdf   : > { %4543 = vmatmul.mubr.f32.vlgmr.msra.gmra.mxu0 %v5251_v63  ;;  %4591 = vmatpush3.msra.mxu1 %v3562_v10  ;;  %v3560_v63 = vld [vmem:[%s7180_s1 + $0x3e8] sm:$0xff]  ;;  %v7301_v10 = vld [vmem:[#allocation22_spill] sm:$0xff] }
  0xe0   : > { %4670 = vmatprep.subr.mxu0 %v3578_v23  ;;  %4465 = vmatprep.mubr.f32.mxu1 %v7291_v46 }
  0xe1   : > { %4671 = vmatpush3.msra.mxu0 %v3578_v23  ;;  %4466 = vmatmul.mubr.msk.f32.gmra.mxu1 %vm955_vm3, %v7292_v35  ;;  %v3555_v23 = vld [vmem:[%s7180_s1 + $0x3c0] sm:$0xff] }
  0xe2   : > { %4545 = vmatprep.mubr.msk.f32.mxu0 %vm365_vm2, %v5279_v15  ;;  %4592 = vmatprep.subr.mxu1 %v3561_v41  ;;  %v3576_v15 = vld [vmem:[%s7180_s1 + $0x468] sm:$0xff] }
  0xe3   : > { %4546 = vmatmul.mubr.f32.gmra.mxu0 %v5285_v20  ;;  %4593 = vmatpush3.msra.mxu1 %v3561_v41  ;;  %v3559_v20 = vld [vmem:[%s7180_s1 + $0x3e0] sm:$0xff] }
  0xe4   : > { %4672 = vmatprep.subr.mxu0 %v3577_v60  ;;  %4468 = vmatprep.mubr.f32.mxu1 %v7293_v49 }
  0xe5   : > { %4673 = vmatpush3.msra.mxu0 %v3577_v60  ;;  %4469 = vmatmul.mubr.msk.f32.gmra.mxu1 %vm955_vm3, %v7294_v40  ;;  %v7303_v60 = vld [vmem:[#allocation24_spill] sm:$0xff] }
  0xe6   : > { %4548 = vmatprep.mubr.msk.f32.mxu0 %vm365_vm2, %v5313_v42  ;;  %4594 = vmatprep.subr.mxu1 %v3560_v63  ;;  %v3575_v42 = vld [vmem:[%s7180_s1 + $0x460] sm:$0xff] }
  0xe7   : > { %4549 = vmatmul.mubr.f32.gmra.mxu0 %v5319_v50  ;;  %4595 = vmatpush3.msra.mxu1 %v3560_v63  ;;  %v3558_v50 = vld [vmem:[%s7180_s1 + $0x3d8] sm:$0xff]  ;;  %v7304_v63 = vld [vmem:[#allocation25_spill] sm:$0xff] }
  0xe8   : > { %4674 = vmatprep.subr.mxu0 %v3576_v15  ;;  %4471 = vmatprep.mubr.f32.mxu1 %v7295_v48 }
  0xe9   : > { %4675 = vmatpush3.msra.mxu0 %v3576_v15  ;;  %4472 = vmatmul.mubr.msk.f32.gmra.mxu1 %vm955_vm3, %v7296_v51  ;;  %v3554_v15 = vld [vmem:[%s7180_s1 + $0x3b8] sm:$0xff] }
  0xea   : > { %4551 = vmatprep.mubr.msk.f32.mxu0 %vm365_vm2, %v5347_v12  ;;  %4596 = vmatprep.subr.mxu1 %v3559_v20  ;;  %v3574_v12 = vld [vmem:[%s7180_s1 + $0x458] sm:$0xff] }
  0xeb   : > { %4552 = vmatmul.mubr.f32.gmra.mxu0 %v5353_v18  ;;  %4597 = vmatpush3.msra.mxu1 %v3559_v20 }
  0xec   : > { %4676 = vmatprep.subr.mxu0 %v3575_v42  ;;  %4474 = vmatprep.mubr.f32.mxu1 %v7297_v56 }
  0xed   : > { %4677 = vmatpush3.msra.mxu0 %v3575_v42  ;;  %4475 = vmatmul.mubr.msk.f32.gmra.mxu1 %vm955_vm3, %v7298_v59 }
  0xee   : > { %4554 = vmatprep.mubr.msk.f32.mxu0 %vm365_vm2, %v5381_v19  ;;  %4598 = vmatprep.subr.mxu1 %v3558_v50  ;;  %v6018_v18 = vpop.f32.mrf.mxu1  ;;  %v3573_v19 = vld [vmem:[%s7180_s1 + $0x450] sm:$0xff] }
  0xef   : > { %4555 = vmatmul.mubr.f32.gmra.mxu0 %v5387_v61  ;;  %4599 = vmatpush3.msra.mxu1 %v3558_v50  ;;  %v6024_v3 = vpop.f32.mrf.mxu0  ;;  %v7306_v50 = vld [vmem:[#allocation26_spill] sm:$0xff] }
  0xf0   : > { %4678 = vmatprep.subr.mxu0 %v3574_v12  ;;  %4477 = vmatprep.mubr.f32.mxu1 %v7299_v9  ;;  %v6027_v44 = vpop.f32.mrf.mxu1 }
  0xf1   : > { %4679 = vmatpush3.msra.mxu0 %v3574_v12  ;;  %4478 = vmatmul.mubr.msk.f32.gmra.mxu1 %vm955_vm3, %v7300_v7  ;;  %v6035_v61 = vpop.f32.mrf.mxu0  ;;  %v7307_v12 = vld [vmem:[#allocation27_spill] sm:$0xff] }
  0xf2   : > { %4557 = vmatprep.mubr.msk.f32.mxu0 %vm365_vm2, %v5415_v45  ;;  %4600 = vmatprep.subr.mxu1 %v3557_v0  ;;  %v3572_v45 = vld [vmem:[%s7180_s1 + $0x448] sm:$0xff] }
  0xf3   : > { %4558 = vmatmul.mubr.f32.gmra.mxu0 %v5421_v37  ;;  %4601 = vmatpush3.msra.mxu1 %v3557_v0  ;;  %v6044_v27 = vpop.f32.mrf.mxu1  ;;  %v3553_v0 = vld [vmem:[%s7180_s1 + $0x3b0] sm:$0xff] }
  0xf4   : > { %4680 = vmatprep.subr.mxu0 %v3573_v19  ;;  %4480 = vmatprep.mubr.f32.mxu1 %v7301_v10 }
  0xf5   : > { %4681 = vmatpush3.msra.mxu0 %v3573_v19  ;;  %4481 = vmatmul.mubr.msk.f32.gmra.mxu1 %vm955_vm3, %v7302_v33  ;;  %v6053_v37 = vpop.f32.mrf.mxu0  ;;  %v6055_v38 = vpop.f32.mrf.mxu1 }
  0xf6   : > { %4560 = vmatprep.mubr.msk.f32.mxu0 %vm365_vm2, %v5449_v17  ;;  %4602 = vmatprep.subr.mxu1 %v3556_v24  ;;  %v3571_v17 = vld [vmem:[%s7180_s1 + $0x440] sm:$0xff] }
  0xf7   : > { %4561 = vmatmul.mubr.f32.gmra.mxu0 %v5455_v55  ;;  %4603 = vmatpush3.msra.mxu1 %v3556_v24  ;;  %v6064_v41 = vpop.f32.mrf.mxu0  ;;  %v7309_v24 = vld [vmem:[#allocation28_spill] sm:$0xff] }
  0xf8   : > { %4682 = vmatprep.subr.mxu0 %v3572_v45  ;;  %4483 = vmatprep.mubr.f32.mxu1 %v7303_v60 }
  0xf9   : > { %4683 = vmatpush3.msra.mxu0 %v3572_v45  ;;  %4484 = vmatmul.mubr.msk.f32.gmra.mxu1 %vm955_vm3, %v7304_v63  ;;  %v6073_v55 = vpop.f32.mrf.mxu1  ;;  %v7310_v45 = vld [vmem:[#allocation29_spill] sm:$0xff] }
  0xfa   : > { %4563 = vmatprep.mubr.msk.f32.mxu0 %vm365_vm2, %v5483_v25  ;;  %4604 = vmatprep.subr.mxu1 %v3555_v23  ;;  %v3570_v25 = vld [vmem:[%s7180_s1 + $0x438] sm:$0xff] }
  0xfb   : > { %4564 = vmatmul.mubr.f32.gmra.mxu0 %v5489_v52  ;;  %4605 = vmatpush3.msra.mxu1 %v3555_v23  ;;  %v6082_v20 = vpop.f32.mrf.mxu0  ;;  %v6084_v42 = vpop.f32.mrf.mxu1 }
  0xfc   : > { %7305 = vst [vmem:[#allocation34_spill] sm:$0xff] %v6084_v42  ;;  %4684 = vmatprep.subr.mxu0 %v3571_v17  ;;  %4486 = vmatprep.mubr.f32.mxu1 %v7306_v50  ;;  %v7316_v42 = vld [vmem:[#allocation32_spill] sm:$0xff] }
  0xfd   : > { %4685 = vmatpush3.msra.mxu0 %v3571_v17  ;;  %4487 = vmatmul.mubr.msk.f32.gmra.mxu1 %vm955_vm3, %v7307_v12  ;;  %v6093_v52 = vpop.f32.mrf.mxu0  ;;  %v3552_v17 = vld [vmem:[%s7180_s1 + $0x3a8] sm:$0xff] }
  0xfe   : > { %4566 = vmatprep.mubr.msk.f32.mxu0 %vm365_vm2, %v5517_v31  ;;  %4606 = vmatprep.subr.mxu1 %v3554_v15  ;;  %v3569_v31 = vld [vmem:[%s7180_s1 + $0x430] sm:$0xff] }
  0xff   : > { %4567 = vmatmul.mubr.f32.gmra.mxu0 %v5523_v28  ;;  %4607 = vmatpush3.msra.mxu1 %v3554_v15  ;;  %v6102_v19 = vpop.f32.mrf.mxu1 }
 0x100   : > { %7308 = vst [vmem:[#allocation4_spill] sm:$0xff] %v6102_v19  ;;  %4686 = vmatprep.subr.mxu0 %v3570_v25  ;;  %4489 = vmatprep.mubr.f32.mxu1 %v7309_v24  ;;  %v7313_v19 = vld [vmem:[#allocation31_spill] sm:$0xff] }
 0x101   : > { %4687 = vmatpush3.msra.mxu0 %v3570_v25  ;;  %4490 = vmatmul.mubr.msk.f32.gmra.mxu1 %vm955_vm3, %v7310_v45  ;;  %v6111_v28 = vpop.f32.mrf.mxu0  ;;  %v6113_v23 = vpop.f32.mrf.mxu1  ;;  %v7312_v25 = vld [vmem:[#allocation30_spill] sm:$0xff] }
 0x102   : > { %7311 = vst [vmem:[#allocation5_spill] sm:$0xff] %v6113_v23  ;;  %4569 = vmatprep.mubr.msk.f32.mxu0 %vm365_vm2, %v5551_v14  ;;  %4608 = vmatprep.subr.mxu1 %v3553_v0  ;;  %v3568_v14 = vld [vmem:[%s7180_s1 + $0x428] sm:$0xff] }
 0x103   : > { %4570 = vmatmul.mubr.f32.gmra.mxu0 %v5557_v6  ;;  %4609 = vmatpush3.msra.mxu1 %v3553_v0  ;;  %v6122_v15 = vpop.f32.mrf.mxu0  ;;  %v3551_v0 = vld [vmem:[%s7180_s1 + $0x3a0] sm:$0xff] }
 0x104   : > { %4688 = vmatprep.subr.mxu0 %v3569_v31  ;;  %4492 = vmatprep.mubr.f32.mxu1 %v7312_v25 }
 0x105   : > { %4689 = vmatpush3.msra.mxu0 %v3569_v31  ;;  %4493 = vmatmul.mubr.msk.f32.gmra.mxu1 %vm955_vm3, %v7313_v19  ;;  %v6131_v6 = vpop.f32.mrf.mxu1 }
 0x106   : > { %7314 = vst [vmem:[#allocation6_spill] sm:$0xff] %v6131_v6  ;;  %4572 = vmatprep.mubr.msk.f32.mxu0 %vm365_vm2, %v5585_v2  ;;  %4610 = vmatprep.subr.mxu1 %v3552_v17  ;;  %v7317_v6 = vld [vmem:[#allocation33_spill] sm:$0xff]  ;;  %v3567_v2 = vld [vmem:[%s7180_s1 + $0x420] sm:$0xff] }
 0x107   : > { %4573 = vmatmul.mubr.f32.gmra.mxu0 %v5591_v8  ;;  %4611 = vmatpush3.msra.mxu1 %v3552_v17  ;;  %v6140_v31 = vpop.f32.mrf.mxu0  ;;  %v6142_v23 = vpop.f32.mrf.mxu1  ;;  %v3550_v17 = vld [vmem:[%s7180_s1 + $0x398] sm:$0xff] }
 0x108   : > { %7315 = vst [vmem:[#allocation7_spill] sm:$0xff] %v6142_v23  ;;  %4690 = vmatprep.subr.mxu0 %v3568_v14  ;;  %4495 = vmatprep.mubr.f32.mxu1 %v7316_v42  ;;  %v7319_v23 = vld [vmem:[#allocation35_spill] sm:$0xff] }
 0x109   : > { %4691 = vmatpush3.msra.mxu0 %v3568_v14  ;;  %4496 = vmatmul.mubr.msk.f32.gmra.mxu1 %vm955_vm3, %v7317_v6  ;;  %v6151_v8 = vpop.f32.mrf.mxu0  ;;  %v7320_v6 = vld [vmem:[#allocation36_spill] sm:$0xff] }
 0x10a   : > { %4575 = vmatprep.mubr.msk.f32.mxu0 %vm365_vm2, %v7282_v32  ;;  %4612 = vmatprep.subr.mxu1 %v3551_v0  ;;  %v3566_v32 = vld [vmem:[%s7180_s1 + $0x418] sm:$0xff] }
 0x10b   : > { %4576 = vmatmul.mubr.f32.gmra.mxu0 %v5625_v53  ;;  %4613 = vmatpush3.msra.mxu1 %v3551_v0  ;;  %v6160_v14 = vpop.f32.mrf.mxu1 }
 0x10c   : > { %7318 = vst [vmem:[#allocation8_spill] sm:$0xff] %v6160_v14  ;;  %4692 = vmatprep.subr.mxu0 %v3567_v2  ;;  %4498 = vmatprep.mubr.f32.mxu1 %v7319_v23 }
 0x10d   : > { %4693 = vmatpush3.msra.mxu0 %v3567_v2  ;;  %4499 = vmatmul.mubr.msk.f32.gmra.mxu1 %vm955_vm3, %v7320_v6  ;;  %v6169_v53 = vpop.f32.mrf.mxu0  ;;  %v6171_v0 = vpop.f32.mrf.mxu1  ;;  %v3549_v2 = vld [vmem:[%s7180_s1 + $0x390] sm:$0xff] }
 0x10e   : > { %7321 = vst [vmem:[#allocation10_spill] sm:$0xff] %v6171_v0  ;;  %4578 = vmatprep.mubr.msk.f32.mxu0 %vm365_vm2, %v5653_v4  ;;  %4614 = vmatprep.subr.mxu1 %v3550_v17  ;;  %v3565_v4 = vld [vmem:[%s7180_s1 + $0x410] sm:$0xff] }
 0x10f   : > { %4579 = vmatmul.mubr.f32.gmra.mxu0 %v5662_v54  ;;  %4615 = vmatpush3.msra.mxu1 %v3550_v17  ;;  %v6180_v14 = vpop.f32.mrf.mxu0  ;;  %v1820_v17 = vrot.slane %v5902_v43, 1 }
 0x110   : > { %4694 = vmatprep.subr.mxu0 %v3566_v32  ;;  %4501 = vmatprep.mubr.f32.mxu1 %v5670_v16 }
 0x111   : > { %4695 = vmatpush3.msra.mxu0 %v3566_v32  ;;  %4502 = vmatmul.mubr.msk.f32.gmra.mxu1 %vm955_vm3, %v5681_v57  ;;  %v6189_v54 = vpop.f32.mrf.mxu1  ;;  %v3548_v32 = vld [vmem:[%s7180_s1 + $0x388] sm:$0xff] }
 0x112   : > { %7322 = vst [vmem:[#allocation11_spill] sm:$0xff] %v6189_v54  ;;  %4581 = vmatprep.mubr.msk.f32.mxu0 %vm365_vm2, %v5692_v30  ;;  %4616 = vmatprep.subr.mxu1 %v3549_v2  ;;  %v3547_v54 = vld [vmem:[%s7180_s1 + $0x380] sm:$0xff] }
 0x113   : > { %4582 = vmatmul.mubr.f32.gmra.mxu0 %v5699_v47  ;;  %4617 = vmatpush3.msra.mxu1 %v3549_v2  ;;  %v6199_v0 = vpop.f32.mrf.mxu0  ;;  %v6201_v57 = vpop.f32.mrf.mxu1  ;;  %v3564_v47 = vld [vmem:[%s7180_s1 + $0x408] sm:$0xff]  ;;  %v6215_v2 = vsel %vm919_vm1, %v5684_v29, %v1820_v17 }
 0x114   : > { %7323 = vst [vmem:[#allocation12_spill] sm:$0xff] %v6201_v57  ;;  %4696 = vmatprep.subr.mxu0 %v3565_v4  ;;  %4504 = vmatprep.mubr.f32.mxu1 %v5706_v36 }
 0x115   : > { %4697 = vmatpush3.msra.mxu0 %v3565_v4  ;;  %4505 = vmatmul.mubr.msk.f32.gmra.mxu1 %vm955_vm3, %v5717_v1  ;;  %v6210_v30 = vpop.f32.mrf.mxu0  ;;  %v6223_v4 = vsel %vm919_vm1, %v1820_v17, %v5684_v29 }
 0x116   : > { %4584 = vmatprep.mubr.msk.f32.mxu0 %vm365_vm2, %v5929_v62  ;;  %4618 = vmatprep.subr.mxu1 %v3548_v32  ;;  %7324 = vst [vmem:[#allocation13_spill] sm:$0xff] %v6223_v4  ;;  %v3563_v62 = vld [vmem:[%s7180_s1 + $0x400] sm:$0xff] }
 0x117   : > { %4585 = vmatmul.mubr.f32.gmra.mxu0 %v5934_v58  ;;  %4619 = vmatpush3.msra.mxu1 %v3548_v32  ;;  %v6226_v57 = vpop.f32.mrf.mxu1  ;;  %v7327_v58 = vmov 0.0   ;;  %v4814_v32 = vld [vmem:[%s4963_s30 + $0x10] sm:$0xff] }
 0x118   : > { %7325 = vst [vmem:[#allocation14_spill] sm:$0xff] %v6226_v57  ;;  %4698 = vmatprep.subr.mxu0 %v3564_v47  ;;  %4507 = vmatprep.mubr.f32.mxu1 %v6215_v2  ;;  %v4816_v57 = vld [vmem:[%s4963_s30 + $0x20] sm:$0xff] }
 0x119   : > { %4699 = vmatpush3.msra.mxu0 %v3564_v47  ;;  %4508 = vmatmul.mubr.msk.f32.gmra.mxu1 %vm955_vm3, %v6223_v4  ;;  %v6235_v26 = vpop.f32.mrf.mxu0  ;;  %v6237_v29 = vpop.f32.mrf.mxu1 }
 0x11a   : > { %7326 = vst [vmem:[#allocation15_spill] sm:$0xff] %v6237_v29  ;;  %4587 = vmatprep.mubr.f32.mxu0 %v7327_v58  ;;  %4620 = vmatprep.subr.mxu1 %v3547_v54 }
 0x11b   : > { %4588 = vmatmul.mubr.f32.gmra.mxu0 %v7327_v58  ;;  %4621 = vmatpush3.msra.mxu1 %v3547_v54  ;;  %v6244_v17 = vpop.f32.mrf.mxu0 }
 0x11c   : > { %4700 = vmatprep.subr.mxu0 %v3563_v62  ;;  %4622 = vmatprep.mubr.f32.mxu1 %v4814_v32  ;;  %v4817_v32 = vld [vmem:[%s4963_s30 + $0x28] sm:$0xff] }
 0x11d   : > { %4701 = vmatpush3.msra.mxu0 %v3563_v62  ;;  %v4144_v47 = vpop.f32.mrf.mxu1  ;;  %4623 = vmatmul.mubr.f32.vlgmr.msra.gmra.mxu1 %v4815_v11 }
 0x11e   : > { %v735_v29 = vadd.f32 %v4144_v47, %v6024_v3  ;;  %4702 = vmatprep.mubr.f32.mxu0 %v7291_v46  ;;  %4625 = vmatprep.mubr.f32.mxu1 %v4816_v57  ;;  %v4818_v47 = vld [vmem:[%s4963_s30 + $0x30] sm:$0xff] }
 0x11f   : > { %v4224_v4 = vpop.f32.mrf.mxu0  ;;  %4703 = vmatmul.mubr.msk.f32.vlgmr.msra.gmra.mxu0 %vm955_vm3, %v7292_v35  ;;  %v729_v54 = vpop.f32.mrf.mxu1 }
 0x120   : > { %v6254_v58 = vadd.f32 %v4224_v4, %v735_v29  ;;  %v730_v62 = vadd.f32 %v729_v54, %v6035_v61  ;;  %4705 = vmatprep.mubr.f32.mxu0 %v7293_v49 }
 0x121   : > { %v1075_v11 = vpop.f32.mrf.mxu0  ;;  %v4147_v3 = vpop.f32.mrf.mxu1  ;;  %4626 = vmatmul.mubr.f32.gmra.mxu1 %v4817_v32 }
 0x122   : > { %v6259_v46 = vadd.f32 %v1075_v11, %v730_v62  ;;  %v745_v57 = vadd.f32 %v4147_v3, %v6053_v37  ;;  %4628 = vmatprep.mubr.f32.mxu1 %v4818_v47  ;;  %v4819_v62 = vld [vmem:[%s4963_s30 + $0x38] sm:$0xff]  ;;  %v4820_v3 = vld [vmem:[%s4963_s30 + $0x40] sm:$0xff] }
 0x123   : > { %v4227_v35 = vpop.f32.mrf.mxu0  ;;  %4706 = vmatmul.mubr.msk.f32.gmra.mxu0 %vm955_vm3, %v7294_v40  ;;  %v739_v61 = vpop.f32.mrf.mxu1 }
 0x124   : > { %v6266_v4 = vadd.f32 %v4227_v35, %v745_v57  ;;  %v740_v49 = vadd.f32 %v739_v61, %v6064_v41  ;;  %4708 = vmatprep.mubr.f32.mxu0 %v7295_v48  ;;  %v4821_v35 = vld [vmem:[%s4963_s30 + $0x48] sm:$0xff] }
 0x125   : > { %v1085_v29 = vpop.f32.mrf.mxu0  ;;  %v4150_v54 = vpop.f32.mrf.mxu1  ;;  %4629 = vmatmul.mubr.f32.gmra.mxu1 %v4819_v62 }
 0x126   : > { %v6271_v37 = vadd.f32 %v1085_v29, %v740_v49  ;;  %v755_v11 = vadd.f32 %v4150_v54, %v6082_v20  ;;  %4631 = vmatprep.mubr.f32.mxu1 %v4820_v3  ;;  %v4822_v49 = vld [vmem:[%s4963_s30 + $0x50] sm:$0xff] }
 0x127   : > { %v4230_v40 = vpop.f32.mrf.mxu0  ;;  %4709 = vmatmul.mubr.msk.f32.gmra.mxu0 %vm955_vm3, %v7296_v51  ;;  %v749_v41 = vpop.f32.mrf.mxu1 }
 0x128   : > { %v6278_v32 = vadd.f32 %v4230_v40, %v755_v11  ;;  %v750_v48 = vadd.f32 %v749_v41, %v6093_v52  ;;  %4711 = vmatprep.mubr.f32.mxu0 %v7297_v56  ;;  %v4823_v11 = vld [vmem:[%s4963_s30 + $0x58] sm:$0xff]  ;;  %v4824_v40 = vld [vmem:[%s4963_s30 + $0x60] sm:$0xff] }
 0x129   : > { %v1095_v57 = vpop.f32.mrf.mxu0  ;;  %v4153_v47 = vpop.f32.mrf.mxu1  ;;  %4632 = vmatmul.mubr.f32.gmra.mxu1 %v4821_v35 }
 0x12a   : > { %v6283_v20 = vadd.f32 %v1095_v57, %v750_v48  ;;  %v765_v61 = vadd.f32 %v4153_v47, %v6111_v28  ;;  %4634 = vmatprep.mubr.f32.mxu1 %v4822_v49  ;;  %v4825_v47 = vld [vmem:[%s4963_s30 + $0x68] sm:$0xff] }
 0x12b   : > { %v4233_v51 = vpop.f32.mrf.mxu0  ;;  %4712 = vmatmul.mubr.msk.f32.gmra.mxu0 %vm955_vm3, %v7298_v59  ;;  %v759_v52 = vpop.f32.mrf.mxu1 }
 0x12c   : > { %v6290_v29 = vadd.f32 %v4233_v51, %v765_v61  ;;  %v760_v56 = vadd.f32 %v759_v52, %v6122_v15  ;;  %4714 = vmatprep.mubr.f32.mxu0 %v7299_v9 }
 0x12d   : > { %v1105_v54 = vpop.f32.mrf.mxu0  ;;  %v4156_v62 = vpop.f32.mrf.mxu1  ;;  %4635 = vmatmul.mubr.f32.gmra.mxu1 %v4823_v11  ;;  %v4826_v11 = vld [vmem:[%s4963_s30 + $0x98] sm:$0xff] }
 0x12e   : > { %v6295_v28 = vadd.f32 %v1105_v54, %v760_v56  ;;  %v775_v3 = vadd.f32 %v4156_v62, %v6140_v31  ;;  %4637 = vmatprep.mubr.f32.mxu1 %v4824_v40 }
 0x12f   : > { %v4236_v41 = vpop.f32.mrf.mxu0  ;;  %4715 = vmatmul.mubr.msk.f32.gmra.mxu0 %vm955_vm3, %v7300_v7  ;;  %v769_v59 = vpop.f32.mrf.mxu1 }
 0x130   : > { %v6302_v15 = vadd.f32 %v4236_v41, %v775_v3  ;;  %v770_v9 = vadd.f32 %v769_v59, %v6151_v8  ;;  %4717 = vmatprep.mubr.f32.mxu0 %v7301_v10  ;;  %v4827_v3 = vld [vmem:[%s4963_s30 + $0xa0] sm:$0xff] }
 0x131   : > { %v1115_v48 = vpop.f32.mrf.mxu0  ;;  %v4159_v57 = vpop.f32.mrf.mxu1  ;;  %4638 = vmatmul.mubr.f32.gmra.mxu1 %v4825_v47 }
 0x132   : > { %v6307_v35 = vadd.f32 %v1115_v48, %v770_v9  ;;  %v785_v31 = vadd.f32 %v4159_v57, %v6169_v53  ;;  %4640 = vmatprep.mubr.f32.mxu1 %v5822_v13  ;;  %v4828_v9 = vld [vmem:[%s4963_s30 + $0xa8] sm:$0xff]  ;;  %v4829_v57 = vld [vmem:[%s4963_s30 + $0xb0] sm:$0xff] }
 0x133   : > { %v4239_v61 = vpop.f32.mrf.mxu0  ;;  %4718 = vmatmul.mubr.msk.f32.gmra.mxu0 %vm955_vm3, %v7302_v33  ;;  %v779_v7 = vpop.f32.mrf.mxu1 }
 0x134   : > { %v6314_v49 = vadd.f32 %v4239_v61, %v785_v31  ;;  %v780_v10 = vadd.f32 %v779_v7, %v6180_v14  ;;  %4720 = vmatprep.mubr.f32.mxu0 %v7303_v60  ;;  %v4830_v7 = vld [vmem:[%s4963_s30 + $0xb8] sm:$0xff] }
 0x135   : > { %v1125_v8 = vpop.f32.mrf.mxu0  ;;  %v4162_v51 = vpop.f32.mrf.mxu1  ;;  %4641 = vmatmul.mubr.f32.gmra.mxu1 %v5826_v39 }
 0x136   : > { %v6319_v52 = vadd.f32 %v1125_v8, %v780_v10  ;;  %v795_v13 = vadd.f32 %v4162_v51, %v6199_v0  ;;  %4643 = vmatprep.mubr.f32.mxu1 %v5840_v22  ;;  %v4831_v8 = vld [vmem:[%s4963_s30 + $0xc0] sm:$0xff]  ;;  %v7328_v51 = vld [vmem:[#allocation33_spill] sm:$0xff] }
 0x137   : > { %v4242_v53 = vpop.f32.mrf.mxu0  ;;  %4721 = vmatmul.mubr.msk.f32.gmra.mxu0 %vm955_vm3, %v7304_v63  ;;  %v789_v33 = vpop.f32.mrf.mxu1 }
 0x138   : > { %v6326_v56 = vadd.f32 %v4242_v53, %v795_v13  ;;  %v790_v60 = vadd.f32 %v789_v33, %v6210_v30  ;;  %4723 = vmatprep.mubr.f32.mxu0 %v7306_v50 }
 0x139   : > { %v1135_v39 = vpop.f32.mrf.mxu0  ;;  %v4165_v14 = vpop.f32.mrf.mxu1  ;;  %4644 = vmatmul.mubr.f32.gmra.mxu1 %v5844_v21 }
 0x13a   : > { %v6331_v0 = vadd.f32 %v1135_v39, %v790_v60  ;;  %v805_v22 = vadd.f32 %v4165_v14, %v6235_v26  ;;  %4646 = vmatprep.mubr.f32.mxu1 %v5858_v5  ;;  %v4832_v39 = vld [vmem:[%s4963_s30 + $0xc8] sm:$0xff]  ;;  %v7330_v14 = vld [vmem:[#allocation4_spill] sm:$0xff] }
 0x13b   : > { %v4245_v63 = vpop.f32.mrf.mxu0  ;;  %4724 = vmatmul.mubr.msk.f32.gmra.mxu0 %vm955_vm3, %v7307_v12  ;;  %v799_v30 = vpop.f32.mrf.mxu1 }
 0x13c   : > { %v6338_v54 = vadd.f32 %v4245_v63, %v805_v22  ;;  %v800_v50 = vadd.f32 %v799_v30, %v6244_v17  ;;  %4726 = vmatprep.mubr.f32.mxu0 %v7309_v24  ;;  %v4833_v63 = vld [vmem:[%s4963_s30 + $0xd0] sm:$0xff] }
 0x13d   : > { %v1145_v21 = vpop.f32.mrf.mxu0  ;;  %v4168_v62 = vpop.f32.mrf.mxu1  ;;  %4647 = vmatmul.mubr.f32.gmra.mxu1 %v4826_v11 }
 0x13e   : > { %v6343_v26 = vadd.f32 %v1145_v21, %v800_v50  ;;  %v815_v5 = vadd.f32 %v4168_v62, %v6018_v18  ;;  %4649 = vmatprep.mubr.f32.mxu1 %v4827_v3  ;;  %v4834_v3 = vld [vmem:[%s4963_s30 + $0xd8] sm:$0xff] }
 0x13f   : > { %v4248_v12 = vpop.f32.mrf.mxu0  ;;  %4727 = vmatmul.mubr.msk.f32.gmra.mxu0 %vm955_vm3, %v7310_v45  ;;  %v809_v17 = vpop.f32.mrf.mxu1 }
 0x140   : > { %v6350_v40 = vadd.f32 %v4248_v12, %v815_v5  ;;  %v810_v24 = vadd.f32 %v809_v17, %v6027_v44  ;;  %4729 = vmatprep.mubr.f32.mxu0 %v7312_v25  ;;  %v7332_v17 = vld [vmem:[#allocation6_spill] sm:$0xff] }
 0x141   : > { %v1155_v41 = vpop.f32.mrf.mxu0  ;;  %v4171_v59 = vpop.f32.mrf.mxu1  ;;  %4650 = vmatmul.mubr.f32.gmra.mxu1 %v4828_v9 }
 0x142   : > { %v6355_v18 = vadd.f32 %v1155_v41, %v810_v24  ;;  %v825_v48 = vadd.f32 %v4171_v59, %v6044_v27  ;;  %4652 = vmatprep.mubr.f32.mxu1 %v4829_v57  ;;  %v4835_v41 = vld [vmem:[%s4963_s30 + $0xe0] sm:$0xff]  ;;  %v7333_v59 = vld [vmem:[#allocation37_spill] sm:$0xff] }
 0x143   : > { %v4251_v45 = vpop.f32.mrf.mxu0  ;;  %4730 = vmatmul.mubr.msk.f32.gmra.mxu0 %vm955_vm3, %v7313_v19  ;;  %v819_v44 = vpop.f32.mrf.mxu1 }
 0x144   : > { %v6362_v47 = vadd.f32 %v4251_v45, %v825_v48  ;;  %v820_v25 = vadd.f32 %v819_v44, %v6055_v38  ;;  %4732 = vmatprep.mubr.f32.mxu0 %v7316_v42  ;;  %v7329_v42 = vld [vmem:[#allocation34_spill] sm:$0xff] }
 0x145   : > { %v1165_v31 = vpop.f32.mrf.mxu0  ;;  %v4174_v61 = vpop.f32.mrf.mxu1  ;;  %4653 = vmatmul.mubr.f32.gmra.mxu1 %v4830_v7 }
 0x146   : > { %v6367_v27 = vadd.f32 %v1165_v31, %v820_v25  ;;  %v835_v10 = vadd.f32 %v4174_v61, %v6073_v55  ;;  %4655 = vmatprep.mubr.f32.mxu1 %v4831_v8  ;;  %v4836_v25 = vld [vmem:[%s4963_s30 + $0xe8] sm:$0xff]  ;;  %v7335_v61 = vld [vmem:[#allocation8_spill] sm:$0xff] }
 0x147   : > { %v4254_v19 = vpop.f32.mrf.mxu0  ;;  %4733 = vmatmul.mubr.msk.f32.gmra.mxu0 %vm955_vm3, %v7328_v51  ;;  %v829_v38 = vpop.f32.mrf.mxu1 }
 0x148   : > { %v6374_v13 = vadd.f32 %v4254_v19, %v835_v10  ;;  %v830_v53 = vadd.f32 %v829_v38, %v7329_v42  ;;  %4735 = vmatprep.mubr.f32.mxu0 %v7319_v23  ;;  %v7331_v23 = vld [vmem:[#allocation5_spill] sm:$0xff]  ;;  %v4837_v10 = vld [vmem:[%s4963_s30 + $0xf0] sm:$0xff] }
 0x149   : > { %v1175_v33 = vpop.f32.mrf.mxu0  ;;  %v4177_v60 = vpop.f32.mrf.mxu1  ;;  %4656 = vmatmul.mubr.f32.gmra.mxu1 %v4832_v39  ;;  %v7336_v38 = vld [vmem:[#allocation10_spill] sm:$0xff] }
 0x14a   : > { %v6379_v55 = vadd.f32 %v1175_v33, %v830_v53  ;;  %v845_v22 = vadd.f32 %v4177_v60, %v7330_v14  ;;  %4658 = vmatprep.mubr.f32.mxu1 %v4833_v63  ;;  %v7337_v60 = vld [vmem:[#allocation11_spill] sm:$0xff]  ;;  %v7338_v14 = vmov 0.0   ;;  %v7339_v63 = vld [vmem:[#allocation13_spill] sm:$0xff] }
 0x14b   : > { %v4257_v30 = vpop.f32.mrf.mxu0  ;;  %4736 = vmatmul.mubr.msk.f32.gmra.mxu0 %vm955_vm3, %v7320_v6  ;;  %v839_v50 = vpop.f32.mrf.mxu1 }
 0x14c   : > { %v6386_v21 = vadd.f32 %v4257_v30, %v845_v22  ;;  %v840_v62 = vadd.f32 %v839_v50, %v7331_v23  ;;  %4738 = vmatprep.mubr.f32.mxu0 %v5670_v16  ;;  %v7334_v16 = vld [vmem:[#allocation7_spill] sm:$0xff]  ;;  %v7340_v50 = vld [vmem:[#allocation12_spill] sm:$0xff] }
 0x14d   : > { %v1185_v11 = vpop.f32.mrf.mxu0  ;;  %v4180_v5 = vpop.f32.mrf.mxu1  ;;  %4659 = vmatmul.mubr.f32.gmra.mxu1 %v4834_v3 }
 0x14e   : > { %v6391_v12 = vadd.f32 %v1185_v11, %v840_v62  ;;  %v855_v24 = vadd.f32 %v4180_v5, %v7332_v17  ;;  %4661 = vmatprep.mubr.f32.mxu1 %v4835_v41  ;;  %v7341_v11 = vld [vmem:[#allocation14_spill] sm:$0xff] }
 0x14f   : > { %v4260_v6 = vpop.f32.mrf.mxu0  ;;  %4739 = vmatmul.mubr.msk.f32.gmra.mxu0 %vm955_vm3, %v7333_v59  ;;  %v849_v9 = vpop.f32.mrf.mxu1 }
 0x150   : > { %v6398_v48 = vadd.f32 %v4260_v6, %v855_v24  ;;  %v850_v57 = vadd.f32 %v849_v9, %v7334_v16  ;;  %4741 = vmatprep.mubr.f32.mxu0 %v5706_v36  ;;  %v7342_v24 = vld [vmem:[#allocation15_spill] sm:$0xff] }
 0x151   : > { %v1195_v45 = vpop.f32.mrf.mxu0  ;;  %v4183_v44 = vpop.f32.mrf.mxu1  ;;  %4662 = vmatmul.mubr.f32.gmra.mxu1 %v4836_v25 }
 0x152   : > { %v6403_v31 = vadd.f32 %v1195_v45, %v850_v57  ;;  %v865_v7 = vadd.f32 %v4183_v44, %v7335_v61  ;;  %4664 = vmatprep.mubr.f32.mxu1 %v4837_v10 }
 0x153   : > { %v4263_v8 = vpop.f32.mrf.mxu0  ;;  %4742 = vmatmul.mubr.msk.f32.gmra.mxu0 %vm955_vm3, %v5717_v1  ;;  %v859_v19 = vpop.f32.mrf.mxu1 }
 0x154   : > { %v6410_v51 = vadd.f32 %v4263_v8, %v865_v7  ;;  %v860_v36 = vadd.f32 %v859_v19, %v7336_v38  ;;  %4744 = vmatprep.mubr.f32.mxu0 %v6215_v2 }
 0x155   : > { %v1205_v42 = vpop.f32.mrf.mxu0  ;;  %v4186_v53 = vpop.f32.mrf.mxu1  ;;  %4665 = vmatmul.mubr.f32.gmra.mxu1 %v5902_v43 }
 0x156   : > { %v6415_v33 = vadd.f32 %v1205_v42, %v860_v36  ;;  %v875_v39 = vadd.f32 %v4186_v53, %v7337_v60  ;;  %4667 = vmatprep.mubr.f32.mxu1 %v7338_v14 }
 0x157   : > { %v4266_v22 = vpop.f32.mrf.mxu0  ;;  %4745 = vmatmul.mubr.msk.f32.gmra.mxu0 %vm955_vm3, %v7339_v63  ;;  %v869_v1 = vpop.f32.mrf.mxu1 }
 0x158   : > { %v6422_v30 = vadd.f32 %v4266_v22, %v875_v39  ;;  %v870_v2 = vadd.f32 %v869_v1, %v7340_v50  ;;  %4747 = vmatprep.mubr.f32.mxu0 %v7338_v14 }
 0x159   : > { %v1215_v23 = vpop.f32.mrf.mxu0  ;;  %v4189_v43 = vpop.f32.mrf.mxu1  ;;  %4668 = vmatmul.mubr.f32.gmra.mxu1 %v7338_v14 }
 0x15a   : > { %v6427_v62 = vadd.f32 %v1215_v23, %v870_v2  ;;  %v885_v5 = vadd.f32 %v4189_v43, %v7341_v11 }
 0x15b   : > { %v4269_v3 = vpop.f32.mrf.mxu0  ;;  %4748 = vmatmul.mubr.f32.gmra.mxu0 %v7338_v14  ;;  %v879_v34 = vpop.f32.mrf.mxu1 }
 0x15c   : > { %v6431_v17 = vadd.f32 %v4269_v3, %v885_v5  ;;  %v880_v41 = vadd.f32 %v879_v34, %v7342_v24 }
 0x15d   : > { %v1225_v6 = vpop.f32.mrf.mxu0  ;;  %v4304_v59 = vpop.f32.mrf.mxu1 }
 0x15e   : > { %v6434_v9 = vadd.f32 %v1225_v6, %v880_v41  ;;  %v1515_v16 = vadd.f32 %v4304_v59, %v6254_v58 }
 0x15f   : > { %v4384_v57 = vpop.f32.mrf.mxu0  ;;  %v1355_v45 = vpop.f32.mrf.mxu1 }
 0x160   : > { %v6437_v44 = vadd.f32 %v4384_v57, %v1515_v16  ;;  %v1514_v25 = vadd.f32 %v1355_v45, %v6259_v46 }
 0x161   : > { %v1629_v61 = vpop.f32.mrf.mxu0  ;;  %v4307_v7 = vpop.f32.mrf.mxu1 }
 0x162   : > { %v6440_v10 = vadd.f32 %v1629_v61, %v1514_v25  ;;  %v1517_v8 = vadd.f32 %v4307_v7, %v6266_v4 }
 0x163   : > { %v4387_v19 = vpop.f32.mrf.mxu0  ;;  %v1365_v38 = vpop.f32.mrf.mxu1 }
 0x164   : > { %v6443_v36 = vadd.f32 %v4387_v19, %v1517_v8  ;;  %v1516_v42 = vadd.f32 %v1365_v38, %v6271_v37 }
 0x165   : > { %v1639_v53 = vpop.f32.mrf.mxu0  ;;  %v4310_v58 = vpop.f32.mrf.mxu1 }
 0x166   : > { %v6446_v60 = vadd.f32 %v1639_v53, %v1516_v42  ;;  %v1519_v39 = vadd.f32 %v4310_v58, %v6278_v32 }
 0x167   : > { %v4390_v14 = vpop.f32.mrf.mxu0  ;;  %v1375_v46 = vpop.f32.mrf.mxu1 }
 0x168   : > { %v6449_v22 = vadd.f32 %v4390_v14, %v1519_v39  ;;  %v1518_v63 = vadd.f32 %v1375_v46, %v6283_v20 }
 0x169   : > { %v1649_v1 = vpop.f32.mrf.mxu0  ;;  %v4313_v4 = vpop.f32.mrf.mxu1 }
 0x16a   : > { %v6452_v50 = vadd.f32 %v1649_v1, %v1518_v63  ;;  %v1521_v2 = vadd.f32 %v4313_v4, %v6290_v29 }
 0x16b   : > { %v4393_v23 = vpop.f32.mrf.mxu0  ;;  %v1385_v37 = vpop.f32.mrf.mxu1 }
 0x16c   : > { %v6455_v43 = vadd.f32 %v4393_v23, %v1521_v2  ;;  %v1520_v11 = vadd.f32 %v1385_v37, %v6295_v28 }
 0x16d   : > { %v1659_v5 = vpop.f32.mrf.mxu0  ;;  %v4316_v32 = vpop.f32.mrf.mxu1 }
 0x16e   : > { %v6458_v3 = vadd.f32 %v1659_v5, %v1520_v11  ;;  %v1523_v34 = vadd.f32 %v4316_v32, %v6302_v15 }
 0x16f   : > { %v4396_v24 = vpop.f32.mrf.mxu0  ;;  %v1395_v20 = vpop.f32.mrf.mxu1 }
 0x170   : > { %v6461_v41 = vadd.f32 %v4396_v24, %v1523_v34  ;;  %v1522_v6 = vadd.f32 %v1395_v20, %v6307_v35 }
 0x171   : > { %v1669_v59 = vpop.f32.mrf.mxu0  ;;  %v4319_v29 = vpop.f32.mrf.mxu1 }
 0x172   : > { %v6464_v16 = vadd.f32 %v1669_v59, %v1522_v6  ;;  %v1525_v57 = vadd.f32 %v4319_v29, %v6314_v49 }
 0x173   : > { %v4399_v45 = vpop.f32.mrf.mxu0  ;;  %v1405_v28 = vpop.f32.mrf.mxu1 }
 0x174   : > { %v6467_v25 = vadd.f32 %v4399_v45, %v1525_v57  ;;  %v1524_v61 = vadd.f32 %v1405_v28, %v6319_v52 }
 0x175   : > { %v1679_v7 = vpop.f32.mrf.mxu0  ;;  %v4322_v15 = vpop.f32.mrf.mxu1 }
 0x176   : > { %v6470_v8 = vadd.f32 %v1679_v7, %v1524_v61  ;;  %v1527_v19 = vadd.f32 %v4322_v15, %v6326_v56 }
 0x177   : > { %v4402_v38 = vpop.f32.mrf.mxu0  ;;  %v1415_v35 = vpop.f32.mrf.mxu1 }
 0x178   : > { %v6473_v42 = vadd.f32 %v4402_v38, %v1527_v19  ;;  %v1526_v53 = vadd.f32 %v1415_v35, %v6331_v0 }
 0x179   : > { %v1689_v58 = vpop.f32.mrf.mxu0  ;;  %v4325_v49 = vpop.f32.mrf.mxu1 }
 0x17a   : > { %v6476_v39 = vadd.f32 %v1689_v58, %v1526_v53  ;;  %v1529_v14 = vadd.f32 %v4325_v49, %v6338_v54 }
 0x17b   : > { %v4405_v46 = vpop.f32.mrf.mxu0  ;;  %v1425_v52 = vpop.f32.mrf.mxu1 }
 0x17c   : > { %v6479_v63 = vadd.f32 %v4405_v46, %v1529_v14  ;;  %v1528_v1 = vadd.f32 %v1425_v52, %v6343_v26 }
 0x17d   : > { %v1699_v4 = vpop.f32.mrf.mxu0  ;;  %v4328_v56 = vpop.f32.mrf.mxu1 }
 0x17e   : > { %v6482_v2 = vadd.f32 %v1699_v4, %v1528_v1  ;;  %v1531_v23 = vadd.f32 %v4328_v56, %v6350_v40 }
 0x17f   : > { %v4408_v37 = vpop.f32.mrf.mxu0  ;;  %v1435_v0 = vpop.f32.mrf.mxu1 }
 0x180   : > { %v6485_v11 = vadd.f32 %v4408_v37, %v1531_v23  ;;  %v1530_v5 = vadd.f32 %v1435_v0, %v6355_v18 }
 0x181   : > { %v1709_v32 = vpop.f32.mrf.mxu0  ;;  %v4331_v54 = vpop.f32.mrf.mxu1 }
 0x182   : > { %v6488_v34 = vadd.f32 %v1709_v32, %v1530_v5  ;;  %v1533_v24 = vadd.f32 %v4331_v54, %v6362_v47 }
 0x183   : > { %v4411_v20 = vpop.f32.mrf.mxu0  ;;  %v1445_v26 = vpop.f32.mrf.mxu1 }
 0x184   : > { %v6491_v6 = vadd.f32 %v4411_v20, %v1533_v24  ;;  %v1532_v59 = vadd.f32 %v1445_v26, %v6367_v27 }
 0x185   : > { %v1719_v29 = vpop.f32.mrf.mxu0  ;;  %v4334_v40 = vpop.f32.mrf.mxu1 }
 0x186   : > { %v6494_v57 = vadd.f32 %v1719_v29, %v1532_v59  ;;  %v1535_v45 = vadd.f32 %v4334_v40, %v6374_v13 }
 0x187   : > { %v4414_v28 = vpop.f32.mrf.mxu0  ;;  %v1455_v18 = vpop.f32.mrf.mxu1 }
 0x188   : > { %v6497_v61 = vadd.f32 %v4414_v28, %v1535_v45  ;;  %v1534_v7 = vadd.f32 %v1455_v18, %v6379_v55 }
 0x189   : > { %v1729_v15 = vpop.f32.mrf.mxu0  ;;  %v4337_v47 = vpop.f32.mrf.mxu1 }
 0x18a   : > { %v6500_v19 = vadd.f32 %v1729_v15, %v1534_v7  ;;  %v1537_v38 = vadd.f32 %v4337_v47, %v6386_v21 }
 0x18b   : > { %v4417_v35 = vpop.f32.mrf.mxu0  ;;  %v1465_v27 = vpop.f32.mrf.mxu1 }
 0x18c   : > { %v6503_v53 = vadd.f32 %v4417_v35, %v1537_v38  ;;  %v1536_v58 = vadd.f32 %v1465_v27, %v6391_v12 }
 0x18d   : > { %v1739_v49 = vpop.f32.mrf.mxu0  ;;  %v4340_v13 = vpop.f32.mrf.mxu1 }
 0x18e   : > { %v6506_v14 = vadd.f32 %v1739_v49, %v1536_v58  ;;  %v1539_v46 = vadd.f32 %v4340_v13, %v6398_v48 }
 0x18f   : > { %v4420_v52 = vpop.f32.mrf.mxu0  ;;  %v1475_v55 = vpop.f32.mrf.mxu1 }
 0x190   : > { %v6509_v1 = vadd.f32 %v4420_v52, %v1539_v46  ;;  %v1538_v4 = vadd.f32 %v1475_v55, %v6403_v31 }
 0x191   : > { %v1749_v56 = vpop.f32.mrf.mxu0  ;;  %v4343_v21 = vpop.f32.mrf.mxu1 }
 0x192   : > { %v6512_v23 = vadd.f32 %v1749_v56, %v1538_v4  ;;  %v1541_v37 = vadd.f32 %v4343_v21, %v6410_v51 }
 0x193   : > { %v4423_v0 = vpop.f32.mrf.mxu0  ;;  %v1485_v12 = vpop.f32.mrf.mxu1 }
 0x194   : > { %7343 = vst [vmem:[#allocation16_spill] sm:$0xff] %v6512_v23  ;;  %v6515_v5 = vadd.f32 %v4423_v0, %v1541_v37  ;;  %v1540_v32 = vadd.f32 %v1485_v12, %v6415_v33 }
 0x195   : > { %v1759_v54 = vpop.f32.mrf.mxu0  ;;  %v4346_v48 = vpop.f32.mrf.mxu1 }
 0x196   : > { %v6518_v24 = vadd.f32 %v1759_v54, %v1540_v32  ;;  %v1543_v20 = vadd.f32 %v4346_v48, %v6422_v30 }
 0x197   : > { %v4426_v26 = vpop.f32.mrf.mxu0  ;;  %v1495_v31 = vpop.f32.mrf.mxu1 }
 0x198   : > { %7344 = vst [vmem:[#allocation17_spill] sm:$0xff] %v6518_v24  ;;  %v6521_v59 = vadd.f32 %v4426_v26, %v1543_v20  ;;  %v1542_v29 = vadd.f32 %v1495_v31, %v6427_v62 }
 0x199   : > { %v1769_v40 = vpop.f32.mrf.mxu0  ;;  %v4349_v51 = vpop.f32.mrf.mxu1 }
 0x19a   : > { %v6524_v45 = vadd.f32 %v1769_v40, %v1542_v29  ;;  %v1545_v28 = vadd.f32 %v4349_v51, %v6431_v17 }
 0x19b   : > { %v4429_v18 = vpop.f32.mrf.mxu0  ;;  %v1505_v33 = vpop.f32.mrf.mxu1 }
 0x19c   : > { %7345 = vst [vmem:[#allocation18_spill] sm:$0xff] %v6524_v45  ;;  %v6527_v7 = vadd.f32 %v4429_v18, %v1545_v28  ;;  %v1544_v15 = vadd.f32 %v1505_v33, %v6434_v9 }
 0x19d   : > { %v1779_v47 = vpop.f32.mrf.mxu0  ;;  %v4464_v30 = vpop.f32.mrf.mxu1 }
 0x19e   : > { %v6530_v38 = vadd.f32 %v1779_v47, %v1544_v15  ;;  %v2069_v35 = vadd.f32 %v4464_v30, %v6437_v44 }
 0x19f   : > { %v4544_v27 = vpop.f32.mrf.mxu0  ;;  %v6533_v62 = vpop.f32.mrf.mxu1 }
 0x1a0   : > { %7346 = vst [vmem:[#allocation19_spill] sm:$0xff] %v6530_v38  ;;  %v6535_v58 = vadd.f32 %v4544_v27, %v2069_v35 }
 0x1a1   : > { %v6537_v49 = vpop.f32.mrf.mxu0  ;;  %v4467_v17 = vpop.f32.mrf.mxu1 }
 0x1a2   : > { %v2071_v13 = vadd.f32 %v4467_v17, %v6443_v36 }
 0x1a3   : > { %v4547_v46 = vpop.f32.mrf.mxu0  ;;  %v6540_v52 = vpop.f32.mrf.mxu1 }
 0x1a4   : > { %v6542_v9 = vadd.f32 %v4547_v46, %v2071_v13 }
 0x1a5   : > { %v6544_v55 = vpop.f32.mrf.mxu0  ;;  %v4470_v4 = vpop.f32.mrf.mxu1 }
 0x1a6   : > { %v2073_v44 = vadd.f32 %v4470_v4, %v6449_v22 }
 0x1a7   : > { %v4550_v56 = vpop.f32.mrf.mxu0  ;;  %v6547_v21 = vpop.f32.mrf.mxu1 }
 0x1a8   : > { %v6549_v37 = vadd.f32 %v4550_v56, %v2073_v44 }
 0x1a9   : > { %v6551_v0 = vpop.f32.mrf.mxu0  ;;  %v4473_v12 = vpop.f32.mrf.mxu1 }
 0x1aa   : > { %v2075_v36 = vadd.f32 %v4473_v12, %v6455_v43 }
 0x1ab   : > { %v4553_v32 = vpop.f32.mrf.mxu0  ;;  %v6554_v54 = vpop.f32.mrf.mxu1 }
 0x1ac   : > { %v6556_v48 = vadd.f32 %v4553_v32, %v2075_v36 }
 0x1ad   : > { %v6558_v20 = vpop.f32.mrf.mxu0  ;;  %v4476_v26 = vpop.f32.mrf.mxu1 }
 0x1ae   : > { %v2077_v22 = vadd.f32 %v4476_v26, %v6461_v41 }
 0x1af   : > { %v4556_v31 = vpop.f32.mrf.mxu0  ;;  %v6561_v29 = vpop.f32.mrf.mxu1 }
 0x1b0   : > { %v6563_v40 = vadd.f32 %v4556_v31, %v2077_v22 }
 0x1b1   : > { %v6565_v51 = vpop.f32.mrf.mxu0  ;;  %v4479_v28 = vpop.f32.mrf.mxu1 }
 0x1b2   : > { %v2079_v43 = vadd.f32 %v4479_v28, %v6467_v25 }
 0x1b3   : > { %v4559_v18 = vpop.f32.mrf.mxu0  ;;  %v6568_v33 = vpop.f32.mrf.mxu1 }
 0x1b4   : > { %v6570_v15 = vadd.f32 %v4559_v18, %v2079_v43 }
 0x1b5   : > { %v6572_v47 = vpop.f32.mrf.mxu0  ;;  %v4482_v30 = vpop.f32.mrf.mxu1 }
 0x1b6   : > { %v2081_v41 = vadd.f32 %v4482_v30, %v6473_v42 }
 0x1b7   : > { %v4562_v35 = vpop.f32.mrf.mxu0  ;;  %v6575_v27 = vpop.f32.mrf.mxu1 }
 0x1b8   : > { %v6577_v17 = vadd.f32 %v4562_v35, %v2081_v41 }
 0x1b9   : > { %v6579_v13 = vpop.f32.mrf.mxu0  ;;  %v4485_v46 = vpop.f32.mrf.mxu1 }
 0x1ba   : > { %v2083_v25 = vadd.f32 %v4485_v46, %v6479_v63 }
 0x1bb   : > { %v4565_v4 = vpop.f32.mrf.mxu0  ;;  %v6582_v44 = vpop.f32.mrf.mxu1 }
 0x1bc   : > { %v6584_v56 = vadd.f32 %v4565_v4, %v2083_v25 }
 0x1bd   : > { %v6586_v12 = vpop.f32.mrf.mxu0  ;;  %v4488_v36 = vpop.f32.mrf.mxu1 }
 0x1be   : > { %v2085_v42 = vadd.f32 %v4488_v36, %v6485_v11 }
 0x1bf   : > { %v4568_v32 = vpop.f32.mrf.mxu0  ;;  %v6589_v26 = vpop.f32.mrf.mxu1 }
 0x1c0   : > { %v6591_v22 = vadd.f32 %v4568_v32, %v2085_v42 }
 0x1c1   : > { %v6593_v31 = vpop.f32.mrf.mxu0  ;;  %v4491_v28 = vpop.f32.mrf.mxu1 }
 0x1c2   : > { %v2087_v63 = vadd.f32 %v4491_v28, %v6491_v6 }
 0x1c3   : > { %v4571_v43 = vpop.f32.mrf.mxu0  ;;  %v6596_v18 = vpop.f32.mrf.mxu1 }
 0x1c4   : > { %v6598_v30 = vadd.f32 %v4571_v43, %v2087_v63 }
 0x1c5   : > { %v6600_v41 = vpop.f32.mrf.mxu0  ;;  %v4494_v35 = vpop.f32.mrf.mxu1 }
 0x1c6   : > { %v2089_v11 = vadd.f32 %v4494_v35, %v6497_v61 }
 0x1c7   : > { %v4574_v46 = vpop.f32.mrf.mxu0  ;;  %v6603_v25 = vpop.f32.mrf.mxu1 }
 0x1c8   : > { %v6605_v4 = vadd.f32 %v4574_v46, %v2089_v11 }
 0x1c9   : > { %v6607_v36 = vpop.f32.mrf.mxu0  ;;  %v4497_v42 = vpop.f32.mrf.mxu1 }
 0x1ca   : > { %v2091_v6 = vadd.f32 %v4497_v42, %v6503_v53 }
 0x1cb   : > { %v4577_v32 = vpop.f32.mrf.mxu0  ;;  %v6610_v28 = vpop.f32.mrf.mxu1 }
 0x1cc   : > { %v6612_v63 = vadd.f32 %v4577_v32, %v2091_v6 }
 0x1cd   : > { %v6614_v43 = vpop.f32.mrf.mxu0  ;;  %v4500_v38 = vpop.f32.mrf.mxu1 }
 0x1ce   : > { %7347 = vst [vmem:[#allocation20_spill] sm:$0xff] %v6612_v63  ;;  %7348 = vst [vmem:[#allocation21_spill] sm:$0xff] %v6614_v43  ;;  %v2093_v61 = vadd.f32 %v4500_v38, %v6509_v1 }
 0x1cf   : > { %v4580_v35 = vpop.f32.mrf.mxu0  ;;  %v6617_v45 = vpop.f32.mrf.mxu1 }
 0x1d0   : > { %v6619_v11 = vadd.f32 %v4580_v35, %v2093_v61 }
 0x1d1   : > { %v6621_v46 = vpop.f32.mrf.mxu0  ;;  %v4503_v24 = vpop.f32.mrf.mxu1 }
 0x1d2   : > { %7349 = vst [vmem:[#allocation22_spill] sm:$0xff] %v6619_v11  ;;  %v2095_v53 = vadd.f32 %v4503_v24, %v6515_v5  ;;  %v2068_v5 = vadd.f32 %v6533_v62, %v6440_v10 }
 0x1d3   : > { %v4583_v42 = vpop.f32.mrf.mxu0  ;;  %v6624_v23 = vpop.f32.mrf.mxu1 }
 0x1d4   : > { %v6626_v6 = vadd.f32 %v4583_v42, %v2095_v53 }
 0x1d5   : > { %v6628_v32 = vpop.f32.mrf.mxu0  ;;  %v4506_v63 = vpop.f32.mrf.mxu1 }
 0x1d6   : > { %7350 = vst [vmem:[#allocation23_spill] sm:$0xff] %v6626_v6  ;;  %7351 = vst [vmem:[#allocation24_spill] sm:$0xff] %v6628_v32  ;;  %v2097_v1 = vadd.f32 %v4506_v63, %v6521_v59  ;;  %v2342_v63 = vadd.f32 %v6537_v49, %v2068_v5 }
 0x1d7   : > { %v4586_v38 = vpop.f32.mrf.mxu0  ;;  %v6631_v43 = vpop.f32.mrf.mxu1 }
 0x1d8   : > { %v6633_v61 = vadd.f32 %v4586_v38, %v2097_v1  ;;  %v2070_v1 = vadd.f32 %v6540_v52, %v6446_v60 }
 0x1d9   : > { %v6635_v35 = vpop.f32.mrf.mxu0  ;;  %v4509_v11 = vpop.f32.mrf.mxu1 }
 0x1da   : > { %7352 = vst [vmem:[#allocation25_spill] sm:$0xff] %v6633_v61  ;;  %7353 = vst [vmem:[#allocation26_spill] sm:$0xff] %v6635_v35  ;;  %v2099_v24 = vadd.f32 %v4509_v11, %v6527_v7  ;;  %v2072_v7 = vadd.f32 %v6547_v21, %v6452_v50  ;;  %v2074_v50 = vadd.f32 %v6554_v54, %v6458_v3 }
 0x1db   : > { %v4589_v53 = vpop.f32.mrf.mxu0  ;;  %v6640_v42 = vpop.f32.mrf.mxu1 }
 0x1dc   : > { %v6642_v6 = vadd.f32 %v4589_v53, %v2099_v24  ;;  %v2344_v53 = vadd.f32 %v6544_v55, %v2070_v1 }
 0x1dd   : > { %v6644_v32 = vpop.f32.mrf.mxu0  ;;  %v4624_v59 = vpop.f32.mrf.mxu1 }
 0x1de   : > { %7354 = vst [vmem:[#allocation27_spill] sm:$0xff] %v6642_v6  ;;  %v2617_v38 = vadd.f32 %v4624_v59, %v6535_v58 }
 0x1df   : > { %v4704_v61 = vpop.f32.mrf.mxu0  ;;  %v2457_v35 = vpop.f32.mrf.mxu1 }
 0x1e0   : > { %v2616_v10 = vadd.f32 %v2457_v35, %v2342_v63  ;;  %v6652_v62 = vadd.f32 %v4704_v61, %v2617_v38  ;;  %v2346_v35 = vadd.f32 %v6551_v0, %v2072_v7 }
 0x1e1   : > { %v2731_v11 = vpop.f32.mrf.mxu0  ;;  %v4627_v24 = vpop.f32.mrf.mxu1 }
 0x1e2   : > { %v6655_v6 = vadd.f32 %v2731_v11, %v2616_v10  ;;  %v2619_v49 = vadd.f32 %v4627_v24, %v6542_v9  ;;  %v2960_v21 = vmul.f32 %v6652_v62, %v6652_v62  ;;  %v2348_v11 = vadd.f32 %v6558_v20, %v2074_v50 }
 0x1e3   : > { %v4707_v5 = vpop.f32.mrf.mxu0  ;;  %v2467_v60 = vpop.f32.mrf.mxu1 }
 0x1e4   : > { %v2959_v58 = vmul.f32 %v6655_v6, %v6655_v6  ;;  %v2618_v52 = vadd.f32 %v2467_v60, %v2344_v53  ;;  %v2922_v59 = vadd.f32 %v6652_v62, %v6655_v6  ;;  %v6667_v9 = vadd.f32 %v4707_v5, %v2619_v49 }
 0x1e5   : > { %v2741_v61 = vpop.f32.mrf.mxu0  ;;  %v4630_v55 = vpop.f32.mrf.mxu1 }
 0x1e6   : > { %v6669_v63 = vadd.f32 %v2741_v61, %v2618_v52  ;;  %v2621_v1 = vadd.f32 %v4630_v55, %v6549_v37  ;;  %v2991_v0 = vadd.f32 %v2960_v21, %v2959_v58  ;;  %v2962_v5 = vmul.f32 %v6667_v9, %v6667_v9 }
 0x1e7   : > { %v4710_v38 = vpop.f32.mrf.mxu0  ;;  %v2477_v10 = vpop.f32.mrf.mxu1  ;;  %v2076_v52 = vadd.f32 %v6561_v29, %v6464_v16 }
 0x1e8   : > { %v2923_v7 = vadd.f32 %v2922_v59, %v6669_v63  ;;  %v2961_v3 = vmul.f32 %v6669_v63, %v6669_v63  ;;  %v2620_v54 = vadd.f32 %v2477_v10, %v2346_v35  ;;  %v6676_v24 = vadd.f32 %v4710_v38, %v2621_v1 }
 0x1e9   : > { %v2751_v53 = vpop.f32.mrf.mxu0  ;;  %v4633_v49 = vpop.f32.mrf.mxu1  ;;  %v2078_v1 = vadd.f32 %v6568_v33, %v6470_v8 }
 0x1ea   : > { %v2992_v60 = vadd.f32 %v2991_v0, %v2961_v3  ;;  %v6680_v37 = vadd.f32 %v2751_v53, %v2620_v54  ;;  %v2924_v58 = vadd.f32 %v2923_v7, %v6667_v9  ;;  %v2623_v21 = vadd.f32 %v4633_v49, %v6556_v48 }
 0x1eb   : > { %v4713_v35 = vpop.f32.mrf.mxu0  ;;  %v2487_v61 = vpop.f32.mrf.mxu1  ;;  %v2964_v38 = vmul.f32 %v6676_v24, %v6676_v24  ;;  %v2350_v54 = vadd.f32 %v6565_v51, %v2076_v52 }
 0x1ec   : > { %v2925_v20 = vadd.f32 %v2924_v58, %v6680_v37  ;;  %v2963_v50 = vmul.f32 %v6680_v37, %v6680_v37  ;;  %v2993_v55 = vadd.f32 %v2992_v60, %v2962_v5  ;;  %v2622_v59 = vadd.f32 %v2487_v61, %v2348_v11 }
 0x1ed   : > { %v6693_v10 = vadd.f32 %v4713_v35, %v2623_v21  ;;  %v2761_v16 = vpop.f32.mrf.mxu0  ;;  %v4636_v29 = vpop.f32.mrf.mxu1  ;;  %v2352_v5 = vadd.f32 %v6572_v47, %v2078_v1  ;;  %v2080_v60 = vadd.f32 %v6575_v27, %v6476_v39 }
 0x1ee   : > { %v2994_v48 = vadd.f32 %v2993_v55, %v2963_v50  ;;  %v6695_v0 = vadd.f32 %v2761_v16, %v2622_v59  ;;  %v2926_v7 = vadd.f32 %v2925_v20, %v6676_v24  ;;  %v2625_v3 = vadd.f32 %v4636_v29, %v6563_v40 }
 0x1ef   : > { %v4716_v11 = vpop.f32.mrf.mxu0  ;;  %v2497_v53 = vpop.f32.mrf.mxu1  ;;  %v2966_v40 = vmul.f32 %v6693_v10, %v6693_v10  ;;  %v2354_v29 = vadd.f32 %v6579_v13, %v2080_v60 }
 0x1f0   : > { %v2927_v8 = vadd.f32 %v2926_v7, %v6695_v0  ;;  %v2965_v33 = vmul.f32 %v6695_v0, %v6695_v0  ;;  %v2995_v49 = vadd.f32 %v2994_v48, %v2964_v38  ;;  %v2624_v58 = vadd.f32 %v2497_v53, %v2350_v54 }
 0x1f1   : > { %v2771_v21 = vpop.f32.mrf.mxu0  ;;  %v4639_v35 = vpop.f32.mrf.mxu1  ;;  %v6708_v52 = vadd.f32 %v4716_v11, %v2625_v3  ;;  %v2082_v48 = vadd.f32 %v6582_v44, %v6482_v2 }
 0x1f2   : > { %v2996_v51 = vadd.f32 %v2995_v49, %v2965_v33  ;;  %v2928_v61 = vadd.f32 %v2927_v8, %v6693_v10  ;;  %v6711_v20 = vadd.f32 %v2771_v21, %v2624_v58  ;;  %v2627_v50 = vadd.f32 %v4639_v35, %v6570_v15 }
 0x1f3   : > { %v4719_v55 = vpop.f32.mrf.mxu0  ;;  %v2507_v47 = vpop.f32.mrf.mxu1  ;;  %v2968_v7 = vmul.f32 %v6708_v52, %v6708_v52  ;;  %v2356_v58 = vadd.f32 %v6586_v12, %v2082_v48  ;;  %v2084_v21 = vadd.f32 %v6589_v26, %v6488_v34 }
 0x1f4   : > { %v2997_v59 = vadd.f32 %v2996_v51, %v2966_v40  ;;  %v2626_v1 = vadd.f32 %v2507_v47, %v2352_v5  ;;  %v2929_v39 = vadd.f32 %v2928_v61, %v6711_v20  ;;  %v2967_v27 = vmul.f32 %v6711_v20, %v6711_v20 }
 0x1f5   : > { %v2781_v38 = vpop.f32.mrf.mxu0  ;;  %v4642_v16 = vpop.f32.mrf.mxu1  ;;  %v6724_v54 = vadd.f32 %v4719_v55, %v2627_v50 }
 0x1f6   : > { %v6722_v15 = vadd.f32 %v2781_v38, %v2626_v1  ;;  %v2998_v3 = vadd.f32 %v2997_v59, %v2967_v27  ;;  %v2930_v11 = vadd.f32 %v2929_v39, %v6708_v52  ;;  %v2629_v53 = vadd.f32 %v4642_v16, %v6577_v17 }
 0x1f7   : > { %v4722_v8 = vpop.f32.mrf.mxu0  ;;  %v2517_v33 = vpop.f32.mrf.mxu1  ;;  %v2970_v40 = vmul.f32 %v6724_v54, %v6724_v54  ;;  %v2086_v27 = vadd.f32 %v6596_v18, %v6494_v57 }
 0x1f8   : > { %v2969_v13 = vmul.f32 %v6722_v15, %v6722_v15  ;;  %v2628_v49 = vadd.f32 %v2517_v33, %v2354_v29  ;;  %v2931_v2 = vadd.f32 %v2930_v11, %v6722_v15  ;;  %v2999_v44 = vadd.f32 %v2998_v3, %v2968_v7 }
 0x1f9   : > { %v2791_v5 = vpop.f32.mrf.mxu0  ;;  %v4645_v60 = vpop.f32.mrf.mxu1  ;;  %v6739_v61 = vadd.f32 %v4722_v8, %v2629_v53 }
 0x1fa   : > { %v6734_v35 = vadd.f32 %v2791_v5, %v2628_v49  ;;  %v2631_v17 = vadd.f32 %v4645_v60, %v6584_v56  ;;  %v3000_v51 = vadd.f32 %v2999_v44, %v2969_v13  ;;  %v2932_v50 = vadd.f32 %v2931_v2, %v6724_v54 }
 0x1fb   : > { %v4725_v55 = vpop.f32.mrf.mxu0  ;;  %v2527_v47 = vpop.f32.mrf.mxu1  ;;  %v2358_v56 = vadd.f32 %v6593_v31, %v2084_v21  ;;  %v2972_v29 = vmul.f32 %v6739_v61, %v6739_v61  ;;  %v2360_v49 = vadd.f32 %v6600_v41, %v2086_v27  ;;  %v2088_v2 = vadd.f32 %v6603_v25, %v6500_v19 }
 0x1fc   : > { %v2971_v12 = vmul.f32 %v6734_v35, %v6734_v35  ;;  %v2630_v59 = vadd.f32 %v2527_v47, %v2356_v58  ;;  %v2933_v34 = vadd.f32 %v2932_v50, %v6734_v35  ;;  %v3001_v26 = vadd.f32 %v3000_v51, %v2970_v40 }
 0x1fd   : > { %v2801_v1 = vpop.f32.mrf.mxu0  ;;  %v4648_v39 = vpop.f32.mrf.mxu1  ;;  %v6748_v38 = vadd.f32 %v4725_v55, %v2631_v17  ;;  %v2362_v47 = vadd.f32 %v6607_v36, %v2088_v2 }
 0x1fe   : > { %v6750_v16 = vadd.f32 %v2801_v1, %v2630_v59  ;;  %v3002_v48 = vadd.f32 %v3001_v26, %v2971_v12  ;;  %v2934_v7 = vadd.f32 %v2933_v34, %v6739_v61  ;;  %v2633_v3 = vadd.f32 %v4648_v39, %v6591_v22 }
 0x1ff   : > { %v4728_v11 = vpop.f32.mrf.mxu0  ;;  %v2537_v53 = vpop.f32.mrf.mxu1  ;;  %v2974_v44 = vmul.f32 %v6748_v38, %v6748_v38  ;;  %v2090_v12 = vadd.f32 %v6610_v28, %v6506_v14 }
 0x200   : > { %v2973_v31 = vmul.f32 %v6750_v16, %v6750_v16  ;;  %v2632_v8 = vadd.f32 %v2537_v53, %v2358_v56  ;;  %v2935_v57 = vadd.f32 %v2934_v7, %v6750_v16  ;;  %v3003_v18 = vadd.f32 %v3002_v48, %v2972_v29 }
 0x201   : > { %v2811_v33 = vpop.f32.mrf.mxu0  ;;  %v4651_v13 = vpop.f32.mrf.mxu1  ;;  %v6766_v60 = vadd.f32 %v4728_v11, %v2633_v3  ;;  %v7356_v11 = vld [vmem:[#allocation16_spill] sm:$0xff] }
 0x202   : > { %v6764_v22 = vadd.f32 %v2811_v33, %v2632_v8  ;;  %v3004_v5 = vadd.f32 %v3003_v18, %v2973_v31  ;;  %v2936_v58 = vadd.f32 %v2935_v57, %v6748_v38  ;;  %v2635_v21 = vadd.f32 %v4651_v13, %v6598_v30  ;;  %v7357_v13 = vld [vmem:[#allocation20_spill] sm:$0xff] }
 0x203   : > { %v4731_v17 = vpop.f32.mrf.mxu0  ;;  %v2547_v40 = vpop.f32.mrf.mxu1  ;;  %v2976_v34 = vmul.f32 %v6766_v60, %v6766_v60  ;;  %v2092_v53 = vadd.f32 %v6617_v45, %v7356_v11 }
 0x204   : > { %v2975_v41 = vmul.f32 %v6764_v22, %v6764_v22  ;;  %v2634_v51 = vadd.f32 %v2547_v40, %v2360_v49  ;;  %v2937_v19 = vadd.f32 %v2936_v58, %v6764_v22  ;;  %v3005_v25 = vadd.f32 %v3004_v5, %v2974_v44 }
 0x205   : > { %v2821_v50 = vpop.f32.mrf.mxu0  ;;  %v4654_v55 = vpop.f32.mrf.mxu1  ;;  %v6781_v1 = vadd.f32 %v4731_v17, %v2635_v21 }
 0x206   : > { %v6776_v59 = vadd.f32 %v2821_v50, %v2634_v51  ;;  %v2637_v30 = vadd.f32 %v4654_v55, %v6605_v4  ;;  %v3006_v26 = vadd.f32 %v3005_v25, %v2975_v41  ;;  %v2938_v39 = vadd.f32 %v2937_v19, %v6766_v60  ;;  %v7355_v4 = vld [vmem:[#allocation21_spill] sm:$0xff] }
 0x207   : > { %v4734_v56 = vpop.f32.mrf.mxu0  ;;  %v2557_v27 = vpop.f32.mrf.mxu1  ;;  %v2364_v3 = vadd.f32 %v7355_v4, %v2090_v12  ;;  %v2978_v57 = vmul.f32 %v6781_v1, %v6781_v1  ;;  %v2366_v41 = vadd.f32 %v6621_v46, %v2092_v53  ;;  %v7358_v51 = vld [vmem:[#allocation17_spill] sm:$0xff] }
 0x208   : > { %v2977_v36 = vmul.f32 %v6776_v59, %v6776_v59  ;;  %v2636_v29 = vadd.f32 %v2557_v27, %v2362_v47  ;;  %v2939_v14 = vadd.f32 %v2938_v39, %v6776_v59  ;;  %v3007_v28 = vadd.f32 %v3006_v26, %v2976_v34 }
 0x209   : > { %v2831_v48 = vpop.f32.mrf.mxu0  ;;  %v4657_v7 = vpop.f32.mrf.mxu1  ;;  %v6790_v31 = vadd.f32 %v4734_v56, %v2637_v30  ;;  %v2094_v19 = vadd.f32 %v6624_v23, %v7358_v51  ;;  %v7359_v30 = vld [vmem:[#allocation22_spill] sm:$0xff] }
 0x20a   : > { %v6792_v8 = vadd.f32 %v2831_v48, %v2636_v29  ;;  %v3008_v18 = vadd.f32 %v3007_v28, %v2977_v36  ;;  %v2940_v33 = vadd.f32 %v2939_v14, %v6781_v1  ;;  %v2639_v49 = vadd.f32 %v4657_v7, %v7357_v13  ;;  %v7360_v14 = vld [vmem:[#allocation24_spill] sm:$0xff]  ;;  %v7361_v48 = vld [vmem:[#allocation18_spill] sm:$0xff] }
 0x20b   : > { %v4737_v2 = vpop.f32.mrf.mxu0  ;;  %v2567_v44 = vpop.f32.mrf.mxu1  ;;  %v2980_v25 = vmul.f32 %v6790_v31, %v6790_v31  ;;  %v2368_v28 = vadd.f32 %v7360_v14, %v2094_v19  ;;  %v2096_v7 = vadd.f32 %v6631_v43, %v7361_v48 }
 0x20c   : > { %v2979_v5 = vmul.f32 %v6792_v8, %v6792_v8  ;;  %v2638_v58 = vadd.f32 %v2567_v44, %v2364_v3  ;;  %v2941_v45 = vadd.f32 %v2940_v33, %v6792_v8  ;;  %v3009_v21 = vadd.f32 %v3008_v18, %v2978_v57  ;;  %v7362_v3 = vld [vmem:[#allocation23_spill] sm:$0xff] }
 0x20d   : > { %v2841_v17 = vpop.f32.mrf.mxu0  ;;  %v4660_v40 = vpop.f32.mrf.mxu1  ;;  %v6808_v47 = vadd.f32 %v4737_v2, %v2639_v49 }
 0x20e   : > { %v6806_v50 = vadd.f32 %v2841_v17, %v2638_v58  ;;  %v3010_v55 = vadd.f32 %v3009_v21, %v2979_v5  ;;  %v2942_v12 = vadd.f32 %v2941_v45, %v6790_v31  ;;  %v2641_v34 = vadd.f32 %v4660_v40, %v7359_v30  ;;  %v7363_v21 = vld [vmem:[#allocation26_spill] sm:$0xff]  ;;  %v7364_v40 = vld [vmem:[#allocation19_spill] sm:$0xff]  ;;  %v7365_v30 = vld [vmem:[#allocation25_spill] sm:$0xff] }
 0x20f   : > { %v4740_v26 = vpop.f32.mrf.mxu0  ;;  %v2577_v39 = vpop.f32.mrf.mxu1  ;;  %v2982_v53 = vmul.f32 %v6808_v47, %v6808_v47  ;;  %v2370_v17 = vadd.f32 %v7363_v21, %v2096_v7 }
 0x210   : > { %v2981_v46 = vmul.f32 %v6806_v50, %v6806_v50  ;;  %v2640_v56 = vadd.f32 %v2577_v39, %v2366_v41  ;;  %v2943_v23 = vadd.f32 %v2942_v12, %v6806_v50  ;;  %v3011_v27 = vadd.f32 %v3010_v55, %v2980_v25 }
 0x211   : > { %v2851_v36 = vpop.f32.mrf.mxu0  ;;  %v4663_v29 = vpop.f32.mrf.mxu1  ;;  %v6823_v18 = vadd.f32 %v4740_v26, %v2641_v34  ;;  %v2098_v41 = vadd.f32 %v6640_v42, %v7364_v40 }
 0x212   : > { %v6818_v4 = vadd.f32 %v2851_v36, %v2640_v56  ;;  %v2643_v11 = vadd.f32 %v4663_v29, %v7362_v3  ;;  %v3012_v57 = vadd.f32 %v3011_v27, %v2981_v46  ;;  %v2944_v33 = vadd.f32 %v2943_v23, %v6808_v47 }
 0x213   : > { %v4743_v13 = vpop.f32.mrf.mxu0  ;;  %v2587_v49 = vpop.f32.mrf.mxu1  ;;  %v2984_v25 = vmul.f32 %v6823_v18, %v6823_v18  ;;  %v2372_v29 = vadd.f32 %v6644_v32, %v2098_v41 }
 0x214   : > { %v2983_v2 = vmul.f32 %v6818_v4, %v6818_v4  ;;  %v2642_v44 = vadd.f32 %v2587_v49, %v2368_v28  ;;  %v2945_v43 = vadd.f32 %v2944_v33, %v6818_v4  ;;  %v3013_v5 = vadd.f32 %v3012_v57, %v2982_v53 }
 0x215   : > { %v2861_v58 = vpop.f32.mrf.mxu0  ;;  %v4666_v45 = vpop.f32.mrf.mxu1  ;;  %v6832_v51 = vadd.f32 %v4743_v13, %v2643_v11  ;;  %v7366_v11 = vld [vmem:[#allocation27_spill] sm:$0xff] }
 0x216   : > { %v6834_v19 = vadd.f32 %v2861_v58, %v2642_v44  ;;  %v3014_v55 = vadd.f32 %v3013_v5, %v2983_v2  ;;  %v2946_v12 = vadd.f32 %v2945_v43, %v6823_v18  ;;  %v2645_v34 = vadd.f32 %v4666_v45, %v7365_v30 }
 0x217   : > { %v4746_v26 = vpop.f32.mrf.mxu0  ;;  %v2597_v39 = vpop.f32.mrf.mxu1  ;;  %v2986_v14 = vmul.f32 %v6832_v51, %v6832_v51 }
 0x218   : > { %v2985_v46 = vmul.f32 %v6834_v19, %v6834_v19  ;;  %v2644_v56 = vadd.f32 %v2597_v39, %v2370_v17  ;;  %v2947_v42 = vadd.f32 %v2946_v12, %v6834_v19  ;;  %v3015_v23 = vadd.f32 %v3014_v55, %v2984_v25 }
 0x219   : > { %v2871_v27 = vpop.f32.mrf.mxu0  ;;  %v4669_v36 = vpop.f32.mrf.mxu1  ;;  %v6848_v7 = vadd.f32 %v4746_v26, %v2645_v34 }
 0x21a   : > { %v6846_v28 = vadd.f32 %v2871_v27, %v2644_v56  ;;  %v3016_v48 = vadd.f32 %v3015_v23, %v2985_v46  ;;  %v2948_v3 = vadd.f32 %v2947_v42, %v6832_v51  ;;  %v2647_v53 = vadd.f32 %v4669_v36, %v7366_v11 }
 0x21b   : > { %v4749_v57 = vpop.f32.mrf.mxu0  ;;  %v2607_v33 = vpop.f32.mrf.mxu1  ;;  %v2988_v5 = vmul.f32 %v6848_v7, %v6848_v7 }
 0x21c   : > { %v2987_v13 = vmul.f32 %v6846_v28, %v6846_v28  ;;  %v2646_v49 = vadd.f32 %v2607_v33, %v2372_v29  ;;  %v2949_v32 = vadd.f32 %v2948_v3, %v6846_v28  ;;  %v3017_v2 = vadd.f32 %v3016_v48, %v2986_v14 }
 0x21d   : > { %v2881_v44 = vpop.f32.mrf.mxu0  ;;  %v6859_v45 = vadd.f32 %v4749_v57, %v2647_v53 }
 0x21e   : > { %v6855_v43 = vadd.f32 %v2881_v44, %v2646_v49  ;;  %v3018_v58 = vadd.f32 %v3017_v2, %v2987_v13  ;;  %v2950_v21 = vadd.f32 %v2949_v32, %v6848_v7  ;;  %v3033_v49 = vld [vmem:[%s7181_s2] sm:$0x1]  ;;  %v7367_v32 = vld [vmem:[#allocation9_spill] sm:$0xff] }
 0x21f   : > { %v2990_v25 = vmul.f32 %v6859_v45, %v6859_v45  ;;  %v3043_v2 = vsub.s32 0, %v7367_v32 }
 0x220   : > { %v2989_v17 = vmul.f32 %v6855_v43, %v6855_v43  ;;  %v2951_v40 = vadd.f32 %v2950_v21, %v6855_v43  ;;  %v3019_v41 = vadd.f32 %v3018_v58, %v2988_v5  ;;  %v3037_v58 = vld [vmem:[%s7182_s3] sm:$0x1] }
 0x222   : > { %v2952_v55 = vadd.f32 %v2951_v40, %v6859_v45  ;;  %v3020_v12 = vadd.f32 %v3019_v41, %v2989_v17 }
 0x224   : > { %v2953_v30 = vrot.slane %v2952_v55, 4  ;;  %v3021_v34 = vadd.f32 %v3020_v12, %v2990_v25 }
 0x226   : > { %v2954_v26 = vadd.f32 %v2953_v30, %v2952_v55  ;;  %v3022_v39 = vrot.slane %v3021_v34, 4 }
 0x228   : > { %v2955_v46 = vrot.slane %v2954_v26, 2  ;;  %v3023_v56 = vadd.f32 %v3022_v39, %v3021_v34 }
 0x22a   : > { %v2956_v42 = vadd.f32 %v2955_v46, %v2954_v26  ;;  %v3024_v23 = vrot.slane %v3023_v56, 2 }
 0x22c   : > { %v2957_v27 = vrot.slane %v2956_v42, 1  ;;  %v3025_v36 = vadd.f32 %v3024_v23, %v3023_v56 }
 0x22e   : > { %v2958_v29 = vadd.f32 %v2957_v27, %v2956_v42  ;;  %v3026_v14 = vrot.slane %v3025_v36, 1 }
 0x230   : > { %v3027_v48 = vadd.f32 %v3026_v14, %v3025_v36  ;;  %v3028_v3 = vmul.f32 0.00390625, %v2958_v29 }
 0x232   : > { %v3029_v11 = vmul.f32 0.00390625, %v3027_v48  ;;  %v3030_v53 = vmul.f32 %v3028_v3, %v3028_v3 }
 0x234   : > { %v3031_v57 = vsub.f32 %v3029_v11, %v3030_v53 }
 0x236   : > { %v3032_v33 = vmax.f32 %v3031_v57, 0.0 }
 0x238   : > { %v3034_v13 = vadd.f32 1e-05, %v3032_v33 }
 0x23a   : > { %4807 = vrsqrt.f32 %v3034_v13 }
 0x247   : > { %v4808_v44 = vpop.eup %4807 }
 0x248   : > { %v3036_v5 = vmul.f32 %v4808_v44, %v3033_v49 }
 0x24a   : > { %v3038_v21 = vmul.f32 %v3036_v5, %v3028_v3  ;;  %v3044_v17 = vrot.slane %v3036_v5, %v3043_v2 }
 0x24c   : > { %v3039_v40 = vsub.f32 %v3037_v58, %v3038_v21  ;;  %v3046_v41 = vmul.f32 %v3044_v17, %v6655_v6  ;;  %v3047_v25 = vmul.f32 %v3044_v17, %v6652_v62  ;;  %v3048_v55 = vmul.f32 %v3044_v17, %v6669_v63 }
 0x24d   : > { %v3049_v12 = vmul.f32 %v3044_v17, %v6667_v9  ;;  %v3050_v30 = vmul.f32 %v3044_v17, %v6680_v37  ;;  %v3051_v34 = vmul.f32 %v3044_v17, %v6676_v24  ;;  %v3052_v26 = vmul.f32 %v3044_v17, %v6695_v0 }
 0x24e   : > { %v3053_v39 = vmul.f32 %v3044_v17, %v6693_v10  ;;  %v3054_v46 = vmul.f32 %v3044_v17, %v6711_v20  ;;  %v3055_v56 = vmul.f32 %v3044_v17, %v6708_v52  ;;  %v3056_v6 = vmul.f32 %v3044_v17, %v6722_v15 }
 0x24f   : > { %v3057_v62 = vmul.f32 %v3044_v17, %v6724_v54  ;;  %v3058_v63 = vmul.f32 %v3044_v17, %v6734_v35  ;;  %v3059_v9 = vmul.f32 %v3044_v17, %v6739_v61  ;;  %v3060_v37 = vmul.f32 %v3044_v17, %v6750_v16 }
 0x250   : > { %v3061_v24 = vmul.f32 %v3044_v17, %v6748_v38  ;;  %v3062_v0 = vmul.f32 %v3044_v17, %v6764_v22  ;;  %v3063_v10 = vmul.f32 %v3044_v17, %v6766_v60  ;;  %v3064_v20 = vmul.f32 %v3044_v17, %v6776_v59 }
 0x251   : > { %v3070_v52 = vmul.f32 %v3044_v17, %v6818_v4  ;;  %v3072_v15 = vmul.f32 %v3044_v17, %v6834_v19  ;;  %v3073_v54 = vmul.f32 %v3044_v17, %v6832_v51  ;;  %v3074_v35 = vmul.f32 %v3044_v17, %v6846_v28 }
 0x252   : > { %v3075_v61 = vmul.f32 %v3044_v17, %v6848_v7  ;;  %v3076_v16 = vmul.f32 %v3044_v17, %v6855_v43  ;;  %v3065_v38 = vmul.f32 %v3044_v17, %v6781_v1  ;;  %v3066_v22 = vmul.f32 %v3044_v17, %v6792_v8 }
 0x253   : > { %v3077_v60 = vmul.f32 %v3044_v17, %v6859_v45  ;;  %v3082_v42 = vrot.slane %v3039_v40, %v3043_v2  ;;  %v3067_v59 = vmul.f32 %v3044_v17, %v6790_v31  ;;  %v3068_v4 = vmul.f32 %v3044_v17, %v6806_v50 }
 0x254   : > { %v3069_v19 = vmul.f32 %v3044_v17, %v6808_v47  ;;  %v3071_v51 = vmul.f32 %v3044_v17, %v6823_v18 }
 0x255   : > { %v6907_v28 = vadd.f32 %v3082_v42, %v3046_v41  ;;  %v6909_v7 = vadd.f32 %v3082_v42, %v3047_v25  ;;  %v6911_v43 = vadd.f32 %v3082_v42, %v3048_v55  ;;  %v6913_v1 = vadd.f32 %v3082_v42, %v3049_v12 }
 0x256   : > { %v6915_v8 = vadd.f32 %v3082_v42, %v3050_v30  ;;  %v6917_v45 = vadd.f32 %v3082_v42, %v3051_v34  ;;  %v6919_v23 = vadd.f32 %v3082_v42, %v3052_v26  ;;  %v6921_v31 = vadd.f32 %v3082_v42, %v3053_v39 }
 0x257   : > { %v6923_v50 = vadd.f32 %v3082_v42, %v3054_v46  ;;  %v6925_v47 = vadd.f32 %v3082_v42, %v3055_v56  ;;  %v6927_v18 = vadd.f32 %v3082_v42, %v3056_v6  ;;  %v6929_v27 = vadd.f32 %v3082_v42, %v3057_v62 }
 0x258   : > { %v6931_v36 = vadd.f32 %v3082_v42, %v3058_v63  ;;  %v6933_v29 = vadd.f32 %v3082_v42, %v3059_v9  ;;  %v6935_v14 = vadd.f32 %v3082_v42, %v3060_v37  ;;  %v6937_v48 = vadd.f32 %v3082_v42, %v3061_v24 }
 0x259   : > { %v6939_v3 = vadd.f32 %v3082_v42, %v3062_v0  ;;  %v6941_v11 = vadd.f32 %v3082_v42, %v3063_v10  ;;  %v6943_v53 = vadd.f32 %v3082_v42, %v3064_v20  ;;  %v6945_v57 = vadd.f32 %v3082_v42, %v3065_v38 }
 0x25a   : > { %v6947_v33 = vadd.f32 %v3082_v42, %v3066_v22  ;;  %v6949_v13 = vadd.f32 %v3082_v42, %v3067_v59  ;;  %v6951_v49 = vadd.f32 %v3082_v42, %v3068_v4  ;;  %v6953_v32 = vadd.f32 %v3082_v42, %v3069_v19 }
 0x25b   : > { %v6955_v2 = vadd.f32 %v3082_v42, %v3070_v52  ;;  %v6957_v44 = vadd.f32 %v3082_v42, %v3071_v51  ;;  %v6959_v5 = vadd.f32 %v3082_v42, %v3072_v15  ;;  %v6961_v58 = vadd.f32 %v3082_v42, %v3073_v54 }
 0x25c   : > { %v6963_v21 = vadd.f32 %v3082_v42, %v3074_v35  ;;  %v6965_v17 = vadd.f32 %v3082_v42, %v3075_v61  ;;  %v6967_v40 = vadd.f32 %v3082_v42, %v3076_v16  ;;  %v6969_v41 = vadd.f32 %v3082_v42, %v3077_v60 }
 0x25d   : > { %vm3116_vm4 = vcmp.ge.f32.partialorder %v6907_v28, 0.0  ;;  %vm3117_vm5 = vcmp.ge.f32.partialorder %v6909_v7, 0.0  ;;  %vm3118_vm6 = vcmp.ge.f32.partialorder %v6911_v43, 0.0  ;;  %vm3119_vm7 = vcmp.ge.f32.partialorder %v6913_v1, 0.0 }
 0x25e   : > { %vm3120_vm8 = vcmp.ge.f32.partialorder %v6915_v8, 0.0  ;;  %vm3121_vm9 = vcmp.ge.f32.partialorder %v6917_v45, 0.0  ;;  %vm3122_vm10 = vcmp.ge.f32.partialorder %v6919_v23, 0.0  ;;  %vm3123_vm11 = vcmp.ge.f32.partialorder %v6921_v31, 0.0 }
 0x25f   : > { %vm3124_vm12 = vcmp.ge.f32.partialorder %v6923_v50, 0.0  ;;  %v3148_v25 = vmul.f32 0.01, %v6907_v28  ;;  %v3149_v55 = vmul.f32 0.01, %v6909_v7  ;;  %vm3131_vm3 = vcmp.ge.f32.partialorder %v6937_v48, 0.0 }
 0x260   : > { %v3150_v12 = vmul.f32 0.01, %v6911_v43  ;;  %vm3132_vm13 = vcmp.ge.f32.partialorder %v6939_v3, 0.0  ;;  %v3151_v30 = vmul.f32 0.01, %v6913_v1  ;;  %vm3137_vm2 = vcmp.ge.f32.partialorder %v6949_v13, 0.0 }
 0x261   : > { %v3152_v34 = vmul.f32 0.01, %v6915_v8  ;;  %v3153_v26 = vmul.f32 0.01, %v6917_v45  ;;  %v3154_v39 = vmul.f32 0.01, %v6919_v23  ;;  %v3180_v6 = vsel %vm3116_vm4, %v6907_v28, %v3148_v25 }
 0x262   : > { %v3155_v46 = vmul.f32 0.01, %v6921_v31  ;;  %v3156_v56 = vmul.f32 0.01, %v6923_v50  ;;  %vm3138_vm14 = vcmp.ge.f32.partialorder %v6951_v49, 0.0  ;;  %v3181_v37 = vsel %vm3117_vm5, %v6909_v7, %v3149_v55  ;;  %3212 = vst [vmem:[%s6986_s8] sm:$0xff] %v3180_v6 }
 0x263   : > { %v3157_v62 = vmul.f32 0.01, %v6925_v47  ;;  %v3158_v63 = vmul.f32 0.01, %v6927_v18  ;;  %v3159_v9 = vmul.f32 0.01, %v6929_v27  ;;  %v3182_v20 = vsel %vm3118_vm6, %v6911_v43, %v3150_v12 }
 0x264   : > { %vm3142_vm4 = vcmp.ge.f32.partialorder %v6959_v5, 0.0  ;;  %vm3144_vm0 = vcmp.ge.f32.partialorder %v6963_v21, 0.0  ;;  %vm3145_vm15 = vcmp.ge.f32.partialorder %v6965_v17, 0.0  ;;  %v3160_v24 = vmul.f32 0.01, %v6931_v36  ;;  %3213 = vst [vmem:[%s6986_s8 + $0x8] sm:$0xff] %v3181_v37 }
 0x265   : > { %v3161_v0 = vmul.f32 0.01, %v6933_v29  ;;  %v3162_v10 = vmul.f32 0.01, %v6935_v14  ;;  %vm3146_vm5 = vcmp.ge.f32.partialorder %v6967_v40, 0.0  ;;  %vm3147_vm1 = vcmp.ge.f32.partialorder %v6969_v41, 0.0 }
 0x266   : > { %v3163_v52 = vmul.f32 0.01, %v6937_v48  ;;  %v3164_v15 = vmul.f32 0.01, %v6939_v3  ;;  %v3165_v54 = vmul.f32 0.01, %v6941_v11  ;;  %v3183_v35 = vsel %vm3119_vm7, %v6913_v1, %v3151_v30 }
 0x267   : > { %3214 = vst [vmem:[%s6986_s8 + $0x10] sm:$0xff] %v3182_v20  ;;  %v3166_v61 = vmul.f32 0.01, %v6943_v53  ;;  %v3167_v16 = vmul.f32 0.01, %v6945_v57  ;;  %v3184_v22 = vsel %vm3120_vm8, %v6915_v8, %v3152_v34  ;;  %3215 = vst [vmem:[%s6986_s8 + $0x18] sm:$0xff] %v3183_v35  ;;  %v3185_v4 = vsel %vm3121_vm9, %v6917_v45, %v3153_v26 }
 0x268   : > { %v3168_v38 = vmul.f32 0.01, %v6947_v33  ;;  %v3169_v60 = vmul.f32 0.01, %v6949_v13  ;;  %v3170_v42 = vmul.f32 0.01, %v6951_v49  ;;  %v3186_v7 = vsel %vm3122_vm10, %v6919_v23, %v3154_v39 }
 0x269   : > { %v3171_v59 = vmul.f32 0.01, %v6953_v32  ;;  %3216 = vst [vmem:[%s6986_s8 + $0x20] sm:$0xff] %v3184_v22  ;;  %v3172_v19 = vmul.f32 0.01, %v6955_v2  ;;  %3217 = vst [vmem:[%s6986_s8 + $0x28] sm:$0xff] %v3185_v4  ;;  %v3187_v45 = vsel %vm3123_vm11, %v6921_v31, %v3155_v46  ;;  %v3188_v55 = vsel %vm3124_vm12, %v6923_v50, %v3156_v56 }
 0x26a   : > { %v3173_v51 = vmul.f32 0.01, %v6957_v44  ;;  %v3174_v28 = vmul.f32 0.01, %v6959_v5  ;;  %v3175_v43 = vmul.f32 0.01, %v6961_v58 }
 0x26b   : > { %v3176_v1 = vmul.f32 0.01, %v6963_v21  ;;  %v3177_v8 = vmul.f32 0.01, %v6965_v17  ;;  %3218 = vst [vmem:[%s6986_s8 + $0x30] sm:$0xff] %v3186_v7  ;;  %vm7368_vm6 = vcmp.ge.f32.partialorder %v6925_v47, 0.0 }
 0x26c   : > { %v3178_v25 = vmul.f32 0.01, %v6967_v40  ;;  %v3179_v23 = vmul.f32 0.01, %v6969_v41  ;;  %v3189_v12 = vsel %vm7368_vm6, %v6925_v47, %v3157_v62  ;;  %3219 = vst [vmem:[%s6986_s8 + $0x38] sm:$0xff] %v3187_v45  ;;  %vm7369_vm7 = vcmp.ge.f32.partialorder %v6927_v18, 0.0 }
 0x26d   : > { %v3190_v31 = vsel %vm7369_vm7, %v6927_v18, %v3158_v63  ;;  %vm7370_vm8 = vcmp.ge.f32.partialorder %v6929_v27, 0.0  ;;  %vm7371_vm9 = vcmp.ge.f32.partialorder %v6931_v36, 0.0  ;;  %vm7372_vm10 = vcmp.ge.f32.partialorder %v6933_v29, 0.0  ;;  %3220 = vst [vmem:[%s6986_s8 + $0x40] sm:$0xff] %v3188_v55  ;;  %3221 = vst [vmem:[%s6986_s8 + $0x48] sm:$0xff] %v3189_v12 }
 0x26e   : > { %v3191_v30 = vsel %vm7370_vm8, %v6929_v27, %v3159_v9  ;;  %v3192_v34 = vsel %vm7371_vm9, %v6931_v36, %v3160_v24  ;;  %v3193_v50 = vsel %vm7372_vm10, %v6933_v29, %v3161_v0  ;;  %vm7373_vm11 = vcmp.ge.f32.partialorder %v6935_v14, 0.0  ;;  %3222 = vst [vmem:[%s6986_s8 + $0x50] sm:$0xff] %v3190_v31 }
 0x26f   : > { %v3194_v47 = vsel %vm7373_vm11, %v6935_v14, %v3162_v10  ;;  %v3195_v18 = vsel %vm3131_vm3, %v6937_v48, %v3163_v52  ;;  %v3196_v27 = vsel %vm3132_vm13, %v6939_v3, %v3164_v15  ;;  %vm7374_vm12 = vcmp.ge.f32.partialorder %v6941_v11, 0.0  ;;  %3223 = vst [vmem:[%s6986_s8 + $0x58] sm:$0xff] %v3191_v30  ;;  %3224 = vst [vmem:[%s6986_s8 + $0x60] sm:$0xff] %v3192_v34 }
 0x270   : > { %v3197_v36 = vsel %vm7374_vm12, %v6941_v11, %v3165_v54  ;;  %3225 = vst [vmem:[%s6986_s8 + $0x68] sm:$0xff] %v3193_v50  ;;  %vm7375_vm6 = vcmp.ge.f32.partialorder %v6943_v53, 0.0  ;;  %vm7376_vm3 = vcmp.ge.f32.partialorder %v6945_v57, 0.0  ;;  %vm7377_vm13 = vcmp.ge.f32.partialorder %v6947_v33, 0.0  ;;  %3226 = vst [vmem:[%s6986_s8 + $0x70] sm:$0xff] %v3194_v47 }
 0x271   : > { %v3198_v29 = vsel %vm7375_vm6, %v6943_v53, %v3166_v61  ;;  %v3199_v14 = vsel %vm7376_vm3, %v6945_v57, %v3167_v16  ;;  %v3200_v48 = vsel %vm7377_vm13, %v6947_v33, %v3168_v38  ;;  %v3201_v3 = vsel %vm3137_vm2, %v6949_v13, %v3169_v60  ;;  %3227 = vst [vmem:[%s6986_s8 + $0x78] sm:$0xff] %v3195_v18 }
 0x272   : > { %3228 = vst [vmem:[%s6986_s8 + $0x80] sm:$0xff] %v3196_v27  ;;  %3229 = vst [vmem:[%s6986_s8 + $0x88] sm:$0xff] %v3197_v36  ;;  %v3202_v11 = vsel %vm3138_vm14, %v6951_v49, %v3170_v42  ;;  %vm7378_vm7 = vcmp.ge.f32.partialorder %v6953_v32, 0.0  ;;  %vm7379_vm8 = vcmp.ge.f32.partialorder %v6955_v2, 0.0  ;;  %vm7380_vm2 = vcmp.ge.f32.partialorder %v6957_v44, 0.0 }
 0x273   : > { %v3203_v53 = vsel %vm7378_vm7, %v6953_v32, %v3171_v59  ;;  %v3204_v57 = vsel %vm7379_vm8, %v6955_v2, %v3172_v19  ;;  %v3205_v33 = vsel %vm7380_vm2, %v6957_v44, %v3173_v51  ;;  %3230 = vst [vmem:[%s6986_s8 + $0x90] sm:$0xff] %v3198_v29  ;;  %3231 = vst [vmem:[%s6986_s8 + $0x98] sm:$0xff] %v3199_v14  ;;  %vm7381_vm14 = vcmp.ge.f32.partialorder %v6961_v58, 0.0 }
 0x274   : > { %3232 = vst [vmem:[%s6986_s8 + $0xa0] sm:$0xff] %v3200_v48  ;;  %3233 = vst [vmem:[%s6986_s8 + $0xa8] sm:$0xff] %v3201_v3  ;;  %v3206_v13 = vsel %vm3142_vm4, %v6959_v5, %v3174_v28  ;;  %v3207_v49 = vsel %vm7381_vm14, %v6961_v58, %v3175_v43  ;;  %v3208_v32 = vsel %vm3144_vm0, %v6963_v21, %v3176_v1 }
 0x275   : > { %v3209_v2 = vsel %vm3145_vm15, %v6965_v17, %v3177_v8  ;;  %3234 = vst [vmem:[%s6986_s8 + $0xb0] sm:$0xff] %v3202_v11  ;;  %3235 = vst [vmem:[%s6986_s8 + $0xb8] sm:$0xff] %v3203_v53  ;;  %v3210_v44 = vsel %vm3146_vm5, %v6967_v40, %v3178_v25  ;;  %v3211_v5 = vsel %vm3147_vm1, %v6969_v41, %v3179_v23 }
 0x276   : > { %3236 = vst [vmem:[%s6986_s8 + $0xc0] sm:$0xff] %v3204_v57  ;;  %3237 = vst [vmem:[%s6986_s8 + $0xc8] sm:$0xff] %v3205_v33 }
 0x277   : > { %3238 = vst [vmem:[%s6986_s8 + $0xd0] sm:$0xff] %v3206_v13  ;;  %3239 = vst [vmem:[%s6986_s8 + $0xd8] sm:$0xff] %v3207_v49 }
 0x278   : > { %3240 = vst [vmem:[%s6986_s8 + $0xe0] sm:$0xff] %v3208_v32  ;;  %3241 = vst [vmem:[%s6986_s8 + $0xe8] sm:$0xff] %v3209_v2 }
 0x279   : > { %3242 = vst [vmem:[%s6986_s8 + $0xf0] sm:$0xff] %v3210_v44  ;;  %3243 = vst [vmem:[%s6986_s8 + $0xf8] sm:$0xff] %v3211_v5 }
 0x27a PF: > { %s14_s17 = sadd.s32 1, %s4860_s17   ;;  %s7382_s15 = smov %s4856_s16 }
 0x27b   : > { %p11_p5 = scmp.ge.s32.totalorder %s14_s17, 4   ;;  %s7383_s16 = smov %s7385_s18 }
 0x27d   :  { %13 = sbr.rel (!%p11_p5) target bundleno = 2 (0x2), region = 84 }

</bundles_post_ra>
